<compile_context>
chip_gen: v7x
topology: tpu7x:2x2x1
jax: 0.10.0
libtpu: 0.0.40
codegen_flags: <defaults>
</compile_context>

<pallas_src>
import math
import jax
import jax.numpy as jnp
from jax.experimental import pallas as pl

# ---- config (small, consistent with the module) ----
B = 2                       # batch
S = 8                       # pad_size / sequence length
D_HEADER = 4
D_SL = 28
D_MODEL = D_HEADER + D_SL   # 32
NHEAD = 4
HEAD_DIM = D_MODEL // NHEAD # 8
DIM_FF = 2048               # nn.TransformerEncoderLayer default
NUM_LAYERS = 2
CLASSES = 5
MAX_TIME_POSITION = 64
LN_EPS = 1e-5
M = B * S                   # 16 rows: batch folded into the matmul M dim
WN = NHEAD * M              # 64: all-head ("wide") score lanes
NEG = -1e30                 # additive mask value; keep f32 (bf16 cast would risk -inf/NaN)

# rows of the packed f32 "vec" slab (per layer); layer slot NUM_LAYERS row 0 holds fc bias
R_BQKV, R_BO, R_LN1W, R_LN1B, R_B1, R_B2, R_LN2W, R_LN2B = range(8)
R_FCB = 0


# --------------------------------------------------------------------------
# Fused Pallas kernel
# --------------------------------------------------------------------------
def _layernorm(x, w, b):
    mu = jnp.mean(x, axis=-1, keepdims=True)
    var = jnp.mean((x - mu) ** 2, axis=-1, keepdims=True)
    return (x - mu) * jax.lax.rsqrt(var + LN_EPS) * w + b


def fused_forward_kernel(xin_ref, wqkv_ref, wofc_ref, w1_ref, w2_ref, vec_ref, out_ref):
    # packed activation input: rows [0:M) = concat(header,sl)+PE, rows [M:2M) = wide attn bias
    x = xin_ref[0:M, 0:D_MODEL]                       # (M, D) f32
    bias = xin_ref[M:2 * M, :]                        # (M, WN) f32, -1e30 at pad / cross-batch
    scale = 1.0 / math.sqrt(HEAD_DIM)

    # hoisted head / block masks (emitted once; reused by both layers)
    lane_d = jax.lax.broadcasted_iota(jnp.int32, (1, D_MODEL), 1)
    head_mask = [((lane_d >= h * HEAD_DIM) & (lane_d < (h + 1) * HEAD_DIM)).astype(jnp.bfloat16)
                 for h in range(NHEAD)]
    lane_w = jax.lax.broadcasted_iota(jnp.int32, (1, WN), 1)
    blk_mask = [(lane_w >= h * M) & (lane_w < (h + 1) * M) for h in range(NHEAD)]

    for l in range(NUM_LAYERS):                       # static unroll
        # --- multi-head self-attention: 2 wide MXU matmuls cover all 4 heads ---
        qkv = (jnp.dot(x.astype(jnp.bfloat16), wqkv_ref[l], preferred_element_type=jnp.float32)
               + vec_ref[l, R_BQKV:R_BQKV + 1, 0:3 * D_MODEL])                      # (M, 3D)
        q = qkv[:, 0 * D_MODEL:1 * D_MODEL].astype(jnp.bfloat16)
        k = qkv[:, 1 * D_MODEL:2 * D_MODEL].astype(jnp.bfloat16)
        v = qkv[:, 2 * D_MODEL:3 * D_MODEL].astype(jnp.bfloat16)

        # row-block h of the stacks = k/v with only head-h lanes kept (sublane concat is cheap)
        k_stack = jnp.concatenate([k * head_mask[h] for h in range(NHEAD)], axis=0)  # (WN, D)
        v_stack = jnp.concatenate([v * head_mask[h] for h in range(NHEAD)], axis=0)  # (WN, D)

        # all-head scores in one matmul; lane block h = head-h (M, M) scores
        s = (jax.lax.dot_general(q, k_stack, (((1,), (1,)), ((), ())),
                                 preferred_element_type=jnp.float32) * scale + bias)  # (M, WN)

        # per-head (per 16-lane block) numerically stable softmax in the wide layout (VPU/EUP)
        m = jnp.zeros_like(s)
        for h in range(NHEAD):
            m_h = jnp.max(jnp.where(blk_mask[h], s, NEG), axis=-1, keepdims=True)
            m = m + jnp.where(blk_mask[h], m_h, 0.0)
        p = jnp.exp(s - m)
        d = jnp.zeros_like(s)
        for h in range(NHEAD):
            d_h = jnp.sum(jnp.where(blk_mask[h], p, 0.0), axis=-1, keepdims=True)
            d = d + jnp.where(blk_mask[h], d_h, 0.0)
        p = p * pl.reciprocal(d, approx=True)

        # all-head context in one matmul: head-h output lands directly in its lanes
        ctx = jnp.dot(p.astype(jnp.bfloat16), v_stack, preferred_element_type=jnp.float32)  # (M, D)
        attn = (jnp.dot(ctx.astype(jnp.bfloat16), wofc_ref[l], preferred_element_type=jnp.float32)
                + vec_ref[l, R_BO:R_BO + 1, 0:D_MODEL])
        x = _layernorm(x + attn,
                       vec_ref[l, R_LN1W:R_LN1W + 1, 0:D_MODEL],
                       vec_ref[l, R_LN1B:R_LN1B + 1, 0:D_MODEL])

        # --- feed-forward (h1 cast to bf16 right after relu: halves live vregs) ---
        h1 = jnp.maximum(
            jnp.dot(x.astype(jnp.bfloat16), w1_ref[l], preferred_element_type=jnp.float32)
            + vec_ref[l, R_B1:R_B1 + 1, :], 0.0).astype(jnp.bfloat16)               # (M, FF) bf16
        h2 = (jnp.dot(h1, w2_ref[l], preferred_element_type=jnp.float32)
              + vec_ref[l, R_B2:R_B2 + 1, 0:D_MODEL])
        x = _layernorm(x + h2,
                       vec_ref[l, R_LN2W:R_LN2W + 1, 0:D_MODEL],
                       vec_ref[l, R_LN2B:R_LN2B + 1, 0:D_MODEL])

    # --- sum over seq (incl. padded positions): sublane reduction, no f32 matmul ---
    pooled = jnp.sum(x.reshape(B, S, D_MODEL), axis=1)                               # (B, D)
    # final fc: weight lives in the extra "layer" slot of the wo slab (padded to D_MODEL cols)
    y = jnp.dot(pooled.astype(jnp.bfloat16), wofc_ref[NUM_LAYERS],
                preferred_element_type=jnp.float32)                                  # (B, D)
    out_ref[...] = y[:, 0:CLASSES] + vec_ref[NUM_LAYERS, R_FCB:R_FCB + 1, 0:CLASSES]


# --------------------------------------------------------------------------
# Params / wrapper
# --------------------------------------------------------------------------
def _sinusoidal_pe(max_len, d_model):
    position = jnp.arange(max_len, dtype=jnp.float32)[:, None]
    div_term = jnp.exp(jnp.arange(0, d_model, 2, dtype=jnp.float32)
                       * (-math.log(10000.0) / d_model))
    angles = position * div_term
    pe = jnp.zeros((max_len, d_model), dtype=jnp.float32)
    pe = pe.at[:, 0::2].set(jnp.sin(angles))
    pe = pe.at[:, 1::2].set(jnp.cos(angles))
    return pe


def init_params(key):
    pe = _sinusoidal_pe(MAX_TIME_POSITION, D_MODEL)
    batch_id = jnp.repeat(jnp.arange(B), S)                       # (M,)
    params = {
        "pe_bs": jnp.tile(pe[:S], (B, 1)),                        # (M, D_MODEL), PE per row
        "cross": batch_id[:, None] != batch_id[None, :],          # (M, M) cross-batch mask
    }

    wqkv, wo, w1, w2 = [], [], [], []
    # packed f32 vector slab: per-layer rows + one extra slot (fc bias); all slices start at lane 0
    vec = jnp.zeros((NUM_LAYERS + 1, 8, DIM_FF), jnp.float32)
    for l in range(NUM_LAYERS):
        ks = jax.random.split(jax.random.fold_in(key, l), 4)
        # All matmul weights are pre-transposed to "x @ W" form.
        wqkv.append(jax.random.normal(ks[0], (D_MODEL, 3 * D_MODEL), jnp.float32)
                    / math.sqrt(D_MODEL))
        wo.append(jax.random.normal(ks[1], (D_MODEL, D_MODEL), jnp.float32)
                  / math.sqrt(D_MODEL))
        w1.append(jax.random.normal(ks[2], (D_MODEL, DIM_FF), jnp.float32)
                  / math.sqrt(D_MODEL))
        w2.append(jax.random.normal(ks[3], (DIM_FF, D_MODEL), jnp.float32)
                  / math.sqrt(DIM_FF))
        # biases (bqkv, bo, b1, b2, LN biases) stay zero; LN weights are ones
        vec = vec.at[l, R_LN1W, :D_MODEL].set(1.0)
        vec = vec.at[l, R_LN2W, :D_MODEL].set(1.0)

    fc_w = (jax.random.normal(jax.random.fold_in(key, 1000), (D_MODEL, CLASSES), jnp.float32)
            / math.sqrt(D_MODEL))
    # wo slab gets an extra "layer" holding fc weight (zero-padded to D_MODEL output columns)
    wofc = jnp.zeros((NUM_LAYERS + 1, D_MODEL, D_MODEL), jnp.float32)
    wofc = wofc.at[:NUM_LAYERS].set(jnp.stack(wo))
    wofc = wofc.at[NUM_LAYERS, :, :CLASSES].set(fc_w)
    # vec[NUM_LAYERS, R_FCB, :CLASSES] stays zero (fc bias is zero at init)

    params.update({
        "wqkv": jnp.stack(wqkv).astype(jnp.bfloat16),     # (L, 32, 96)
        "wo_fc": wofc.astype(jnp.bfloat16),               # (L+1, 32, 32)
        "w1": jnp.stack(w1).astype(jnp.bfloat16),         # (L, 32, 2048)
        "w2": jnp.stack(w2).astype(jnp.bfloat16),         # (L, 2048, 32)
        "vec": vec,                                       # (L+1, 8, 2048) f32
    })
    return params


@jax.jit
def transformer_predictor_forward(header, sl_sum, mask, time_position, params):
    """TransformerPredictor.forward, mode='ae', tse=False, eval mode.

    header: (B, S, 4) f32, sl_sum: (B, S, 28) f32, mask: (B, S) bool (True = pad),
    time_position: unused (tse=False).
    """
    del time_position
    # concat + positional encoding done here as one fused XLA op (removes 5 DMAs + 2 matmuls
    # from the kernel prologue).
    x0 = (jnp.concatenate([header.reshape(M, D_HEADER), sl_sum.reshape(M, D_SL)], axis=-1)
          + params["pe_bs"])                                                     # (M, D)
    # Additive attention bias: -1e30 at padded keys and cross-batch (i, j) pairs; tiled per head.
    bias = jnp.where(params["cross"] | mask.reshape(1, M), NEG, 0.0).astype(jnp.float32)  # (M, M)
    bias_wide = jnp.tile(bias, (1, NHEAD))                                       # (M, WN)
    # Pack activation + bias into one input (rows 0:M = x0 zero-padded to WN lanes, rows M:2M = bias).
    xin = jnp.concatenate(
        [jnp.pad(x0, ((0, 0), (0, WN - D_MODEL))), bias_wide], axis=0)           # (2M, WN)

    # Single fused pallas_call, no grid: 6 whole-array VMEM-resident inputs (~0.8 MiB total).
    return pl.pallas_call(
        fused_forward_kernel,
        out_shape=jax.ShapeDtypeStruct((B, CLASSES), jnp.float32),
    )(xin, params["wqkv"], params["wo_fc"], params["w1"], params["w2"], params["vec"])


if __name__ == "__main__":
    key = jax.random.PRNGKey(0)
    k_h, k_s, k_p = jax.random.split(key, 3)
    header = jax.random.normal(k_h, (B, S, D_HEADER), dtype=jnp.float32)
    sl_sum = jax.random.normal(k_s, (B, S, D_SL), dtype=jnp.float32)
    # src_key_padding_mask: last two positions of every sequence are padding
    mask = jnp.zeros((B, S), dtype=bool).at[:, -2:].set(True)
    time_position = jnp.zeros((B, S), dtype=jnp.float32)          # unused (tse=False)

    params = init_params(k_p)
    out = transformer_predictor_forward(header, sl_sum, mask, time_position, params)
    out = jax.block_until_ready(out)
    assert out.shape == (B, CLASSES) and out.dtype == jnp.float32
    assert bool(jnp.all(jnp.isfinite(out)))
    print("KERNEL_OK")
</pallas_src>

<mosaic_0001>
module attributes {stable_mosaic.version = 11 : i64} {
  func.func @fused_forward_kernel(%arg0: memref<32x64xf32, #tpu.memory_space<vmem>>, %arg1: memref<2x32x96xbf16, #tpu.memory_space<vmem>>, %arg2: memref<3x32x32xbf16, #tpu.memory_space<vmem>>, %arg3: memref<2x32x2048xbf16, #tpu.memory_space<vmem>>, %arg4: memref<2x2048x32xbf16, #tpu.memory_space<vmem>>, %arg5: memref<3x8x2048xf32, #tpu.memory_space<vmem>>, %arg6: memref<2x5xf32, #tpu.memory_space<vmem>>) attributes {dimension_semantics = [], scalar_prefetch = 0 : i64, scratch_operands = 0 : i64, tpu.core_type = #tpu.core_type<tc>} {
    %c0 = arith.constant 0 : index
    %c0_0 = arith.constant 0 : index
    %0 = vector.load %arg0[%c0, %c0_0] : memref<32x64xf32, #tpu.memory_space<vmem>>, vector<16x32xf32>
    %c16 = arith.constant 16 : index
    %c0_1 = arith.constant 0 : index
    %1 = vector.load %arg0[%c16, %c0_1] : memref<32x64xf32, #tpu.memory_space<vmem>>, vector<16x64xf32>
    %2 = tpu.iota {dimensions = array<i32: 1>} : vector<1x32xi32>
    %c0_i32 = arith.constant 0 : i32
    %3 = vector.broadcast %c0_i32 : i32 to vector<1x32xi32>
    %4 = arith.cmpi sge, %2, %3 : vector<1x32xi32>
    %c8_i32 = arith.constant 8 : i32
    %5 = vector.broadcast %c8_i32 : i32 to vector<1x32xi32>
    %6 = arith.cmpi slt, %2, %5 : vector<1x32xi32>
    %7 = arith.andi %4, %6 : vector<1x32xi1>
    %8 = arith.extui %7 : vector<1x32xi1> to vector<1x32xi32>
    %9 = arith.sitofp %8 : vector<1x32xi32> to vector<1x32xf32>
    %10 = arith.truncf %9 : vector<1x32xf32> to vector<1x32xbf16>
    %c8_i32_2 = arith.constant 8 : i32
    %11 = vector.broadcast %c8_i32_2 : i32 to vector<1x32xi32>
    %12 = arith.cmpi sge, %2, %11 : vector<1x32xi32>
    %c16_i32 = arith.constant 16 : i32
    %13 = vector.broadcast %c16_i32 : i32 to vector<1x32xi32>
    %14 = arith.cmpi slt, %2, %13 : vector<1x32xi32>
    %15 = arith.andi %12, %14 : vector<1x32xi1>
    %16 = arith.extui %15 : vector<1x32xi1> to vector<1x32xi32>
    %17 = arith.sitofp %16 : vector<1x32xi32> to vector<1x32xf32>
    %18 = arith.truncf %17 : vector<1x32xf32> to vector<1x32xbf16>
    %c16_i32_3 = arith.constant 16 : i32
    %19 = vector.broadcast %c16_i32_3 : i32 to vector<1x32xi32>
    %20 = arith.cmpi sge, %2, %19 : vector<1x32xi32>
    %c24_i32 = arith.constant 24 : i32
    %21 = vector.broadcast %c24_i32 : i32 to vector<1x32xi32>
    %22 = arith.cmpi slt, %2, %21 : vector<1x32xi32>
    %23 = arith.andi %20, %22 : vector<1x32xi1>
    %24 = arith.extui %23 : vector<1x32xi1> to vector<1x32xi32>
    %25 = arith.sitofp %24 : vector<1x32xi32> to vector<1x32xf32>
    %26 = arith.truncf %25 : vector<1x32xf32> to vector<1x32xbf16>
    %c24_i32_4 = arith.constant 24 : i32
    %27 = vector.broadcast %c24_i32_4 : i32 to vector<1x32xi32>
    %28 = arith.cmpi sge, %2, %27 : vector<1x32xi32>
    %c32_i32 = arith.constant 32 : i32
    %29 = vector.broadcast %c32_i32 : i32 to vector<1x32xi32>
    %30 = arith.cmpi slt, %2, %29 : vector<1x32xi32>
    %31 = arith.andi %28, %30 : vector<1x32xi1>
    %32 = arith.extui %31 : vector<1x32xi1> to vector<1x32xi32>
    %33 = arith.sitofp %32 : vector<1x32xi32> to vector<1x32xf32>
    %34 = arith.truncf %33 : vector<1x32xf32> to vector<1x32xbf16>
    %35 = tpu.iota {dimensions = array<i32: 1>} : vector<1x64xi32>
    %c0_i32_5 = arith.constant 0 : i32
    %36 = vector.broadcast %c0_i32_5 : i32 to vector<1x64xi32>
    %37 = arith.cmpi sge, %35, %36 : vector<1x64xi32>
    %c16_i32_6 = arith.constant 16 : i32
    %38 = vector.broadcast %c16_i32_6 : i32 to vector<1x64xi32>
    %39 = arith.cmpi slt, %35, %38 : vector<1x64xi32>
    %40 = arith.andi %37, %39 : vector<1x64xi1>
    %c16_i32_7 = arith.constant 16 : i32
    %41 = vector.broadcast %c16_i32_7 : i32 to vector<1x64xi32>
    %42 = arith.cmpi sge, %35, %41 : vector<1x64xi32>
    %c32_i32_8 = arith.constant 32 : i32
    %43 = vector.broadcast %c32_i32_8 : i32 to vector<1x64xi32>
    %44 = arith.cmpi slt, %35, %43 : vector<1x64xi32>
    %45 = arith.andi %42, %44 : vector<1x64xi1>
    %c32_i32_9 = arith.constant 32 : i32
    %46 = vector.broadcast %c32_i32_9 : i32 to vector<1x64xi32>
    %47 = arith.cmpi sge, %35, %46 : vector<1x64xi32>
    %c48_i32 = arith.constant 48 : i32
    %48 = vector.broadcast %c48_i32 : i32 to vector<1x64xi32>
    %49 = arith.cmpi slt, %35, %48 : vector<1x64xi32>
    %50 = arith.andi %47, %49 : vector<1x64xi1>
    %c48_i32_10 = arith.constant 48 : i32
    %51 = vector.broadcast %c48_i32_10 : i32 to vector<1x64xi32>
    %52 = arith.cmpi sge, %35, %51 : vector<1x64xi32>
    %c64_i32 = arith.constant 64 : i32
    %53 = vector.broadcast %c64_i32 : i32 to vector<1x64xi32>
    %54 = arith.cmpi slt, %35, %53 : vector<1x64xi32>
    %55 = arith.andi %52, %54 : vector<1x64xi1>
    %56 = arith.truncf %0 : vector<16x32xf32> to vector<16x32xbf16>
    %c0_11 = arith.constant 0 : index
    %c0_12 = arith.constant 0 : index
    %c0_13 = arith.constant 0 : index
    %57 = vector.load %arg1[%c0_11, %c0_12, %c0_13] : memref<2x32x96xbf16, #tpu.memory_space<vmem>>, vector<1x32x96xbf16>
    %58 = vector.shape_cast %57 : vector<1x32x96xbf16> to vector<32x96xbf16>
    %cst = arith.constant dense<0.000000e+00> : vector<16x96xf32>
    %59 = tpu.matmul %56, %58, %cst {dimension_numbers = #tpu.dot_dimension_numbers<[1], [0], [0], [1], [0, 0, 1, 1], [], []>} : vector<16x32xbf16>, vector<32x96xbf16>, vector<16x96xf32> -> vector<16x96xf32>
    %c0_14 = arith.constant 0 : index
    %c0_15 = arith.constant 0 : index
    %c0_16 = arith.constant 0 : index
    %60 = vector.load %arg5[%c0_14, %c0_15, %c0_16] : memref<3x8x2048xf32, #tpu.memory_space<vmem>>, vector<1x1x96xf32>
    %61 = vector.shape_cast %60 : vector<1x1x96xf32> to vector<1x96xf32>
    %62 = vector.broadcast %61 : vector<1x96xf32> to vector<16x96xf32>
    %63 = arith.addf %59, %62 : vector<16x96xf32>
    %64 = vector.extract_strided_slice %63 {offsets = [0, 0], sizes = [16, 32], strides = [1, 1]} : vector<16x96xf32> to vector<16x32xf32>
    %65 = arith.truncf %64 : vector<16x32xf32> to vector<16x32xbf16>
    %66 = vector.extract_strided_slice %63 {offsets = [0, 32], sizes = [16, 32], strides = [1, 1]} : vector<16x96xf32> to vector<16x32xf32>
    %67 = arith.truncf %66 : vector<16x32xf32> to vector<16x32xbf16>
    %68 = vector.extract_strided_slice %63 {offsets = [0, 64], sizes = [16, 32], strides = [1, 1]} : vector<16x96xf32> to vector<16x32xf32>
    %69 = arith.truncf %68 : vector<16x32xf32> to vector<16x32xbf16>
    %70 = vector.broadcast %10 : vector<1x32xbf16> to vector<16x32xbf16>
    %71 = arith.mulf %67, %70 : vector<16x32xbf16>
    %72 = vector.broadcast %18 : vector<1x32xbf16> to vector<16x32xbf16>
    %73 = arith.mulf %67, %72 : vector<16x32xbf16>
    %74 = vector.broadcast %26 : vector<1x32xbf16> to vector<16x32xbf16>
    %75 = arith.mulf %67, %74 : vector<16x32xbf16>
    %76 = vector.broadcast %34 : vector<1x32xbf16> to vector<16x32xbf16>
    %77 = arith.mulf %67, %76 : vector<16x32xbf16>
    %78 = tpu.concatenate %71, %73, %75, %77 in 0 : vector<16x32xbf16>, vector<16x32xbf16>, vector<16x32xbf16>, vector<16x32xbf16> -> vector<64x32xbf16>
    %79 = vector.broadcast %10 : vector<1x32xbf16> to vector<16x32xbf16>
    %80 = arith.mulf %69, %79 : vector<16x32xbf16>
    %81 = vector.broadcast %18 : vector<1x32xbf16> to vector<16x32xbf16>
    %82 = arith.mulf %69, %81 : vector<16x32xbf16>
    %83 = vector.broadcast %26 : vector<1x32xbf16> to vector<16x32xbf16>
    %84 = arith.mulf %69, %83 : vector<16x32xbf16>
    %85 = vector.broadcast %34 : vector<1x32xbf16> to vector<16x32xbf16>
    %86 = arith.mulf %69, %85 : vector<16x32xbf16>
    %87 = tpu.concatenate %80, %82, %84, %86 in 0 : vector<16x32xbf16>, vector<16x32xbf16>, vector<16x32xbf16>, vector<16x32xbf16> -> vector<64x32xbf16>
    %cst_17 = arith.constant dense<0.000000e+00> : vector<16x64xf32>
    %88 = tpu.matmul %65, %78, %cst_17 {dimension_numbers = #tpu.dot_dimension_numbers<[1], [1], [0], [0], [0, 0, 1, 0], [], []>} : vector<16x32xbf16>, vector<64x32xbf16>, vector<16x64xf32> -> vector<16x64xf32>
    %cst_18 = arith.constant 0.353553385 : f32
    %89 = vector.broadcast %cst_18 : f32 to vector<16x64xf32>
    %90 = arith.mulf %88, %89 : vector<16x64xf32>
    %91 = arith.addf %90, %1 : vector<16x64xf32>
    %cst_19 = arith.constant 0.000000e+00 : f32
    %92 = vector.broadcast %cst_19 : f32 to vector<16x64xf32>
    %cst_20 = arith.constant -1.000000e+30 : f32
    %93 = vector.shape_cast %40 : vector<1x64xi1> to vector<1x64xi1>
    %94 = vector.broadcast %93 : vector<1x64xi1> to vector<16x64xi1>
    %95 = vector.broadcast %cst_20 : f32 to vector<16x64xf32>
    %96 = arith.select %94, %91, %95 : vector<16x64xi1>, vector<16x64xf32>
    %cst_21 = arith.constant dense<0xFF800000> : vector<16xf32>
    %97 = vector.multi_reduction <maximumf>, %96, %cst_21 [1] : vector<16x64xf32> to vector<16xf32>
    %98 = vector.shape_cast %97 : vector<16xf32> to vector<16x1xf32>
    %cst_22 = arith.constant 0.000000e+00 : f32
    %99 = vector.shape_cast %40 : vector<1x64xi1> to vector<1x64xi1>
    %100 = vector.broadcast %99 : vector<1x64xi1> to vector<16x64xi1>
    %101 = vector.shape_cast %98 : vector<16x1xf32> to vector<16x1xf32>
    %102 = vector.broadcast %101 : vector<16x1xf32> to vector<16x64xf32>
    %103 = vector.broadcast %cst_22 : f32 to vector<16x64xf32>
    %104 = arith.select %100, %102, %103 : vector<16x64xi1>, vector<16x64xf32>
    %105 = arith.addf %92, %104 : vector<16x64xf32>
    %cst_23 = arith.constant -1.000000e+30 : f32
    %106 = vector.shape_cast %45 : vector<1x64xi1> to vector<1x64xi1>
    %107 = vector.broadcast %106 : vector<1x64xi1> to vector<16x64xi1>
    %108 = vector.broadcast %cst_23 : f32 to vector<16x64xf32>
    %109 = arith.select %107, %91, %108 : vector<16x64xi1>, vector<16x64xf32>
    %cst_24 = arith.constant dense<0xFF800000> : vector<16xf32>
    %110 = vector.multi_reduction <maximumf>, %109, %cst_24 [1] : vector<16x64xf32> to vector<16xf32>
    %111 = vector.shape_cast %110 : vector<16xf32> to vector<16x1xf32>
    %cst_25 = arith.constant 0.000000e+00 : f32
    %112 = vector.shape_cast %45 : vector<1x64xi1> to vector<1x64xi1>
    %113 = vector.broadcast %112 : vector<1x64xi1> to vector<16x64xi1>
    %114 = vector.shape_cast %111 : vector<16x1xf32> to vector<16x1xf32>
    %115 = vector.broadcast %114 : vector<16x1xf32> to vector<16x64xf32>
    %116 = vector.broadcast %cst_25 : f32 to vector<16x64xf32>
    %117 = arith.select %113, %115, %116 : vector<16x64xi1>, vector<16x64xf32>
    %118 = arith.addf %105, %117 : vector<16x64xf32>
    %cst_26 = arith.constant -1.000000e+30 : f32
    %119 = vector.shape_cast %50 : vector<1x64xi1> to vector<1x64xi1>
    %120 = vector.broadcast %119 : vector<1x64xi1> to vector<16x64xi1>
    %121 = vector.broadcast %cst_26 : f32 to vector<16x64xf32>
    %122 = arith.select %120, %91, %121 : vector<16x64xi1>, vector<16x64xf32>
    %cst_27 = arith.constant dense<0xFF800000> : vector<16xf32>
    %123 = vector.multi_reduction <maximumf>, %122, %cst_27 [1] : vector<16x64xf32> to vector<16xf32>
    %124 = vector.shape_cast %123 : vector<16xf32> to vector<16x1xf32>
    %cst_28 = arith.constant 0.000000e+00 : f32
    %125 = vector.shape_cast %50 : vector<1x64xi1> to vector<1x64xi1>
    %126 = vector.broadcast %125 : vector<1x64xi1> to vector<16x64xi1>
    %127 = vector.shape_cast %124 : vector<16x1xf32> to vector<16x1xf32>
    %128 = vector.broadcast %127 : vector<16x1xf32> to vector<16x64xf32>
    %129 = vector.broadcast %cst_28 : f32 to vector<16x64xf32>
    %130 = arith.select %126, %128, %129 : vector<16x64xi1>, vector<16x64xf32>
    %131 = arith.addf %118, %130 : vector<16x64xf32>
    %cst_29 = arith.constant -1.000000e+30 : f32
    %132 = vector.shape_cast %55 : vector<1x64xi1> to vector<1x64xi1>
    %133 = vector.broadcast %132 : vector<1x64xi1> to vector<16x64xi1>
    %134 = vector.broadcast %cst_29 : f32 to vector<16x64xf32>
    %135 = arith.select %133, %91, %134 : vector<16x64xi1>, vector<16x64xf32>
    %cst_30 = arith.constant dense<0xFF800000> : vector<16xf32>
    %136 = vector.multi_reduction <maximumf>, %135, %cst_30 [1] : vector<16x64xf32> to vector<16xf32>
    %137 = vector.shape_cast %136 : vector<16xf32> to vector<16x1xf32>
    %cst_31 = arith.constant 0.000000e+00 : f32
    %138 = vector.shape_cast %55 : vector<1x64xi1> to vector<1x64xi1>
    %139 = vector.broadcast %138 : vector<1x64xi1> to vector<16x64xi1>
    %140 = vector.shape_cast %137 : vector<16x1xf32> to vector<16x1xf32>
    %141 = vector.broadcast %140 : vector<16x1xf32> to vector<16x64xf32>
    %142 = vector.broadcast %cst_31 : f32 to vector<16x64xf32>
    %143 = arith.select %139, %141, %142 : vector<16x64xi1>, vector<16x64xf32>
    %144 = arith.addf %131, %143 : vector<16x64xf32>
    %145 = arith.subf %91, %144 : vector<16x64xf32>
    %146 = math.exp %145 : vector<16x64xf32>
    %cst_32 = arith.constant 0.000000e+00 : f32
    %147 = vector.broadcast %cst_32 : f32 to vector<16x64xf32>
    %cst_33 = arith.constant 0.000000e+00 : f32
    %148 = vector.shape_cast %40 : vector<1x64xi1> to vector<1x64xi1>
    %149 = vector.broadcast %148 : vector<1x64xi1> to vector<16x64xi1>
    %150 = vector.broadcast %cst_33 : f32 to vector<16x64xf32>
    %151 = arith.select %149, %146, %150 : vector<16x64xi1>, vector<16x64xf32>
    %cst_34 = arith.constant dense<0.000000e+00> : vector<16xf32>
    %152 = vector.multi_reduction <add>, %151, %cst_34 [1] : vector<16x64xf32> to vector<16xf32>
    %153 = vector.shape_cast %152 : vector<16xf32> to vector<16x1xf32>
    %cst_35 = arith.constant 0.000000e+00 : f32
    %154 = vector.shape_cast %40 : vector<1x64xi1> to vector<1x64xi1>
    %155 = vector.broadcast %154 : vector<1x64xi1> to vector<16x64xi1>
    %156 = vector.shape_cast %153 : vector<16x1xf32> to vector<16x1xf32>
    %157 = vector.broadcast %156 : vector<16x1xf32> to vector<16x64xf32>
    %158 = vector.broadcast %cst_35 : f32 to vector<16x64xf32>
    %159 = arith.select %155, %157, %158 : vector<16x64xi1>, vector<16x64xf32>
    %160 = arith.addf %147, %159 : vector<16x64xf32>
    %cst_36 = arith.constant 0.000000e+00 : f32
    %161 = vector.shape_cast %45 : vector<1x64xi1> to vector<1x64xi1>
    %162 = vector.broadcast %161 : vector<1x64xi1> to vector<16x64xi1>
    %163 = vector.broadcast %cst_36 : f32 to vector<16x64xf32>
    %164 = arith.select %162, %146, %163 : vector<16x64xi1>, vector<16x64xf32>
    %cst_37 = arith.constant dense<0.000000e+00> : vector<16xf32>
    %165 = vector.multi_reduction <add>, %164, %cst_37 [1] : vector<16x64xf32> to vector<16xf32>
    %166 = vector.shape_cast %165 : vector<16xf32> to vector<16x1xf32>
    %cst_38 = arith.constant 0.000000e+00 : f32
    %167 = vector.shape_cast %45 : vector<1x64xi1> to vector<1x64xi1>
    %168 = vector.broadcast %167 : vector<1x64xi1> to vector<16x64xi1>
    %169 = vector.shape_cast %166 : vector<16x1xf32> to vector<16x1xf32>
    %170 = vector.broadcast %169 : vector<16x1xf32> to vector<16x64xf32>
    %171 = vector.broadcast %cst_38 : f32 to vector<16x64xf32>
    %172 = arith.select %168, %170, %171 : vector<16x64xi1>, vector<16x64xf32>
    %173 = arith.addf %160, %172 : vector<16x64xf32>
    %cst_39 = arith.constant 0.000000e+00 : f32
    %174 = vector.shape_cast %50 : vector<1x64xi1> to vector<1x64xi1>
    %175 = vector.broadcast %174 : vector<1x64xi1> to vector<16x64xi1>
    %176 = vector.broadcast %cst_39 : f32 to vector<16x64xf32>
    %177 = arith.select %175, %146, %176 : vector<16x64xi1>, vector<16x64xf32>
    %cst_40 = arith.constant dense<0.000000e+00> : vector<16xf32>
    %178 = vector.multi_reduction <add>, %177, %cst_40 [1] : vector<16x64xf32> to vector<16xf32>
    %179 = vector.shape_cast %178 : vector<16xf32> to vector<16x1xf32>
    %cst_41 = arith.constant 0.000000e+00 : f32
    %180 = vector.shape_cast %50 : vector<1x64xi1> to vector<1x64xi1>
    %181 = vector.broadcast %180 : vector<1x64xi1> to vector<16x64xi1>
    %182 = vector.shape_cast %179 : vector<16x1xf32> to vector<16x1xf32>
    %183 = vector.broadcast %182 : vector<16x1xf32> to vector<16x64xf32>
    %184 = vector.broadcast %cst_41 : f32 to vector<16x64xf32>
    %185 = arith.select %181, %183, %184 : vector<16x64xi1>, vector<16x64xf32>
    %186 = arith.addf %173, %185 : vector<16x64xf32>
    %cst_42 = arith.constant 0.000000e+00 : f32
    %187 = vector.shape_cast %55 : vector<1x64xi1> to vector<1x64xi1>
    %188 = vector.broadcast %187 : vector<1x64xi1> to vector<16x64xi1>
    %189 = vector.broadcast %cst_42 : f32 to vector<16x64xf32>
    %190 = arith.select %188, %146, %189 : vector<16x64xi1>, vector<16x64xf32>
    %cst_43 = arith.constant dense<0.000000e+00> : vector<16xf32>
    %191 = vector.multi_reduction <add>, %190, %cst_43 [1] : vector<16x64xf32> to vector<16xf32>
    %192 = vector.shape_cast %191 : vector<16xf32> to vector<16x1xf32>
    %cst_44 = arith.constant 0.000000e+00 : f32
    %193 = vector.shape_cast %55 : vector<1x64xi1> to vector<1x64xi1>
    %194 = vector.broadcast %193 : vector<1x64xi1> to vector<16x64xi1>
    %195 = vector.shape_cast %192 : vector<16x1xf32> to vector<16x1xf32>
    %196 = vector.broadcast %195 : vector<16x1xf32> to vector<16x64xf32>
    %197 = vector.broadcast %cst_44 : f32 to vector<16x64xf32>
    %198 = arith.select %194, %196, %197 : vector<16x64xi1>, vector<16x64xf32>
    %199 = arith.addf %186, %198 : vector<16x64xf32>
    %200 = tpu.reciprocal %199 {approx = true} : vector<16x64xf32> -> vector<16x64xf32>
    %201 = arith.mulf %146, %200 : vector<16x64xf32>
    %202 = arith.truncf %201 : vector<16x64xf32> to vector<16x64xbf16>
    %cst_45 = arith.constant dense<0.000000e+00> : vector<16x32xf32>
    %203 = tpu.matmul %202, %87, %cst_45 {dimension_numbers = #tpu.dot_dimension_numbers<[1], [0], [0], [1], [0, 0, 1, 1], [], []>} : vector<16x64xbf16>, vector<64x32xbf16>, vector<16x32xf32> -> vector<16x32xf32>
    %204 = arith.truncf %203 : vector<16x32xf32> to vector<16x32xbf16>
    %c0_46 = arith.constant 0 : index
    %c0_47 = arith.constant 0 : index
    %c0_48 = arith.constant 0 : index
    %205 = vector.load %arg2[%c0_46, %c0_47, %c0_48] : memref<3x32x32xbf16, #tpu.memory_space<vmem>>, vector<1x32x32xbf16>
    %206 = vector.shape_cast %205 : vector<1x32x32xbf16> to vector<32x32xbf16>
    %cst_49 = arith.constant dense<0.000000e+00> : vector<16x32xf32>
    %207 = tpu.matmul %204, %206, %cst_49 {dimension_numbers = #tpu.dot_dimension_numbers<[1], [0], [0], [1], [0, 0, 1, 1], [], []>} : vector<16x32xbf16>, vector<32x32xbf16>, vector<16x32xf32> -> vector<16x32xf32>
    %c0_50 = arith.constant 0 : index
    %c1 = arith.constant 1 : index
    %c0_51 = arith.constant 0 : index
    %208 = vector.load %arg5[%c0_50, %c1, %c0_51] : memref<3x8x2048xf32, #tpu.memory_space<vmem>>, vector<1x1x32xf32>
    %209 = vector.shape_cast %208 : vector<1x1x32xf32> to vector<1x32xf32>
    %210 = vector.broadcast %209 : vector<1x32xf32> to vector<16x32xf32>
    %211 = arith.addf %207, %210 : vector<16x32xf32>
    %212 = arith.addf %0, %211 : vector<16x32xf32>
    %c0_52 = arith.constant 0 : index
    %c2 = arith.constant 2 : index
    %c0_53 = arith.constant 0 : index
    %213 = vector.load %arg5[%c0_52, %c2, %c0_53] : memref<3x8x2048xf32, #tpu.memory_space<vmem>>, vector<1x1x32xf32>
    %214 = vector.shape_cast %213 : vector<1x1x32xf32> to vector<1x32xf32>
    %c0_54 = arith.constant 0 : index
    %c3 = arith.constant 3 : index
    %c0_55 = arith.constant 0 : index
    %215 = vector.load %arg5[%c0_54, %c3, %c0_55] : memref<3x8x2048xf32, #tpu.memory_space<vmem>>, vector<1x1x32xf32>
    %216 = vector.shape_cast %215 : vector<1x1x32xf32> to vector<1x32xf32>
    %cst_56 = arith.constant dense<0.000000e+00> : vector<16xf32>
    %217 = vector.multi_reduction <add>, %212, %cst_56 [1] : vector<16x32xf32> to vector<16xf32>
    %218 = vector.shape_cast %217 : vector<16xf32> to vector<16x1xf32>
    %cst_57 = arith.constant 3.200000e+01 : f32
    %219 = vector.broadcast %cst_57 : f32 to vector<16x1xf32>
    %220 = arith.divf %218, %219 : vector<16x1xf32>
    %221 = vector.broadcast %220 : vector<16x1xf32> to vector<16x32xf32>
    %222 = arith.subf %212, %221 : vector<16x32xf32>
    %223 = arith.mulf %222, %222 : vector<16x32xf32>
    %cst_58 = arith.constant dense<0.000000e+00> : vector<16xf32>
    %224 = vector.multi_reduction <add>, %223, %cst_58 [1] : vector<16x32xf32> to vector<16xf32>
    %225 = vector.shape_cast %224 : vector<16xf32> to vector<16x1xf32>
    %cst_59 = arith.constant 3.200000e+01 : f32
    %226 = vector.broadcast %cst_59 : f32 to vector<16x1xf32>
    %227 = arith.divf %225, %226 : vector<16x1xf32>
    %228 = vector.broadcast %220 : vector<16x1xf32> to vector<16x32xf32>
    %229 = arith.subf %212, %228 : vector<16x32xf32>
    %cst_60 = arith.constant 9.99999974E-6 : f32
    %230 = vector.broadcast %cst_60 : f32 to vector<16x1xf32>
    %231 = arith.addf %227, %230 : vector<16x1xf32>
    %232 = math.rsqrt %231 : vector<16x1xf32>
    %233 = vector.broadcast %232 : vector<16x1xf32> to vector<16x32xf32>
    %234 = arith.mulf %229, %233 : vector<16x32xf32>
    %235 = vector.broadcast %214 : vector<1x32xf32> to vector<16x32xf32>
    %236 = arith.mulf %234, %235 : vector<16x32xf32>
    %237 = vector.broadcast %216 : vector<1x32xf32> to vector<16x32xf32>
    %238 = arith.addf %236, %237 : vector<16x32xf32>
    %239 = arith.truncf %238 : vector<16x32xf32> to vector<16x32xbf16>
    %c0_61 = arith.constant 0 : index
    %c0_62 = arith.constant 0 : index
    %c0_63 = arith.constant 0 : index
    %240 = vector.load %arg3[%c0_61, %c0_62, %c0_63] : memref<2x32x2048xbf16, #tpu.memory_space<vmem>>, vector<1x32x2048xbf16>
    %241 = vector.shape_cast %240 : vector<1x32x2048xbf16> to vector<32x2048xbf16>
    %cst_64 = arith.constant dense<0.000000e+00> : vector<16x2048xf32>
    %242 = tpu.matmul %239, %241, %cst_64 {dimension_numbers = #tpu.dot_dimension_numbers<[1], [0], [0], [1], [0, 0, 1, 1], [], []>} : vector<16x32xbf16>, vector<32x2048xbf16>, vector<16x2048xf32> -> vector<16x2048xf32>
    %c0_65 = arith.constant 0 : index
    %c4 = arith.constant 4 : index
    %c0_66 = arith.constant 0 : index
    %243 = vector.load %arg5[%c0_65, %c4, %c0_66] : memref<3x8x2048xf32, #tpu.memory_space<vmem>>, vector<1x1x2048xf32>
    %244 = vector.shape_cast %243 : vector<1x1x2048xf32> to vector<1x2048xf32>
    %245 = vector.broadcast %244 : vector<1x2048xf32> to vector<16x2048xf32>
    %246 = arith.addf %242, %245 : vector<16x2048xf32>
    %cst_67 = arith.constant 0.000000e+00 : f32
    %247 = vector.broadcast %cst_67 : f32 to vector<16x2048xf32>
    %248 = arith.maximumf %246, %247 : vector<16x2048xf32>
    %249 = arith.truncf %248 : vector<16x2048xf32> to vector<16x2048xbf16>
    %c0_68 = arith.constant 0 : index
    %c0_69 = arith.constant 0 : index
    %c0_70 = arith.constant 0 : index
    %250 = vector.load %arg4[%c0_68, %c0_69, %c0_70] : memref<2x2048x32xbf16, #tpu.memory_space<vmem>>, vector<1x2048x32xbf16>
    %251 = vector.shape_cast %250 : vector<1x2048x32xbf16> to vector<2048x32xbf16>
    %cst_71 = arith.constant dense<0.000000e+00> : vector<16x32xf32>
    %252 = tpu.matmul %249, %251, %cst_71 {dimension_numbers = #tpu.dot_dimension_numbers<[1], [0], [0], [1], [0, 0, 1, 1], [], []>} : vector<16x2048xbf16>, vector<2048x32xbf16>, vector<16x32xf32> -> vector<16x32xf32>
    %c0_72 = arith.constant 0 : index
    %c5 = arith.constant 5 : index
    %c0_73 = arith.constant 0 : index
    %253 = vector.load %arg5[%c0_72, %c5, %c0_73] : memref<3x8x2048xf32, #tpu.memory_space<vmem>>, vector<1x1x32xf32>
    %254 = vector.shape_cast %253 : vector<1x1x32xf32> to vector<1x32xf32>
    %255 = vector.broadcast %254 : vector<1x32xf32> to vector<16x32xf32>
    %256 = arith.addf %252, %255 : vector<16x32xf32>
    %257 = arith.addf %238, %256 : vector<16x32xf32>
    %c0_74 = arith.constant 0 : index
    %c6 = arith.constant 6 : index
    %c0_75 = arith.constant 0 : index
    %258 = vector.load %arg5[%c0_74, %c6, %c0_75] : memref<3x8x2048xf32, #tpu.memory_space<vmem>>, vector<1x1x32xf32>
    %259 = vector.shape_cast %258 : vector<1x1x32xf32> to vector<1x32xf32>
    %c0_76 = arith.constant 0 : index
    %c7 = arith.constant 7 : index
    %c0_77 = arith.constant 0 : index
    %260 = vector.load %arg5[%c0_76, %c7, %c0_77] : memref<3x8x2048xf32, #tpu.memory_space<vmem>>, vector<1x1x32xf32>
    %261 = vector.shape_cast %260 : vector<1x1x32xf32> to vector<1x32xf32>
    %cst_78 = arith.constant dense<0.000000e+00> : vector<16xf32>
    %262 = vector.multi_reduction <add>, %257, %cst_78 [1] : vector<16x32xf32> to vector<16xf32>
    %263 = vector.shape_cast %262 : vector<16xf32> to vector<16x1xf32>
    %cst_79 = arith.constant 3.200000e+01 : f32
    %264 = vector.broadcast %cst_79 : f32 to vector<16x1xf32>
    %265 = arith.divf %263, %264 : vector<16x1xf32>
    %266 = vector.broadcast %265 : vector<16x1xf32> to vector<16x32xf32>
    %267 = arith.subf %257, %266 : vector<16x32xf32>
    %268 = arith.mulf %267, %267 : vector<16x32xf32>
    %cst_80 = arith.constant dense<0.000000e+00> : vector<16xf32>
    %269 = vector.multi_reduction <add>, %268, %cst_80 [1] : vector<16x32xf32> to vector<16xf32>
    %270 = vector.shape_cast %269 : vector<16xf32> to vector<16x1xf32>
    %cst_81 = arith.constant 3.200000e+01 : f32
    %271 = vector.broadcast %cst_81 : f32 to vector<16x1xf32>
    %272 = arith.divf %270, %271 : vector<16x1xf32>
    %273 = vector.broadcast %265 : vector<16x1xf32> to vector<16x32xf32>
    %274 = arith.subf %257, %273 : vector<16x32xf32>
    %cst_82 = arith.constant 9.99999974E-6 : f32
    %275 = vector.broadcast %cst_82 : f32 to vector<16x1xf32>
    %276 = arith.addf %272, %275 : vector<16x1xf32>
    %277 = math.rsqrt %276 : vector<16x1xf32>
    %278 = vector.broadcast %277 : vector<16x1xf32> to vector<16x32xf32>
    %279 = arith.mulf %274, %278 : vector<16x32xf32>
    %280 = vector.broadcast %259 : vector<1x32xf32> to vector<16x32xf32>
    %281 = arith.mulf %279, %280 : vector<16x32xf32>
    %282 = vector.broadcast %261 : vector<1x32xf32> to vector<16x32xf32>
    %283 = arith.addf %281, %282 : vector<16x32xf32>
    %284 = arith.truncf %283 : vector<16x32xf32> to vector<16x32xbf16>
    %c1_83 = arith.constant 1 : index
    %c0_84 = arith.constant 0 : index
    %c0_85 = arith.constant 0 : index
    %285 = vector.load %arg1[%c1_83, %c0_84, %c0_85] : memref<2x32x96xbf16, #tpu.memory_space<vmem>>, vector<1x32x96xbf16>
    %286 = vector.shape_cast %285 : vector<1x32x96xbf16> to vector<32x96xbf16>
    %cst_86 = arith.constant dense<0.000000e+00> : vector<16x96xf32>
    %287 = tpu.matmul %284, %286, %cst_86 {dimension_numbers = #tpu.dot_dimension_numbers<[1], [0], [0], [1], [0, 0, 1, 1], [], []>} : vector<16x32xbf16>, vector<32x96xbf16>, vector<16x96xf32> -> vector<16x96xf32>
    %c1_87 = arith.constant 1 : index
    %c0_88 = arith.constant 0 : index
    %c0_89 = arith.constant 0 : index
    %288 = vector.load %arg5[%c1_87, %c0_88, %c0_89] : memref<3x8x2048xf32, #tpu.memory_space<vmem>>, vector<1x1x96xf32>
    %289 = vector.shape_cast %288 : vector<1x1x96xf32> to vector<1x96xf32>
    %290 = vector.broadcast %289 : vector<1x96xf32> to vector<16x96xf32>
    %291 = arith.addf %287, %290 : vector<16x96xf32>
    %292 = vector.extract_strided_slice %291 {offsets = [0, 0], sizes = [16, 32], strides = [1, 1]} : vector<16x96xf32> to vector<16x32xf32>
    %293 = arith.truncf %292 : vector<16x32xf32> to vector<16x32xbf16>
    %294 = vector.extract_strided_slice %291 {offsets = [0, 32], sizes = [16, 32], strides = [1, 1]} : vector<16x96xf32> to vector<16x32xf32>
    %295 = arith.truncf %294 : vector<16x32xf32> to vector<16x32xbf16>
    %296 = vector.extract_strided_slice %291 {offsets = [0, 64], sizes = [16, 32], strides = [1, 1]} : vector<16x96xf32> to vector<16x32xf32>
    %297 = arith.truncf %296 : vector<16x32xf32> to vector<16x32xbf16>
    %298 = vector.broadcast %10 : vector<1x32xbf16> to vector<16x32xbf16>
    %299 = arith.mulf %295, %298 : vector<16x32xbf16>
    %300 = vector.broadcast %18 : vector<1x32xbf16> to vector<16x32xbf16>
    %301 = arith.mulf %295, %300 : vector<16x32xbf16>
    %302 = vector.broadcast %26 : vector<1x32xbf16> to vector<16x32xbf16>
    %303 = arith.mulf %295, %302 : vector<16x32xbf16>
    %304 = vector.broadcast %34 : vector<1x32xbf16> to vector<16x32xbf16>
    %305 = arith.mulf %295, %304 : vector<16x32xbf16>
    %306 = tpu.concatenate %299, %301, %303, %305 in 0 : vector<16x32xbf16>, vector<16x32xbf16>, vector<16x32xbf16>, vector<16x32xbf16> -> vector<64x32xbf16>
    %307 = vector.broadcast %10 : vector<1x32xbf16> to vector<16x32xbf16>
    %308 = arith.mulf %297, %307 : vector<16x32xbf16>
    %309 = vector.broadcast %18 : vector<1x32xbf16> to vector<16x32xbf16>
    %310 = arith.mulf %297, %309 : vector<16x32xbf16>
    %311 = vector.broadcast %26 : vector<1x32xbf16> to vector<16x32xbf16>
    %312 = arith.mulf %297, %311 : vector<16x32xbf16>
    %313 = vector.broadcast %34 : vector<1x32xbf16> to vector<16x32xbf16>
    %314 = arith.mulf %297, %313 : vector<16x32xbf16>
    %315 = tpu.concatenate %308, %310, %312, %314 in 0 : vector<16x32xbf16>, vector<16x32xbf16>, vector<16x32xbf16>, vector<16x32xbf16> -> vector<64x32xbf16>
    %cst_90 = arith.constant dense<0.000000e+00> : vector<16x64xf32>
    %316 = tpu.matmul %293, %306, %cst_90 {dimension_numbers = #tpu.dot_dimension_numbers<[1], [1], [0], [0], [0, 0, 1, 0], [], []>} : vector<16x32xbf16>, vector<64x32xbf16>, vector<16x64xf32> -> vector<16x64xf32>
    %cst_91 = arith.constant 0.353553385 : f32
    %317 = vector.broadcast %cst_91 : f32 to vector<16x64xf32>
    %318 = arith.mulf %316, %317 : vector<16x64xf32>
    %319 = arith.addf %318, %1 : vector<16x64xf32>
    %cst_92 = arith.constant 0.000000e+00 : f32
    %320 = vector.broadcast %cst_92 : f32 to vector<16x64xf32>
    %cst_93 = arith.constant -1.000000e+30 : f32
    %321 = vector.shape_cast %40 : vector<1x64xi1> to vector<1x64xi1>
    %322 = vector.broadcast %321 : vector<1x64xi1> to vector<16x64xi1>
    %323 = vector.broadcast %cst_93 : f32 to vector<16x64xf32>
    %324 = arith.select %322, %319, %323 : vector<16x64xi1>, vector<16x64xf32>
    %cst_94 = arith.constant dense<0xFF800000> : vector<16xf32>
    %325 = vector.multi_reduction <maximumf>, %324, %cst_94 [1] : vector<16x64xf32> to vector<16xf32>
    %326 = vector.shape_cast %325 : vector<16xf32> to vector<16x1xf32>
    %cst_95 = arith.constant 0.000000e+00 : f32
    %327 = vector.shape_cast %40 : vector<1x64xi1> to vector<1x64xi1>
    %328 = vector.broadcast %327 : vector<1x64xi1> to vector<16x64xi1>
    %329 = vector.shape_cast %326 : vector<16x1xf32> to vector<16x1xf32>
    %330 = vector.broadcast %329 : vector<16x1xf32> to vector<16x64xf32>
    %331 = vector.broadcast %cst_95 : f32 to vector<16x64xf32>
    %332 = arith.select %328, %330, %331 : vector<16x64xi1>, vector<16x64xf32>
    %333 = arith.addf %320, %332 : vector<16x64xf32>
    %cst_96 = arith.constant -1.000000e+30 : f32
    %334 = vector.shape_cast %45 : vector<1x64xi1> to vector<1x64xi1>
    %335 = vector.broadcast %334 : vector<1x64xi1> to vector<16x64xi1>
    %336 = vector.broadcast %cst_96 : f32 to vector<16x64xf32>
    %337 = arith.select %335, %319, %336 : vector<16x64xi1>, vector<16x64xf32>
    %cst_97 = arith.constant dense<0xFF800000> : vector<16xf32>
    %338 = vector.multi_reduction <maximumf>, %337, %cst_97 [1] : vector<16x64xf32> to vector<16xf32>
    %339 = vector.shape_cast %338 : vector<16xf32> to vector<16x1xf32>
    %cst_98 = arith.constant 0.000000e+00 : f32
    %340 = vector.shape_cast %45 : vector<1x64xi1> to vector<1x64xi1>
    %341 = vector.broadcast %340 : vector<1x64xi1> to vector<16x64xi1>
    %342 = vector.shape_cast %339 : vector<16x1xf32> to vector<16x1xf32>
    %343 = vector.broadcast %342 : vector<16x1xf32> to vector<16x64xf32>
    %344 = vector.broadcast %cst_98 : f32 to vector<16x64xf32>
    %345 = arith.select %341, %343, %344 : vector<16x64xi1>, vector<16x64xf32>
    %346 = arith.addf %333, %345 : vector<16x64xf32>
    %cst_99 = arith.constant -1.000000e+30 : f32
    %347 = vector.shape_cast %50 : vector<1x64xi1> to vector<1x64xi1>
    %348 = vector.broadcast %347 : vector<1x64xi1> to vector<16x64xi1>
    %349 = vector.broadcast %cst_99 : f32 to vector<16x64xf32>
    %350 = arith.select %348, %319, %349 : vector<16x64xi1>, vector<16x64xf32>
    %cst_100 = arith.constant dense<0xFF800000> : vector<16xf32>
    %351 = vector.multi_reduction <maximumf>, %350, %cst_100 [1] : vector<16x64xf32> to vector<16xf32>
    %352 = vector.shape_cast %351 : vector<16xf32> to vector<16x1xf32>
    %cst_101 = arith.constant 0.000000e+00 : f32
    %353 = vector.shape_cast %50 : vector<1x64xi1> to vector<1x64xi1>
    %354 = vector.broadcast %353 : vector<1x64xi1> to vector<16x64xi1>
    %355 = vector.shape_cast %352 : vector<16x1xf32> to vector<16x1xf32>
    %356 = vector.broadcast %355 : vector<16x1xf32> to vector<16x64xf32>
    %357 = vector.broadcast %cst_101 : f32 to vector<16x64xf32>
    %358 = arith.select %354, %356, %357 : vector<16x64xi1>, vector<16x64xf32>
    %359 = arith.addf %346, %358 : vector<16x64xf32>
    %cst_102 = arith.constant -1.000000e+30 : f32
    %360 = vector.shape_cast %55 : vector<1x64xi1> to vector<1x64xi1>
    %361 = vector.broadcast %360 : vector<1x64xi1> to vector<16x64xi1>
    %362 = vector.broadcast %cst_102 : f32 to vector<16x64xf32>
    %363 = arith.select %361, %319, %362 : vector<16x64xi1>, vector<16x64xf32>
    %cst_103 = arith.constant dense<0xFF800000> : vector<16xf32>
    %364 = vector.multi_reduction <maximumf>, %363, %cst_103 [1] : vector<16x64xf32> to vector<16xf32>
    %365 = vector.shape_cast %364 : vector<16xf32> to vector<16x1xf32>
    %cst_104 = arith.constant 0.000000e+00 : f32
    %366 = vector.shape_cast %55 : vector<1x64xi1> to vector<1x64xi1>
    %367 = vector.broadcast %366 : vector<1x64xi1> to vector<16x64xi1>
    %368 = vector.shape_cast %365 : vector<16x1xf32> to vector<16x1xf32>
    %369 = vector.broadcast %368 : vector<16x1xf32> to vector<16x64xf32>
    %370 = vector.broadcast %cst_104 : f32 to vector<16x64xf32>
    %371 = arith.select %367, %369, %370 : vector<16x64xi1>, vector<16x64xf32>
    %372 = arith.addf %359, %371 : vector<16x64xf32>
    %373 = arith.subf %319, %372 : vector<16x64xf32>
    %374 = math.exp %373 : vector<16x64xf32>
    %cst_105 = arith.constant 0.000000e+00 : f32
    %375 = vector.broadcast %cst_105 : f32 to vector<16x64xf32>
    %cst_106 = arith.constant 0.000000e+00 : f32
    %376 = vector.shape_cast %40 : vector<1x64xi1> to vector<1x64xi1>
    %377 = vector.broadcast %376 : vector<1x64xi1> to vector<16x64xi1>
    %378 = vector.broadcast %cst_106 : f32 to vector<16x64xf32>
    %379 = arith.select %377, %374, %378 : vector<16x64xi1>, vector<16x64xf32>
    %cst_107 = arith.constant dense<0.000000e+00> : vector<16xf32>
    %380 = vector.multi_reduction <add>, %379, %cst_107 [1] : vector<16x64xf32> to vector<16xf32>
    %381 = vector.shape_cast %380 : vector<16xf32> to vector<16x1xf32>
    %cst_108 = arith.constant 0.000000e+00 : f32
    %382 = vector.shape_cast %40 : vector<1x64xi1> to vector<1x64xi1>
    %383 = vector.broadcast %382 : vector<1x64xi1> to vector<16x64xi1>
    %384 = vector.shape_cast %381 : vector<16x1xf32> to vector<16x1xf32>
    %385 = vector.broadcast %384 : vector<16x1xf32> to vector<16x64xf32>
    %386 = vector.broadcast %cst_108 : f32 to vector<16x64xf32>
    %387 = arith.select %383, %385, %386 : vector<16x64xi1>, vector<16x64xf32>
    %388 = arith.addf %375, %387 : vector<16x64xf32>
    %cst_109 = arith.constant 0.000000e+00 : f32
    %389 = vector.shape_cast %45 : vector<1x64xi1> to vector<1x64xi1>
    %390 = vector.broadcast %389 : vector<1x64xi1> to vector<16x64xi1>
    %391 = vector.broadcast %cst_109 : f32 to vector<16x64xf32>
    %392 = arith.select %390, %374, %391 : vector<16x64xi1>, vector<16x64xf32>
    %cst_110 = arith.constant dense<0.000000e+00> : vector<16xf32>
    %393 = vector.multi_reduction <add>, %392, %cst_110 [1] : vector<16x64xf32> to vector<16xf32>
    %394 = vector.shape_cast %393 : vector<16xf32> to vector<16x1xf32>
    %cst_111 = arith.constant 0.000000e+00 : f32
    %395 = vector.shape_cast %45 : vector<1x64xi1> to vector<1x64xi1>
    %396 = vector.broadcast %395 : vector<1x64xi1> to vector<16x64xi1>
    %397 = vector.shape_cast %394 : vector<16x1xf32> to vector<16x1xf32>
    %398 = vector.broadcast %397 : vector<16x1xf32> to vector<16x64xf32>
    %399 = vector.broadcast %cst_111 : f32 to vector<16x64xf32>
    %400 = arith.select %396, %398, %399 : vector<16x64xi1>, vector<16x64xf32>
    %401 = arith.addf %388, %400 : vector<16x64xf32>
    %cst_112 = arith.constant 0.000000e+00 : f32
    %402 = vector.shape_cast %50 : vector<1x64xi1> to vector<1x64xi1>
    %403 = vector.broadcast %402 : vector<1x64xi1> to vector<16x64xi1>
    %404 = vector.broadcast %cst_112 : f32 to vector<16x64xf32>
    %405 = arith.select %403, %374, %404 : vector<16x64xi1>, vector<16x64xf32>
    %cst_113 = arith.constant dense<0.000000e+00> : vector<16xf32>
    %406 = vector.multi_reduction <add>, %405, %cst_113 [1] : vector<16x64xf32> to vector<16xf32>
    %407 = vector.shape_cast %406 : vector<16xf32> to vector<16x1xf32>
    %cst_114 = arith.constant 0.000000e+00 : f32
    %408 = vector.shape_cast %50 : vector<1x64xi1> to vector<1x64xi1>
    %409 = vector.broadcast %408 : vector<1x64xi1> to vector<16x64xi1>
    %410 = vector.shape_cast %407 : vector<16x1xf32> to vector<16x1xf32>
    %411 = vector.broadcast %410 : vector<16x1xf32> to vector<16x64xf32>
    %412 = vector.broadcast %cst_114 : f32 to vector<16x64xf32>
    %413 = arith.select %409, %411, %412 : vector<16x64xi1>, vector<16x64xf32>
    %414 = arith.addf %401, %413 : vector<16x64xf32>
    %cst_115 = arith.constant 0.000000e+00 : f32
    %415 = vector.shape_cast %55 : vector<1x64xi1> to vector<1x64xi1>
    %416 = vector.broadcast %415 : vector<1x64xi1> to vector<16x64xi1>
    %417 = vector.broadcast %cst_115 : f32 to vector<16x64xf32>
    %418 = arith.select %416, %374, %417 : vector<16x64xi1>, vector<16x64xf32>
    %cst_116 = arith.constant dense<0.000000e+00> : vector<16xf32>
    %419 = vector.multi_reduction <add>, %418, %cst_116 [1] : vector<16x64xf32> to vector<16xf32>
    %420 = vector.shape_cast %419 : vector<16xf32> to vector<16x1xf32>
    %cst_117 = arith.constant 0.000000e+00 : f32
    %421 = vector.shape_cast %55 : vector<1x64xi1> to vector<1x64xi1>
    %422 = vector.broadcast %421 : vector<1x64xi1> to vector<16x64xi1>
    %423 = vector.shape_cast %420 : vector<16x1xf32> to vector<16x1xf32>
    %424 = vector.broadcast %423 : vector<16x1xf32> to vector<16x64xf32>
    %425 = vector.broadcast %cst_117 : f32 to vector<16x64xf32>
    %426 = arith.select %422, %424, %425 : vector<16x64xi1>, vector<16x64xf32>
    %427 = arith.addf %414, %426 : vector<16x64xf32>
    %428 = tpu.reciprocal %427 {approx = true} : vector<16x64xf32> -> vector<16x64xf32>
    %429 = arith.mulf %374, %428 : vector<16x64xf32>
    %430 = arith.truncf %429 : vector<16x64xf32> to vector<16x64xbf16>
    %cst_118 = arith.constant dense<0.000000e+00> : vector<16x32xf32>
    %431 = tpu.matmul %430, %315, %cst_118 {dimension_numbers = #tpu.dot_dimension_numbers<[1], [0], [0], [1], [0, 0, 1, 1], [], []>} : vector<16x64xbf16>, vector<64x32xbf16>, vector<16x32xf32> -> vector<16x32xf32>
    %432 = arith.truncf %431 : vector<16x32xf32> to vector<16x32xbf16>
    %c1_119 = arith.constant 1 : index
    %c0_120 = arith.constant 0 : index
    %c0_121 = arith.constant 0 : index
    %433 = vector.load %arg2[%c1_119, %c0_120, %c0_121] : memref<3x32x32xbf16, #tpu.memory_space<vmem>>, vector<1x32x32xbf16>
    %434 = vector.shape_cast %433 : vector<1x32x32xbf16> to vector<32x32xbf16>
    %cst_122 = arith.constant dense<0.000000e+00> : vector<16x32xf32>
    %435 = tpu.matmul %432, %434, %cst_122 {dimension_numbers = #tpu.dot_dimension_numbers<[1], [0], [0], [1], [0, 0, 1, 1], [], []>} : vector<16x32xbf16>, vector<32x32xbf16>, vector<16x32xf32> -> vector<16x32xf32>
    %c1_123 = arith.constant 1 : index
    %c1_124 = arith.constant 1 : index
    %c0_125 = arith.constant 0 : index
    %436 = vector.load %arg5[%c1_123, %c1_124, %c0_125] : memref<3x8x2048xf32, #tpu.memory_space<vmem>>, vector<1x1x32xf32>
    %437 = vector.shape_cast %436 : vector<1x1x32xf32> to vector<1x32xf32>
    %438 = vector.broadcast %437 : vector<1x32xf32> to vector<16x32xf32>
    %439 = arith.addf %435, %438 : vector<16x32xf32>
    %440 = arith.addf %283, %439 : vector<16x32xf32>
    %c1_126 = arith.constant 1 : index
    %c2_127 = arith.constant 2 : index
    %c0_128 = arith.constant 0 : index
    %441 = vector.load %arg5[%c1_126, %c2_127, %c0_128] : memref<3x8x2048xf32, #tpu.memory_space<vmem>>, vector<1x1x32xf32>
    %442 = vector.shape_cast %441 : vector<1x1x32xf32> to vector<1x32xf32>
    %c1_129 = arith.constant 1 : index
    %c3_130 = arith.constant 3 : index
    %c0_131 = arith.constant 0 : index
    %443 = vector.load %arg5[%c1_129, %c3_130, %c0_131] : memref<3x8x2048xf32, #tpu.memory_space<vmem>>, vector<1x1x32xf32>
    %444 = vector.shape_cast %443 : vector<1x1x32xf32> to vector<1x32xf32>
    %cst_132 = arith.constant dense<0.000000e+00> : vector<16xf32>
    %445 = vector.multi_reduction <add>, %440, %cst_132 [1] : vector<16x32xf32> to vector<16xf32>
    %446 = vector.shape_cast %445 : vector<16xf32> to vector<16x1xf32>
    %cst_133 = arith.constant 3.200000e+01 : f32
    %447 = vector.broadcast %cst_133 : f32 to vector<16x1xf32>
    %448 = arith.divf %446, %447 : vector<16x1xf32>
    %449 = vector.broadcast %448 : vector<16x1xf32> to vector<16x32xf32>
    %450 = arith.subf %440, %449 : vector<16x32xf32>
    %451 = arith.mulf %450, %450 : vector<16x32xf32>
    %cst_134 = arith.constant dense<0.000000e+00> : vector<16xf32>
    %452 = vector.multi_reduction <add>, %451, %cst_134 [1] : vector<16x32xf32> to vector<16xf32>
    %453 = vector.shape_cast %452 : vector<16xf32> to vector<16x1xf32>
    %cst_135 = arith.constant 3.200000e+01 : f32
    %454 = vector.broadcast %cst_135 : f32 to vector<16x1xf32>
    %455 = arith.divf %453, %454 : vector<16x1xf32>
    %456 = vector.broadcast %448 : vector<16x1xf32> to vector<16x32xf32>
    %457 = arith.subf %440, %456 : vector<16x32xf32>
    %cst_136 = arith.constant 9.99999974E-6 : f32
    %458 = vector.broadcast %cst_136 : f32 to vector<16x1xf32>
    %459 = arith.addf %455, %458 : vector<16x1xf32>
    %460 = math.rsqrt %459 : vector<16x1xf32>
    %461 = vector.broadcast %460 : vector<16x1xf32> to vector<16x32xf32>
    %462 = arith.mulf %457, %461 : vector<16x32xf32>
    %463 = vector.broadcast %442 : vector<1x32xf32> to vector<16x32xf32>
    %464 = arith.mulf %462, %463 : vector<16x32xf32>
    %465 = vector.broadcast %444 : vector<1x32xf32> to vector<16x32xf32>
    %466 = arith.addf %464, %465 : vector<16x32xf32>
    %467 = arith.truncf %466 : vector<16x32xf32> to vector<16x32xbf16>
    %c1_137 = arith.constant 1 : index
    %c0_138 = arith.constant 0 : index
    %c0_139 = arith.constant 0 : index
    %468 = vector.load %arg3[%c1_137, %c0_138, %c0_139] : memref<2x32x2048xbf16, #tpu.memory_space<vmem>>, vector<1x32x2048xbf16>
    %469 = vector.shape_cast %468 : vector<1x32x2048xbf16> to vector<32x2048xbf16>
    %cst_140 = arith.constant dense<0.000000e+00> : vector<16x2048xf32>
    %470 = tpu.matmul %467, %469, %cst_140 {dimension_numbers = #tpu.dot_dimension_numbers<[1], [0], [0], [1], [0, 0, 1, 1], [], []>} : vector<16x32xbf16>, vector<32x2048xbf16>, vector<16x2048xf32> -> vector<16x2048xf32>
    %c1_141 = arith.constant 1 : index
    %c4_142 = arith.constant 4 : index
    %c0_143 = arith.constant 0 : index
    %471 = vector.load %arg5[%c1_141, %c4_142, %c0_143] : memref<3x8x2048xf32, #tpu.memory_space<vmem>>, vector<1x1x2048xf32>
    %472 = vector.shape_cast %471 : vector<1x1x2048xf32> to vector<1x2048xf32>
    %473 = vector.broadcast %472 : vector<1x2048xf32> to vector<16x2048xf32>
    %474 = arith.addf %470, %473 : vector<16x2048xf32>
    %cst_144 = arith.constant 0.000000e+00 : f32
    %475 = vector.broadcast %cst_144 : f32 to vector<16x2048xf32>
    %476 = arith.maximumf %474, %475 : vector<16x2048xf32>
    %477 = arith.truncf %476 : vector<16x2048xf32> to vector<16x2048xbf16>
    %c1_145 = arith.constant 1 : index
    %c0_146 = arith.constant 0 : index
    %c0_147 = arith.constant 0 : index
    %478 = vector.load %arg4[%c1_145, %c0_146, %c0_147] : memref<2x2048x32xbf16, #tpu.memory_space<vmem>>, vector<1x2048x32xbf16>
    %479 = vector.shape_cast %478 : vector<1x2048x32xbf16> to vector<2048x32xbf16>
    %cst_148 = arith.constant dense<0.000000e+00> : vector<16x32xf32>
    %480 = tpu.matmul %477, %479, %cst_148 {dimension_numbers = #tpu.dot_dimension_numbers<[1], [0], [0], [1], [0, 0, 1, 1], [], []>} : vector<16x2048xbf16>, vector<2048x32xbf16>, vector<16x32xf32> -> vector<16x32xf32>
    %c1_149 = arith.constant 1 : index
    %c5_150 = arith.constant 5 : index
    %c0_151 = arith.constant 0 : index
    %481 = vector.load %arg5[%c1_149, %c5_150, %c0_151] : memref<3x8x2048xf32, #tpu.memory_space<vmem>>, vector<1x1x32xf32>
    %482 = vector.shape_cast %481 : vector<1x1x32xf32> to vector<1x32xf32>
    %483 = vector.broadcast %482 : vector<1x32xf32> to vector<16x32xf32>
    %484 = arith.addf %480, %483 : vector<16x32xf32>
    %485 = arith.addf %466, %484 : vector<16x32xf32>
    %c1_152 = arith.constant 1 : index
    %c6_153 = arith.constant 6 : index
    %c0_154 = arith.constant 0 : index
    %486 = vector.load %arg5[%c1_152, %c6_153, %c0_154] : memref<3x8x2048xf32, #tpu.memory_space<vmem>>, vector<1x1x32xf32>
    %487 = vector.shape_cast %486 : vector<1x1x32xf32> to vector<1x32xf32>
    %c1_155 = arith.constant 1 : index
    %c7_156 = arith.constant 7 : index
    %c0_157 = arith.constant 0 : index
    %488 = vector.load %arg5[%c1_155, %c7_156, %c0_157] : memref<3x8x2048xf32, #tpu.memory_space<vmem>>, vector<1x1x32xf32>
    %489 = vector.shape_cast %488 : vector<1x1x32xf32> to vector<1x32xf32>
    %cst_158 = arith.constant dense<0.000000e+00> : vector<16xf32>
    %490 = vector.multi_reduction <add>, %485, %cst_158 [1] : vector<16x32xf32> to vector<16xf32>
    %491 = vector.shape_cast %490 : vector<16xf32> to vector<16x1xf32>
    %cst_159 = arith.constant 3.200000e+01 : f32
    %492 = vector.broadcast %cst_159 : f32 to vector<16x1xf32>
    %493 = arith.divf %491, %492 : vector<16x1xf32>
    %494 = vector.broadcast %493 : vector<16x1xf32> to vector<16x32xf32>
    %495 = arith.subf %485, %494 : vector<16x32xf32>
    %496 = arith.mulf %495, %495 : vector<16x32xf32>
    %cst_160 = arith.constant dense<0.000000e+00> : vector<16xf32>
    %497 = vector.multi_reduction <add>, %496, %cst_160 [1] : vector<16x32xf32> to vector<16xf32>
    %498 = vector.shape_cast %497 : vector<16xf32> to vector<16x1xf32>
    %cst_161 = arith.constant 3.200000e+01 : f32
    %499 = vector.broadcast %cst_161 : f32 to vector<16x1xf32>
    %500 = arith.divf %498, %499 : vector<16x1xf32>
    %501 = vector.broadcast %493 : vector<16x1xf32> to vector<16x32xf32>
    %502 = arith.subf %485, %501 : vector<16x32xf32>
    %cst_162 = arith.constant 9.99999974E-6 : f32
    %503 = vector.broadcast %cst_162 : f32 to vector<16x1xf32>
    %504 = arith.addf %500, %503 : vector<16x1xf32>
    %505 = math.rsqrt %504 : vector<16x1xf32>
    %506 = vector.broadcast %505 : vector<16x1xf32> to vector<16x32xf32>
    %507 = arith.mulf %502, %506 : vector<16x32xf32>
    %508 = vector.broadcast %487 : vector<1x32xf32> to vector<16x32xf32>
    %509 = arith.mulf %507, %508 : vector<16x32xf32>
    %510 = vector.broadcast %489 : vector<1x32xf32> to vector<16x32xf32>
    %511 = arith.addf %509, %510 : vector<16x32xf32>
    %512 = vector.shape_cast %511 : vector<16x32xf32> to vector<2x8x32xf32>
    %cst_163 = arith.constant dense<0.000000e+00> : vector<2x32xf32>
    %513 = vector.multi_reduction <add>, %512, %cst_163 [1] : vector<2x8x32xf32> to vector<2x32xf32>
    %514 = arith.truncf %513 : vector<2x32xf32> to vector<2x32xbf16>
    %c2_164 = arith.constant 2 : index
    %c0_165 = arith.constant 0 : index
    %c0_166 = arith.constant 0 : index
    %515 = vector.load %arg2[%c2_164, %c0_165, %c0_166] : memref<3x32x32xbf16, #tpu.memory_space<vmem>>, vector<1x32x32xbf16>
    %516 = vector.shape_cast %515 : vector<1x32x32xbf16> to vector<32x32xbf16>
    %cst_167 = arith.constant dense<0.000000e+00> : vector<2x32xf32>
    %517 = tpu.matmul %514, %516, %cst_167 {dimension_numbers = #tpu.dot_dimension_numbers<[1], [0], [0], [1], [0, 0, 1, 1], [], []>} : vector<2x32xbf16>, vector<32x32xbf16>, vector<2x32xf32> -> vector<2x32xf32>
    %518 = vector.extract_strided_slice %517 {offsets = [0, 0], sizes = [2, 5], strides = [1, 1]} : vector<2x32xf32> to vector<2x5xf32>
    %c2_168 = arith.constant 2 : index
    %c0_169 = arith.constant 0 : index
    %c0_170 = arith.constant 0 : index
    %519 = vector.load %arg5[%c2_168, %c0_169, %c0_170] : memref<3x8x2048xf32, #tpu.memory_space<vmem>>, vector<1x1x5xf32>
    %520 = vector.shape_cast %519 : vector<1x1x5xf32> to vector<1x5xf32>
    %521 = vector.broadcast %520 : vector<1x5xf32> to vector<2x5xf32>
    %522 = arith.addf %518, %521 : vector<2x5xf32>
    %c0_171 = arith.constant 0 : index
    %c0_172 = arith.constant 0 : index
    %523 = vector.load %arg6[%c0_171, %c0_172] : memref<2x5xf32, #tpu.memory_space<vmem>>, vector<2x5xf32>
    tpu.vector_store %arg6[%c0_171, %c0_172], %522 {strides = array<i32>} : memref<2x5xf32, #tpu.memory_space<vmem>>, vector<2x5xf32>,
    return
  }
}

</mosaic_0001>

<bundles_post_ra>
// kernel: tile.9
= control target key start
LH: loop header
LB: loop body
LE: loop exit
PB: predicated region body
PF: predicated region fallthrough
CT: control target
= control target key end

     0   :  { %vm82_vm0 = vcmask 1047556   ;;  %vm84_vm1 = vcmask 130048   ;;  %s195_s9 = smov 48   ;;  %s196_s14 = smov 16   ;;  %vm103_vm2 = vcmask 523648   ;;  %vm124_vm3 = vcmask 392448   ;;  %s289_s0 = inlined_call_operand.vmem [shape: f32[16,4,16], index: 0, kind: input, shape index: {}]   ;;  %s290_s1 = inlined_call_operand.vmem [shape: f32[16,64], index: 1, kind: output, shape index: {}]  }
   0x1   :  { %v180_v0 = vld [vmem:[%s289_s0 + $0x1c] sm:$0xf]  ;;  %v181_v1 = vld [vmem:[%s289_s0 + $0x18] sm:$0xf]  ;;  %v182_v2 = vld [vmem:[%s289_s0 + $0x14] sm:$0xf] }
   0x2   :  { %48 = vst [vmem:[#allocation0 + $0x38] sm:$0xf] %v180_v0  ;;  %53 = vst [vmem:[#allocation0 + $0x30] sm:$0xf] %v181_v1  ;;  %v183_v3 = vld [vmem:[%s289_s0 + $0x10] sm:$0xf] }
   0x3   :  { %58 = vst [vmem:[#allocation0 + $0x28] sm:$0xf] %v182_v2  ;;  %v184_v4 = vld [vmem:[%s289_s0 + $0xc] sm:$0xf]  ;;  %v185_v5 = vld [vmem:[%s289_s0 + $0x8] sm:$0xf] }
   0x4   :  { %63 = vst [vmem:[#allocation0 + $0x20] sm:$0xf] %v183_v3  ;;  %68 = vst [vmem:[#allocation0 + $0x18] sm:$0xf] %v184_v4  ;;  %v186_v6 = vld [vmem:[%s289_s0 + $0x4] sm:$0xf] }
   0x5   :  { %73 = vst [vmem:[#allocation0 + $0x10] sm:$0xf] %v185_v5  ;;  %v78_v7 = vld [vmem:[%s289_s0] sm:$0xf]  ;;  %77 = vst [vmem:[#allocation0 + $0x8] sm:$0xf] %v186_v6 }
   0x6   :  { %79 = vst [vmem:[#allocation0] sm:$0xf] %v78_v7  ;;  %v172_v8 = vld [vmem:[%s289_s0 + $0x3c] sm:$0xf]  ;;  %v173_v9 = vld [vmem:[%s289_s0 + $0x38] sm:$0xf] }
   0x7   :  { %8 = vst [vmem:[#allocation0 + $0x78] sm:$0xf] %v172_v8  ;;  %13 = vst [vmem:[#allocation0 + $0x70] sm:$0xf] %v173_v9  ;;  %v174_v10 = vld [vmem:[%s289_s0 + $0x34] sm:$0xf] }
   0x8   :  { %v175_v11 = vld [vmem:[%s289_s0 + $0x30] sm:$0xf]  ;;  %v176_v12 = vld [vmem:[%s289_s0 + $0x2c] sm:$0xf]  ;;  %18 = vst [vmem:[#allocation0 + $0x68] sm:$0xf] %v174_v10 }
   0x9   :  { %23 = vst [vmem:[#allocation0 + $0x60] sm:$0xf] %v175_v11  ;;  %28 = vst [vmem:[#allocation0 + $0x58] sm:$0xf] %v176_v12  ;;  %v177_v13 = vld [vmem:[%s289_s0 + $0x28] sm:$0xf] }
   0xa   :  { %v178_v14 = vld [vmem:[%s289_s0 + $0x24] sm:$0xf]  ;;  %v179_v15 = vld [vmem:[%s289_s0 + $0x20] sm:$0xf]  ;;  %33 = vst [vmem:[#allocation0 + $0x50] sm:$0xf] %v177_v13 }
   0xb   :  { %38 = vst [vmem:[#allocation0 + $0x48] sm:$0xf] %v178_v14  ;;  %43 = vst [vmem:[#allocation0 + $0x40] sm:$0xf] %v179_v15  ;;  %s194_s0 = smov 32   ;;  %vm145_vm4 = vcmask 261248  }
   0xc   :  { %v119_v16 = vld [vmem:[#allocation0 + $0x2] ss:$8 sm:$0xf0]   ;;  %v98_v17 = vld [vmem:[#allocation0 + $0x3] ss:$8 sm:$0xf0]  }
   0xd   :  { %v117_v18 = vld [vmem:[#allocation0 + $0x2] ss:$8 sm:$0xf]   ;;  %v96_v19 = vld [vmem:[#allocation0 + $0x3] ss:$8 sm:$0xf]  }
   0xe   :  { %v121_v20 = vsel %vm82_vm0, %v119_v16, %v117_v18  ;;  %v100_v21 = vsel %vm82_vm0, %v98_v17, %v96_v19  ;;  %v138_v24 = vld [vmem:[#allocation0 + $0x1] ss:$8 sm:$0xf]   ;;  %v80_v32 = vld [vmem:[#allocation0] ss:$8 sm:$0xf]  }
   0xf   :  { %122 = vrot.lane.b32.xlu1 %v121_v20, %s194_s0  ;;  %101 = vrot.lane.b32.xlu0 %v100_v21, %s195_s9  ;;  %v140_v25 = vld [vmem:[#allocation0 + $0x1] ss:$8 sm:$0xf0]   ;;  %v81_v33 = vld [vmem:[#allocation0] ss:$8 sm:$0xf0]  }
  0x10   :  { %v129_v22 = vld [vmem:[#allocation0 + $0x42] ss:$8 sm:$0xf0]   ;;  %v108_v23 = vld [vmem:[#allocation0 + $0x43] ss:$8 sm:$0xf0]   ;;  %v83_v34 = vsel %vm82_vm0, %v81_v33, %v80_v32  ;;  %v142_v38 = vsel %vm82_vm0, %v140_v25, %v138_v24 }
  0x11   :  { %v150_v31 = vld [vmem:[#allocation0 + $0x41] ss:$8 sm:$0xf0]   ;;  %v89_v36 = vld [vmem:[#allocation0 + $0x40] ss:$8 sm:$0xf0]  }
  0x12   :  { %v127_v26 = vld [vmem:[#allocation0 + $0x42] ss:$8 sm:$0xf]   ;;  %v106_v27 = vld [vmem:[#allocation0 + $0x43] ss:$8 sm:$0xf]  }
  0x13   :  { %v131_v28 = vsel %vm82_vm0, %v129_v22, %v127_v26  ;;  %v110_v29 = vsel %vm82_vm0, %v108_v23, %v106_v27  ;;  %v148_v30 = vld [vmem:[#allocation0 + $0x41] ss:$8 sm:$0xf]   ;;  %v87_v35 = vld [vmem:[#allocation0 + $0x40] ss:$8 sm:$0xf]  }
  0x14   :  { %132 = vrot.lane.b32.xlu1 %v131_v28, %s194_s0  ;;  %111 = vrot.lane.b32.xlu0 %v110_v29, %s195_s9  ;;  %v152_v37 = vsel %vm82_vm0, %v150_v31, %v148_v30  ;;  %85 = vst.msk [vmem:[%s290_s1] sm:$0xff] %vm84_vm1, %v83_v34   ;;  %v91_v39 = vsel %vm82_vm0, %v89_v36, %v87_v35 }
  0x15   :  { %187 = vst.msk [vmem:[%s290_s1 + $0x8] sm:$0xff] %vm84_vm1, %v91_v39  }
  0x18   :  { %153 = vrot.lane.b32.xlu1 %v152_v37, %s196_s14  ;;  %143 = vrot.lane.b32.xlu0 %v142_v38, %s196_s14 }
  0x81   :  { %v123_v40 = vpop.permute.xlu1 %122   ;;  %v102_v41 = vpop.permute.xlu0 %101  }
  0x82   :  { %104 = vst.msk [vmem:[%s290_s1] sm:$0xff] %vm103_vm2, %v102_v41  }
  0x83   :  { %125 = vst.msk [vmem:[%s290_s1] sm:$0xff] %vm124_vm3, %v123_v40  }
  0x86   :  { %v133_v42 = vpop.permute.xlu1 %132   ;;  %v112_v43 = vpop.permute.xlu0 %111  }
  0x87   :  { %188 = vst.msk [vmem:[%s290_s1 + $0x8] sm:$0xff] %vm103_vm2, %v112_v43  }
  0x88   :  { %189 = vst.msk [vmem:[%s290_s1 + $0x8] sm:$0xff] %vm124_vm3, %v133_v42  }
  0x8a   :  { %v154_v44 = vpop.permute.xlu1 %153   ;;  %v144_v45 = vpop.permute.xlu0 %143  }
  0x8b   :  { %190 = vst.msk [vmem:[%s290_s1 + $0x8] sm:$0xff] %vm145_vm4, %v154_v44   ;;  %146 = vst.msk [vmem:[%s290_s1] sm:$0xff] %vm145_vm4, %v144_v45  }

// kernel: transformer_predictor_forward.1
= control target key start
LH: loop header
LB: loop body
LE: loop exit
PB: predicated region body
PF: predicated region fallthrough
CT: control target
= control target key end

     0   :  { %v29_v1 = vlaneseq  ;;  %v6636_v2 = vmov 0.0   ;;  %vm6637_vm0 = vmmov 0   ;;  %vm81_vm9 = vcmask 261120   ;;  %s6638_s29 = smov 32   ;;  %s8360_s0 = inlined_call_operand.vmem [shape: f32[32,64], index: 0, kind: input, shape index: {}]   ;;  %s8361_s1 = inlined_call_operand.vmem [shape: bf16[2,32,96], index: 1, kind: input, shape index: {}]   ;;  %s8362_s2 = inlined_call_operand.vmem [shape: bf16[3,32,32], index: 2, kind: input, shape index: {}]   ;;  %s8363_s3 = inlined_call_operand.vmem [shape: bf16[2,32,2048], index: 3, kind: input, shape index: {}]   ;;  %s8364_s4 = inlined_call_operand.vmem [shape: bf16[2,2048,32], index: 4, kind: input, shape index: {}]   ;;  %s8365_s5 = inlined_call_operand.vmem [shape: f32[3,8,2048], index: 5, kind: input, shape index: {}]   ;;  %s8366_s6 = inlined_call_operand.hbm [shape: f32[2,5], index: 6, kind: output, shape index: {}]  }
   0x1   :  { %v6310_v0 = vld [vmem:[%s8361_s1] sm:$0xff]   ;;  %6215 = vmatprep.subr.bf16.mxu0 %v6636_v2  ;;  %6223 = vmatprep.subr.bf16.mxu1 %v6636_v2  ;;  %v6311_v3 = vld [vmem:[%s8361_s1 + $0x8] sm:$0xff]  }
   0x2   :  { %6216 = vmatpush3.bf16.msra.mxu0 %v6310_v0  ;;  %6219 = vmatprep.mubr.msk.bf16.mxu0 %vm6637_vm0, %v6636_v2  ;;  %v25_v4 = vld [vmem:[%s8360_s0] sm:$0xff]  ;;  %v26_v5 = vld [vmem:[%s8360_s0 + $0x8] sm:$0xff]  ;;  %v6695_v6 = vand.u32 127, %v29_v1 }
   0x3   :  { %6217 = vmatprep.subr.bf16.mxu0 %v6636_v2  ;;  %v63_v7 = vpack.c.bf16 %v26_v5, %v25_v4  ;;  %6231 = vmatprep.mubr.msk.bf16.mxu1 %vm6637_vm0, %v6636_v2 }
   0x4   :  { %vm43_vm1 = vcmp.ge.s32.totalorder %v6695_v6, 16  ;;  %vm44_vm2 = vcmp.lt.s32.totalorder %v6695_v6, 24  ;;  %vm50_vm3 = vcmp.lt.s32.totalorder %v6695_v6, 32  ;;  %vm32_vm4 = vcmp.lt.s32.totalorder %v6695_v6, 8 }
   0x5   :  { %vm45_vm5 = vmand %vm43_vm1, %vm44_vm2  ;;  %v5153_v8 = vsel %vm32_vm4, 1.0, %v6636_v2  ;;  %vm49_vm6 = vcmp.ge.s32.totalorder %v6695_v6, 24  ;;  %vm37_vm7 = vcmp.ge.s32.totalorder %v6695_v6, 8  ;;  %vm38_vm8 = vcmp.lt.s32.totalorder %v6695_v6, 16 }
   0x6   :  { %6218 = vmatpush3.bf16.msra.mxu0 %v6311_v3  ;;  %v5155_v9 = vsel %vm45_vm5, 1.0, %v6636_v2  ;;  %vm6709_vm10 = vmand %vm43_vm1, %vm50_vm3  ;;  %v6713_v11 = vpack.c.bf16 %v5153_v8, %v5153_v8 }
   0x7   :  { %v6715_v12 = vpack.c.bf16 %v5155_v9, %v5155_v9  ;;  %vm51_vm11 = vmand %vm49_vm6, %vm50_vm3  ;;  %6235 = vmatprep.subr.bf16.mxu0 %v6636_v2 }
   0x8   :  { %128 = vrot.lane.b32.xlu0 %v6713_v11, %s6638_s29  ;;  %v5156_v13 = vsel %vm51_vm11, 1.0, %v6636_v2  ;;  %vm39_vm12 = vmand %vm37_vm7, %vm38_vm8 }
   0x9   :  { %6220 = vmatmul.mubr.msk.bf16.vlgmr.msra.gmra.mrb[0].mxu0 %vm81_vm9, %v63_v7  ;;  %138 = vrot.lane.b32.xlu1 %v6715_v12, %s6638_s29  ;;  %v6724_v14 = vpack.c.bf16 %v5156_v13, %v5156_v13  ;;  %v5154_v15 = vsel %vm39_vm12, 1.0, %v6636_v2 }
   0xa   :  { %v6727_v16 = vpack.c.bf16 %v5154_v15, %v5154_v15  ;;  %6243 = vmatprep.mubr.msk.bf16.mxu0 %vm6637_vm0, %v6636_v2 }
   0xc   :  { %133 = vrot.lane.b32.xlu0 %v6727_v16, %s6638_s29 }
   0xd   :  { %143 = vrot.lane.b32.xlu1 %v6724_v14, %s6638_s29 }
   0xe   :  { %11 = vsyncpa [#allocation3], 0  ;;  %v68_v18 = vld [vmem:[%s8365_s5] ss:$0 sm:$0xff]  ;;  %s6639_s8 = smov 96   ;;  %vm57_vm13 = vcmp.ge.s32.totalorder %v6695_v6, 32 }
   0xf   :  { %vm58_vm14 = vcmp.lt.s32.totalorder %v6695_v6, 48  ;;  %v27_v41 = vld [vmem:[%s8360_s0 + $0x10] sm:$0xff]  ;;  %v28_v45 = vld [vmem:[%s8360_s0 + $0x18] sm:$0xff]  ;;  %vm239_vm1 = vcmask 523264   ;;  %vm60_vm2 = vcmp.ge.s32.totalorder %v6695_v6, 48  ;;  %vm61_vm3 = vcmp.lt.s32.totalorder %v6695_v6, 64 }
  0x10   :  { %vm6775_vm15 = vmand %vm57_vm13, %vm58_vm14  ;;  %s6640_s13 = smov 64   ;;  %s6642_s17 = smov [#allocation2]   ;;  %vm5135_vm5 = vcmask 33792  }
  0x11   :  { %vm6791_vm4 = vmand %vm60_vm2, %vm61_vm3 }
  0x7a   :  { %v6733_v17 = vpop.permute.xlu0 %128 }
  0x7b   :  { %v6738_v21 = vpop.permute.xlu1 %138 }
  0x7e   :  { %v6740_v26 = vpop.permute.xlu0 %133 }
  0x7f   :  { %v6748_v30 = vpop.permute.xlu1 %143 }
  0xdc   :  { %v119_v19 = vpop.f32.mrb[0].mxu0 }
  0xdd   :  { %v6221_v20 = vpop.f32.mrb[1].mxu0  ;;  %v120_v23 = vadd.f32 %v119_v19, %v68_v18 }
  0xde   :  { %v122_v22 = vpop.f32.mrb[2].mxu0 }
  0xdf   :  { %v123_v24 = vadd.f32 %v122_v22, %v68_v18  ;;  %v6222_v25 = vpop.f32.mrb[3].mxu0 }
  0xe1   :  { %v6742_v27 = vpack.c.bf16 %v123_v24, %v120_v23 }
  0xe3   :  { %v136_v28 = vmul.bf16 %v6740_v26, %v6742_v27  ;;  %v131_v29 = vmul.bf16 %v6733_v17, %v6742_v27  ;;  %v146_v31 = vmul.bf16 %v6748_v30, %v6742_v27  ;;  %v141_v32 = vmul.bf16 %v6738_v21, %v6742_v27 }
  0xe5   :  { %169 = vrot.lane.b32.xlu1 %v136_v28, %s6639_s8  ;;  %167 = vrot.lane.b32.xlu0 %v131_v29, %s6639_s8 }
  0xe9   :  { %173 = vrot.lane.b32.xlu1 %v146_v31, %s6639_s8  ;;  %171 = vrot.lane.b32.xlu0 %v141_v32, %s6639_s8 }
 0x157   :  { %v168_v33 = vpop.permute.xlu0 %167  ;;  %v170_v35 = vpop.permute.xlu1 %169 }
 0x158   :  { %v179_v34 = vsel %vm81_vm9, %v168_v33, 0  ;;  %v182_v36 = vsel %vm81_vm9, %v170_v35, 0 }
 0x159   :  { %6224 = vmatpush3.bf16.xpose.msra.mxu1 %v179_v34 }
 0x15a   :  { %6225 = vmatprep.subr.bf16.mxu1 %v6636_v2 }
 0x15b   :  { %v172_v37 = vpop.permute.xlu0 %171  ;;  %v174_v39 = vpop.permute.xlu1 %173 }
 0x15c   :  { %v185_v38 = vsel %vm81_vm9, %v172_v37, 0  ;;  %v188_v40 = vsel %vm81_vm9, %v174_v39, 0 }
 0x161   :  { %6226 = vmatpush3.bf16.xpose.msra.mxu1 %v182_v36 }
 0x162   :  { %6227 = vmatprep.subr.bf16.mxu1 %v6636_v2 }
 0x169   :  { %6228 = vmatpush3.bf16.xpose.msra.mxu1 %v185_v38 }
 0x16a   :  { %6229 = vmatprep.subr.bf16.mxu1 %v6636_v2 }
 0x171   :  { %6230 = vmatpush3.bf16.xpose.msra.mxu1 %v188_v40 }
 0x178   :  { %6232 = vmatmul.mubr.msk.bf16.vlgmr.msra.gmra.mrb[0].mxu1 %vm81_vm9, %v6742_v27 }
 0x24b   :  { %v224_v42 = vpop.f32.mrb[0].mxu1 }
 0x24c   :  { %v231_v43 = vmul.f32 0.35355338, %v224_v42  ;;  %v6233_v44 = vpop.f32.mrb[1].mxu1 }
 0x24d   :  { %v227_v46 = vpop.f32.mrb[2].mxu1 }
 0x24e   :  { %v233_v48 = vadd.f32 %v231_v43, %v27_v41  ;;  %v232_v49 = vmul.f32 0.35355338, %v227_v46  ;;  %v6234_v50 = vpop.f32.mrb[3].mxu1 }
 0x250   :  { %v234_v51 = vadd.f32 %v232_v49, %v28_v45  ;;  %v266_v52 = vsel %vm6775_vm15, %v233_v48, -1e+30  ;;  %v237_v53 = vsel %vm38_vm8, %v233_v48, -1e+30  ;;  %v252_v56 = vsel %vm6709_vm10, %v233_v48, -1e+30 }
 0x251   :  { %v268_v54 = vsel %vm239_vm1, %v266_v52, -inf  ;;  %v240_v55 = vsel %vm239_vm1, %v237_v53, -inf  ;;  %v254_v59 = vsel %vm239_vm1, %v252_v56, -inf  ;;  %v280_v62 = vsel %vm6791_vm4, %v233_v48, -1e+30 }
 0x252   :  { %269 = vmax.xlane.f32.xlu1 %v268_v54  ;;  %241 = vmax.xlane.f32.xlu0 %v240_v55  ;;  %v238_v57 = vsel %vm38_vm8, %v234_v51, -1e+30  ;;  %v253_v61 = vsel %vm6709_vm10, %v234_v51, -1e+30  ;;  %v282_v0 = vsel %vm239_vm1, %v280_v62, -inf }
 0x253   :  { %v243_v60 = vsel %vm239_vm1, %v238_v57, -inf  ;;  %v257_v63 = vsel %vm239_vm1, %v253_v61, -inf  ;;  %v267_v3 = vsel %vm6775_vm15, %v234_v51, -1e+30  ;;  %v281_v5 = vsel %vm6791_vm4, %v234_v51, -1e+30 }
 0x254   :  { %v271_v4 = vsel %vm239_vm1, %v267_v3, -inf  ;;  %v285_v7 = vsel %vm239_vm1, %v281_v5, -inf }
 0x256   :  { %255 = vmax.xlane.f32.xlu0 %v254_v59  ;;  %244 = vmax.xlane.f32.xlu1 %v243_v60 }
 0x25a   :  { %258 = vmax.xlane.f32.xlu0 %v257_v63  ;;  %283 = vmax.xlane.f32.xlu1 %v282_v0 }
 0x25e   :  { %272 = vmax.xlane.f32.xlu0 %v271_v4 }
 0x262   :  { %286 = vmax.xlane.f32.xlu0 %v285_v7 }
 0x26b   :  { %147 = vrot.lane.b32.xlu1 %v6713_v11, %s6640_s13 }
 0x26f   :  { %155 = vrot.lane.b32.xlu1 %v6715_v12, %s6640_s13 }
 0x273   :  { %159 = vrot.lane.b32.xlu1 %v6724_v14, %s6640_s13 }
 0x278   :  { %151 = vrot.lane.b32.xlu0 %v6727_v16, %s6640_s13 }
 0x2df   :  { %v270_v8 = vpop.xlane.xlu1 %269  ;;  %v242_v9 = vpop.xlane.xlu0 %241 }
 0x2e0   :  { %v246_v18 = vsel %vm38_vm8, %v242_v9, 0.0  ;;  %v274_v12 = vsel %vm6775_vm15, %v270_v8, 0.0 }
 0x2e3   :  { %v256_v13 = vpop.xlane.xlu0 %255  ;;  %v245_v15 = vpop.xlane.xlu1 %244 }
 0x2e4   :  { %v260_v19 = vsel %vm6709_vm10, %v256_v13, 0.0  ;;  %v247_v31 = vsel %vm38_vm8, %v245_v15, 0.0 }
 0x2e5   :  { %v262_v11 = vadd.f32 %v260_v19, %v246_v18 }
 0x2e7   :  { %v259_v20 = vpop.xlane.xlu0 %258  ;;  %v276_v22 = vadd.f32 %v274_v12, %v262_v11  ;;  %v284_v14 = vpop.xlane.xlu1 %283 }
 0x2e8   :  { %v288_v16 = vsel %vm6791_vm4, %v284_v14, 0.0  ;;  %v261_v24 = vsel %vm6709_vm10, %v259_v20, 0.0 }
 0x2e9   :  { %v290_v23 = vadd.f32 %v288_v16, %v276_v22  ;;  %v263_v34 = vadd.f32 %v261_v24, %v247_v31 }
 0x2eb   :  { %v292_v25 = vsub.f32 %v233_v48, %v290_v23  ;;  %v273_v28 = vpop.xlane.xlu0 %272  ;;  %v6827_v29 = vpop.permute.xlu1 %147 }
 0x2ec   :  { %v275_v32 = vsel %vm6775_vm15, %v273_v28, 0.0  ;;  %v150_v33 = vmul.bf16 %v6827_v29, %v6742_v27 }
 0x2ed   :  { %v294_v35 = vmul.f32 1.442695, %v292_v25  ;;  %v277_v36 = vadd.f32 %v275_v32, %v263_v34 }
 0x2ee   :  { %355 = vrot.lane.b32.xlu1 %v150_v33, %s6640_s13 }
 0x2ef   :  { %6576 = vpow2.f32 %v294_v35  ;;  %v287_v37 = vpop.xlane.xlu0 %286  ;;  %v6879_v0 = vpop.permute.xlu1 %155 }
 0x2f0   :  { %v289_v38 = vsel %vm6791_vm4, %v287_v37, 0.0  ;;  %v158_v3 = vmul.bf16 %v6879_v0, %v6742_v27 }
 0x2f1   :  { %v291_v39 = vadd.f32 %v289_v38, %v277_v36 }
 0x2f3   :  { %v293_v40 = vsub.f32 %v234_v51, %v291_v39  ;;  %v6874_v62 = vpop.permute.xlu0 %151  ;;  %v6883_v4 = vpop.permute.xlu1 %159 }
 0x2f4   :  { %v154_v63 = vmul.bf16 %v6874_v62, %v6742_v27  ;;  %v162_v5 = vmul.bf16 %v6883_v4, %v6742_v27 }
 0x2f5   :  { %v296_v41 = vmul.f32 1.442695, %v293_v40 }
 0x2f7   :  { %6578 = vpow2.f32 %v296_v41 }
 0x2f9   :  { %v6838_v42 = vpop.eup %6576 }
 0x2fa   :  { %v298_v43 = vsel %vm38_vm8, %v6838_v42, 0.0  ;;  %v310_v45 = vsel %vm6709_vm10, %v6838_v42, 0.0  ;;  %v322_v55 = vsel %vm6775_vm15, %v6838_v42, 0.0  ;;  %v334_v57 = vsel %vm6791_vm4, %v6838_v42, 0.0 }
 0x2fb   :  { %v300_v44 = vsel %vm239_vm1, %v298_v43, 0.0  ;;  %v312_v46 = vsel %vm239_vm1, %v310_v45, 0.0  ;;  %v324_v56 = vsel %vm239_vm1, %v322_v55, 0.0  ;;  %v336_v59 = vsel %vm239_vm1, %v334_v57, 0.0 }
 0x2fc   :  { %301 = vadd.xlane.f32.xlu0 %v300_v44  ;;  %v6312_v44 = vld [vmem:[%s8362_s2] sm:$0xff]  }
 0x300   :  { %313 = vadd.xlane.f32.xlu0 %v312_v46  ;;  %v6313_v46 = vld [vmem:[%s8362_s2 + $0x8] sm:$0xff]  }
 0x301   :  { %v6848_v48 = vpop.eup %6578 }
 0x302   :  { %v311_v49 = vsel %vm6709_vm10, %v6848_v48, 0.0  ;;  %v323_v51 = vsel %vm6775_vm15, %v6848_v48, 0.0  ;;  %v335_v53 = vsel %vm6791_vm4, %v6848_v48, 0.0  ;;  %v299_v60 = vsel %vm38_vm8, %v6848_v48, 0.0 }
 0x303   :  { %v315_v50 = vsel %vm239_vm1, %v311_v49, 0.0  ;;  %v327_v52 = vsel %vm239_vm1, %v323_v51, 0.0  ;;  %v339_v54 = vsel %vm239_vm1, %v335_v53, 0.0  ;;  %v303_v61 = vsel %vm239_vm1, %v299_v60, 0.0  ;;  %v6608_v60 = vld [vmem:[%s8360_s0] sm:$0xff] }
 0x304   :  { %316 = vadd.xlane.f32.xlu0 %v315_v50 }
 0x308   :  { %328 = vadd.xlane.f32.xlu0 %v327_v52  ;;  %v416_v52 = vld [vmem:[%s8365_s5 + $0x1] ss:$0 sm:$0xff] }
 0x30c   :  { %340 = vadd.xlane.f32.xlu0 %v339_v54 }
 0x312   :  { %325 = vadd.xlane.f32.xlu1 %v324_v56 }
 0x316   :  { %337 = vadd.xlane.f32.xlu1 %v336_v59 }
 0x31a   :  { %304 = vadd.xlane.f32.xlu1 %v303_v61 }
 0x322   :  { %357 = vrot.lane.b32.xlu0 %v154_v63, %s6640_s13 }
 0x32b   :  { %359 = vrot.lane.b32.xlu1 %v158_v3, %s6640_s13  ;;  %v6609_v3 = vld [vmem:[%s8360_s0 + $0x8] sm:$0xff] }
 0x32f   :  { %361 = vrot.lane.b32.xlu1 %v162_v5, %s6640_s13 }
 0x360   :  { %v356_v7 = vpop.permute.xlu1 %355 }
 0x361   :  { %6236 = vmatpush3.bf16.msra.mxu0 %v356_v7 }
 0x362   :  { %6237 = vmatprep.subr.bf16.mxu0 %v6636_v2 }
 0x389   :  { %v302_v8 = vpop.xlane.xlu0 %301 }
 0x38a   :  { %v306_v20 = vsel %vm38_vm8, %v302_v8, 0.0 }
 0x38d   :  { %v314_v9 = vpop.xlane.xlu0 %313 }
 0x38e   :  { %v318_v12 = vsel %vm6709_vm10, %v314_v9, 0.0 }
 0x38f   :  { %v320_v14 = vadd.f32 %v318_v12, %v306_v20 }
 0x391   :  { %v317_v13 = vpop.xlane.xlu0 %316 }
 0x392   :  { %v319_v25 = vsel %vm6709_vm10, %v317_v13, 0.0 }
 0x395   :  { %v329_v15 = vpop.xlane.xlu0 %328 }
 0x396   :  { %v331_v33 = vsel %vm6775_vm15, %v329_v15, 0.0 }
 0x399   :  { %v341_v18 = vpop.xlane.xlu0 %340 }
 0x39a   :  { %v343_v36 = vsel %vm6791_vm4, %v341_v18, 0.0 }
 0x39d   :  { %v358_v19 = vpop.permute.xlu0 %357 }
 0x39e   :  { %6238 = vmatpush3.bf16.msra.mxu0 %v358_v19 }
 0x39f   :  { %v326_v11 = vpop.xlane.xlu1 %325  ;;  %6239 = vmatprep.subr.bf16.mxu0 %v6636_v2 }
 0x3a0   :  { %v330_v22 = vsel %vm6775_vm15, %v326_v11, 0.0 }
 0x3a1   :  { %v332_v23 = vadd.f32 %v330_v22, %v320_v14  ;;  %v509_v22 = vld [vmem:[%s8363_s3] sm:$0xff] }
 0x3a2   :  { %v517_v14 = vld [vmem:[%s8363_s3 + $0x40] sm:$0xff] }
 0x3a3   :  { %v338_v27 = vpop.xlane.xlu1 %337 }
 0x3a4   :  { %v342_v16 = vsel %vm6791_vm4, %v338_v27, 0.0 }
 0x3a5   :  { %v344_v31 = vadd.f32 %v342_v16, %v332_v23  ;;  %v510_v16 = vld [vmem:[%s8363_s3 + $0x8] sm:$0xff]  ;;  %v5170_v23 = vcombine.high %v509_v22, %v517_v14 }
 0x3a7   :  { %v305_v24 = vpop.xlane.xlu1 %304  ;;  %6580 = vrcp.f32 %v344_v31 }
 0x3a8   :  { %v307_v28 = vsel %vm38_vm8, %v305_v24, 0.0  ;;  %v518_v24 = vld [vmem:[%s8363_s3 + $0x48] sm:$0xff] }
 0x3a9   :  { %v321_v32 = vadd.f32 %v319_v25, %v307_v28  ;;  %v5169_v25 = vcombine.low %v509_v22, %v517_v14  ;;  %v5171_v28 = vcombine.low %v510_v16, %v518_v24  ;;  %v5172_v31 = vcombine.high %v510_v16, %v518_v24  ;;  %v514_v22 = vld [vmem:[%s8363_s3 + $0x28] sm:$0xff] }
 0x3aa   :  { %v522_v14 = vld [vmem:[%s8363_s3 + $0x68] sm:$0xff] }
 0x3ab   :  { %v333_v34 = vadd.f32 %v331_v33, %v321_v32  ;;  %v360_v35 = vpop.permute.xlu1 %359  ;;  %837 = vmatprep.subr.bf16.mxu1 %v5172_v31  ;;  %v525_v32 = vld [vmem:[%s8363_s3 + $0x80] sm:$0xff] }
 0x3ac   :  { %6240 = vmatpush3.bf16.msra.mxu0 %v360_v35  ;;  %v533_v33 = vld [vmem:[%s8363_s3 + $0xc0] sm:$0xff]  ;;  %838 = vmatpush1.bf16.msra.mxu1 %v5171_v28 }
 0x3ad   :  { %v345_v37 = vadd.f32 %v343_v36, %v333_v34  ;;  %6241 = vmatprep.subr.bf16.mxu0 %v6636_v2  ;;  %v526_v34 = vld [vmem:[%s8363_s3 + $0x88] sm:$0xff]  ;;  %v5186_v35 = vcombine.high %v525_v32, %v533_v33  ;;  %v529_v28 = vld [vmem:[%s8363_s3 + $0xa0] sm:$0xff] }
 0x3ae   :  { %v534_v36 = vld [vmem:[%s8363_s3 + $0xc8] sm:$0xff]  ;;  %v537_v31 = vld [vmem:[%s8363_s3 + $0xe0] sm:$0xff] }
 0x3af   :  { %6582 = vrcp.f32 %v345_v37  ;;  %v362_v38 = vpop.permute.xlu1 %361  ;;  %v5185_v37 = vcombine.low %v525_v32, %v533_v33  ;;  %v530_v32 = vld [vmem:[%s8363_s3 + $0xa8] sm:$0xff] }
 0x3b0   :  { %6242 = vmatpush3.bf16.msra.mxu0 %v362_v38  ;;  %v5187_v38 = vcombine.low %v526_v34, %v534_v36  ;;  %v538_v33 = vld [vmem:[%s8363_s3 + $0xe8] sm:$0xff] }
 0x3b1   :  { %6247 = vmatprep.subr.bf16.mxu0 %v6636_v2  ;;  %v6581_v39 = vpop.eup %6580 }
 0x3b2   :  { %v348_v41 = vmul.f32 %v6581_v39, %v6838_v42  ;;  %v5188_v39 = vcombine.high %v526_v34, %v534_v36  ;;  %v5194_v36 = vcombine.high %v529_v28, %v537_v31 }
 0x3b4   :  { %839 = vmatprep.subr.bf16.mxu1 %v5188_v39  ;;  %v523_v39 = vld [vmem:[%s8363_s3 + $0x70] sm:$0xff] }
 0x3b5   :  { %840 = vmatpush1.bf16.msra.mxu1 %v5187_v38  ;;  %v515_v38 = vld [vmem:[%s8363_s3 + $0x30] sm:$0xff] }
 0x3b9   :  { %v6583_v40 = vpop.eup %6582 }
 0x3ba   :  { %v349_v43 = vmul.f32 %v6583_v40, %v6848_v48  ;;  %v511_v40 = vld [vmem:[%s8363_s3 + $0x10] sm:$0xff] }
 0x3bc   :  { %v350_v45 = vpack.c.bf16 %v349_v43, %v348_v41  ;;  %v519_v41 = vld [vmem:[%s8363_s3 + $0x50] sm:$0xff]  ;;  %v512_v43 = vld [vmem:[%s8363_s3 + $0x18] sm:$0xff] }
 0x3be   :  { %6244 = vmatmul.mubr.msk.bf16.vlgmr.msra.gmra.mrb[4].mxu0 %vm239_vm1, %v350_v45  ;;  %v5174_v45 = vcombine.high %v511_v40, %v519_v41 }
 0x3bf   :  { %6248 = vmatpush3.bf16.msra.mxu0 %v6312_v44  ;;  %6251 = vmatprep.mubr.msk.bf16.mxu0 %vm6637_vm0, %v6636_v2  ;;  %v6641_v44 = vmov 0  }
 0x3c0   :  { %6249 = vmatprep.subr.bf16.mxu0 %v6636_v2  ;;  %869 = vmatprep.mubr.bf16.mxu1 %v6641_v44 }
 0x3c3   :  { %6250 = vmatpush3.bf16.msra.mxu0 %v6313_v46  ;;  %v520_v46 = vld [vmem:[%s8363_s3 + $0x58] sm:$0xff] }
 0x3c4   :  { %794 = vmatprep.subr.bf16.mxu0 %v5170_v23 }
 0x491   :  { %v404_v42 = vpop.f32.mrb[4].mxu0 }
 0x492   :  { %v6245_v48 = vpop.f32.mrb[5].mxu0 }
 0x493   :  { %v407_v49 = vpop.f32.mrb[6].mxu0  ;;  %v5175_v48 = vcombine.low %v512_v43, %v520_v46 }
 0x494   :  { %v411_v50 = vpack.c.bf16 %v407_v49, %v404_v42  ;;  %v6246_v51 = vpop.f32.mrb[7].mxu0  ;;  %v5173_v42 = vcombine.low %v511_v40, %v519_v41  ;;  %v5176_v49 = vcombine.high %v512_v43, %v520_v46  ;;  %v516_v40 = vld [vmem:[%s8363_s3 + $0x38] sm:$0xff]  ;;  %v5193_v43 = vcombine.low %v529_v28, %v537_v31  ;;  %v6335_v28 = vld [vmem:[%s8364_s4 + $0xe8] sm:$0xff]  }
 0x495   :  { %v524_v41 = vld [vmem:[%s8363_s3 + $0x78] sm:$0xff]  ;;  %v5182_v46 = vcombine.high %v515_v38, %v523_v39  ;;  %v6336_v31 = vld [vmem:[%s8364_s4 + $0x28] sm:$0xff]  }
 0x496   :  { %6252 = vmatmul.mubr.msk.bf16.vlgmr.msra.gmra.mrb[8].mxu0 %vm81_vm9, %v411_v50  ;;  %923 = vmatprep.subr.bf16.mxu1 %v5176_v49  ;;  %v539_v49 = vld [vmem:[%s8363_s3 + $0xf0] sm:$0xff] }
 0x497   :  { %795 = vmatpush1.bf16.msra.mxu0 %v5169_v25  ;;  %826 = vmatprep.mubr.bf16.mxu0 %v6641_v44  ;;  %v5180_v25 = vcombine.high %v514_v22, %v522_v14 }
 0x498   :  { %796 = vmatprep.subr.bf16.mxu0 %v5186_v35  ;;  %v5179_v35 = vcombine.low %v514_v22, %v522_v14  ;;  %v6329_v22 = vld [vmem:[%s8364_s4 + $0x98] sm:$0xff]   ;;  %v6330_v14 = vld [vmem:[%s8364_s4 + $0x60] sm:$0xff]  }
 0x49b   :  { %797 = vmatpush1.bf16.msra.mxu0 %v5185_v37  ;;  %v5196_v37 = vcombine.high %v530_v32, %v538_v33 }
 0x49c   :  { %880 = vmatprep.subr.bf16.mxu0 %v5174_v45  ;;  %v5195_v45 = vcombine.low %v530_v32, %v538_v33  ;;  %v6337_v32 = vld [vmem:[%s8364_s4 + $0xa8] sm:$0xff]   ;;  %v6338_v33 = vld [vmem:[%s8364_s4 + $0x70] sm:$0xff]  }
 0x569   :  { %v466_v53 = vpop.f32.mrb[8].mxu0 }
 0x56a   :  { %v467_v54 = vadd.f32 %v466_v53, %v416_v52  ;;  %v6253_v55 = vpop.f32.mrb[9].mxu0 }
 0x56b   :  { %v469_v56 = vpop.f32.mrb[10].mxu0 }
 0x56c   :  { %v470_v57 = vadd.f32 %v469_v56, %v416_v52  ;;  %v6254_v59 = vpop.f32.mrb[11].mxu0  ;;  %v473_v61 = vadd.f32 %v6608_v60, %v467_v54 }
 0x56d   :  { %v475_v59 = vld [vmem:[%s8365_s5 + $0x2] ss:$0 sm:$0xff] }
 0x56e   :  { %v477_v63 = vsel %vm81_vm9, %v473_v61, 0.0  ;;  %v474_v5 = vadd.f32 %v6609_v3, %v470_v57  ;;  %v476_v3 = vld [vmem:[%s8365_s5 + $0x3] ss:$0 sm:$0xff] }
 0x56f   :  { %478 = vadd.xlane.f32.xlu0 %v477_v63 }
 0x570   :  { %v480_v7 = vsel %vm81_vm9, %v474_v5, 0.0 }
 0x571   :  { %481 = vadd.xlane.f32.xlu1 %v480_v7  ;;  %v527_v7 = vld [vmem:[%s8363_s3 + $0x90] sm:$0xff] }
 0x5fc   :  { %v479_v8 = vpop.xlane.xlu0 %478 }
 0x5fd   :  { %v484_v9 = vmul.f32 0.03125, %v479_v8  ;;  %v535_v8 = vld [vmem:[%s8363_s3 + $0xd0] sm:$0xff] }
 0x5fe   :  { %v482_v13 = vpop.xlane.xlu1 %481  ;;  %v5189_v16 = vcombine.low %v527_v7, %v535_v8 }
 0x5ff   :  { %v486_v15 = vsub.f32 %v473_v61, %v484_v9  ;;  %v485_v18 = vmul.f32 0.03125, %v482_v13  ;;  %v528_v9 = vld [vmem:[%s8363_s3 + $0x98] sm:$0xff] }
 0x600   :  { %v536_v13 = vld [vmem:[%s8363_s3 + $0xd8] sm:$0xff] }
 0x601   :  { %v487_v19 = vsub.f32 %v474_v5, %v485_v18  ;;  %v488_v11 = vmul.f32 %v486_v15, %v486_v15  ;;  %v5191_v23 = vcombine.low %v528_v9, %v536_v13 }
 0x603   :  { %v490_v12 = vsel %vm81_vm9, %v488_v11, 0.0  ;;  %v489_v27 = vmul.f32 %v487_v19, %v487_v19  ;;  %v5190_v11 = vcombine.high %v527_v7, %v535_v8  ;;  %v6320_v7 = vld [vmem:[%s8364_s4 + $0x8] sm:$0xff]  }
 0x604   :  { %491 = vadd.xlane.f32.xlu0 %v490_v12  ;;  %v5192_v12 = vcombine.high %v528_v9, %v536_v13  ;;  %v6321_v8 = vld [vmem:[%s8364_s4 + $0x88] sm:$0xff]   ;;  %v6322_v9 = vld [vmem:[%s8364_s4 + $0x50] sm:$0xff]  }
 0x605   :  { %v493_v20 = vsel %vm81_vm9, %v489_v27, 0.0  ;;  %v513_v27 = vld [vmem:[%s8363_s3 + $0x20] sm:$0xff]  ;;  %v6323_v13 = vld [vmem:[%s8364_s4 + $0xd0] sm:$0xff]  }
 0x608   :  { %494 = vadd.xlane.f32.xlu0 %v493_v20  ;;  %v521_v20 = vld [vmem:[%s8363_s3 + $0x60] sm:$0xff] }
 0x609   :  { %v5178_v24 = vcombine.high %v513_v27, %v521_v20  ;;  %v5177_v34 = vcombine.low %v513_v27, %v521_v20  ;;  %v6327_v27 = vld [vmem:[%s8364_s4 + $0xd8] sm:$0xff]  }
 0x60a   :  { %v6328_v20 = vld [vmem:[%s8364_s4 + $0x18] sm:$0xff]  }
 0x691   :  { %v492_v50 = vpop.xlane.xlu0 %491 }
 0x692   :  { %v496_v51 = vmul.f32 0.03125, %v492_v50  ;;  %v532_v50 = vld [vmem:[%s8363_s3 + $0xb8] sm:$0xff] }
 0x694   :  { %v498_v52 = vadd.f32 1e-05, %v496_v51  ;;  %v540_v51 = vld [vmem:[%s8363_s3 + $0xf8] sm:$0xff] }
 0x695   :  { %v495_v53 = vpop.xlane.xlu0 %494 }
 0x696   :  { %6584 = vrsqrt.f32 %v498_v52  ;;  %v497_v54 = vmul.f32 0.03125, %v495_v53  ;;  %v5181_v52 = vcombine.low %v515_v38, %v523_v39  ;;  %v5183_v53 = vcombine.low %v516_v40, %v524_v41  ;;  %v6343_v38 = vld [vmem:[%s8364_s4 + $0xf8] sm:$0xff]  }
 0x697   :  { %v6344_v39 = vld [vmem:[%s8364_s4 + $0x38] sm:$0xff]  }
 0x698   :  { %v499_v55 = vadd.f32 1e-05, %v497_v54 }
 0x69a   :  { %6586 = vrsqrt.f32 %v499_v55  ;;  %v5200_v55 = vcombine.high %v532_v50, %v540_v51 }
 0x6a0   :  { %v6585_v56 = vpop.eup %6584 }
 0x6a1   :  { %v502_v57 = vmul.f32 %v6585_v56, %v486_v15 }
 0x6a3   :  { %v504_v61 = vmul.f32 %v502_v57, %v475_v59  ;;  %v5199_v57 = vcombine.low %v532_v50, %v540_v51 }
 0x6a4   :  { %v6587_v60 = vpop.eup %6586 }
 0x6a5   :  { %v503_v63 = vmul.f32 %v6587_v60, %v487_v19  ;;  %v6991_v15 = vadd.f32 %v504_v61, %v476_v3  ;;  %v6315_v60 = vld [vmem:[%s8364_s4 + $0xc0] sm:$0xff]  }
 0x6a6   :  { %v6316_v61 = vld [vmem:[%s8364_s4] sm:$0xff]  }
 0x6a7   :  { %v505_v5 = vmul.f32 %v503_v63, %v475_v59  ;;  %v6314_v59 = vld [vmem:[%s8364_s4 + $0x40] sm:$0xff]  }
 0x6a8   :  { %v6317_v63 = vld [vmem:[%s8364_s4 + $0x80] sm:$0xff]  }
 0x6a9   :  { %v6993_v18 = vadd.f32 %v505_v5, %v476_v3  ;;  %v6318_v3 = vld [vmem:[%s8364_s4 + $0x48] sm:$0xff]  }
 0x6aa   :  { %v6319_v5 = vld [vmem:[%s8364_s4 + $0xc8] sm:$0xff]  }
 0x6ab   :  { %v6997_v19 = vpack.c.bf16 %v6993_v18, %v6991_v15 }
 0x6ad   :  { %5201 = vmatmul.mubr.msk.bf16.vlgmr.msra.gmra.mrb[12].mxu0 %vm81_vm9, %v6997_v19  ;;  %5202 = vmatmul.mubr.msk.bf16.vlgmr.msra.gmra.mrb[4].mxu1 %vm81_vm9, %v6997_v19 }
 0x6ae   :  { %881 = vmatpush1.bf16.msra.mxu0 %v5173_v42  ;;  %924 = vmatpush1.bf16.msra.mxu1 %v5175_v48  ;;  %v5184_v42 = vcombine.high %v516_v40, %v524_v41  ;;  %v531_v48 = vld [vmem:[%s8363_s3 + $0xb0] sm:$0xff]  ;;  %v6345_v40 = vld [vmem:[%s8364_s4 + $0xb8] sm:$0xff]   ;;  %v6346_v41 = vld [vmem:[%s8364_s4 + $0x140] sm:$0xff]  }
 0x6af   :  { %882 = vmatprep.subr.bf16.mxu0 %v5190_v11  ;;  %925 = vmatprep.subr.bf16.mxu1 %v5192_v12  ;;  %v5198_v54 = vcombine.high %v531_v48, %v539_v49  ;;  %v5197_v56 = vcombine.low %v531_v48, %v539_v49  ;;  %v6325_v11 = vld [vmem:[%s8364_s4 + $0x90] sm:$0xff]   ;;  %v6326_v12 = vld [vmem:[%s8364_s4 + $0x58] sm:$0xff]  }
 0x6b0   :  { %912 = vmatprep.mubr.bf16.mxu0 %v6641_v44  ;;  %955 = vmatprep.mubr.bf16.mxu1 %v6641_v44 }
 0x6b2   :  { %883 = vmatpush1.bf16.msra.mxu0 %v5189_v16  ;;  %926 = vmatpush1.bf16.msra.mxu1 %v5191_v23  ;;  %v6331_v16 = vld [vmem:[%s8364_s4 + $0xe0] sm:$0xff]  }
 0x6b3   :  { %966 = vmatprep.subr.bf16.mxu0 %v5178_v24  ;;  %1009 = vmatprep.subr.bf16.mxu1 %v5180_v25  ;;  %v6332_v23 = vld [vmem:[%s8364_s4 + $0x20] sm:$0xff]   ;;  %v6334_v25 = vld [vmem:[%s8364_s4 + $0x68] sm:$0xff]  }
 0x6b4   :  { %v6333_v24 = vld [vmem:[%s8364_s4 + $0xa0] sm:$0xff]  }
 0x6b5   :  { %5203 = vmatmul.mubr.msk.bf16.vlgmr.msra.gmra.mrb[16].mxu0 %vm81_vm9, %v6997_v19  ;;  %5204 = vmatmul.mubr.msk.bf16.vlgmr.msra.gmra.mrb[8].mxu1 %vm81_vm9, %v6997_v19 }
 0x6b6   :  { %967 = vmatpush1.bf16.msra.mxu0 %v5177_v34  ;;  %1010 = vmatpush1.bf16.msra.mxu1 %v5179_v35  ;;  %v6339_v34 = vld [vmem:[%s8364_s4 + $0xf0] sm:$0xff]  }
 0x6b7   :  { %968 = vmatprep.subr.bf16.mxu0 %v5194_v36  ;;  %1011 = vmatprep.subr.bf16.mxu1 %v5196_v37  ;;  %v6340_v35 = vld [vmem:[%s8364_s4 + $0x30] sm:$0xff]   ;;  %v6342_v37 = vld [vmem:[%s8364_s4 + $0x78] sm:$0xff]  }
 0x6b8   :  { %998 = vmatprep.mubr.bf16.mxu0 %v6641_v44  ;;  %1041 = vmatprep.mubr.bf16.mxu1 %v6641_v44  ;;  %v6341_v36 = vld [vmem:[%s8364_s4 + $0xb0] sm:$0xff]  }
 0x6ba   :  { %969 = vmatpush1.bf16.msra.mxu0 %v5193_v43  ;;  %1012 = vmatpush1.bf16.msra.mxu1 %v5195_v45  ;;  %v6347_v43 = vld [vmem:[%s8364_s4 + $0x1c0] sm:$0xff]   ;;  %v552_v45 = vshrl.u32 %v29_v1, 7 }
 0x6bb   :  { %1052 = vmatprep.subr.bf16.mxu0 %v5182_v46  ;;  %1095 = vmatprep.subr.bf16.mxu1 %v5184_v42  ;;  %v5165_v46 = vld [vmem:[%s8365_s5 + $0x4] ss:$8 sm:$0xf] }
 0x6bc   :  { %v5166_v42 = vld [vmem:[%s8365_s5 + $0x4] ss:$8 sm:$0xf0]  ;;  %v7178_v49 = vsub.s32 0, %v552_v45  ;;  %v7180_v50 = vsub.s32 2, %v552_v45  ;;  %v7182_v51 = vsub.s32 1, %v552_v45 }
 0x6bd   :  { %5205 = vmatmul.mubr.msk.bf16.vlgmr.msra.gmra.mrb[20].mxu0 %vm81_vm9, %v6997_v19  ;;  %5206 = vmatmul.mubr.msk.bf16.vlgmr.msra.gmra.mrb[12].mxu1 %vm81_vm9, %v6997_v19  ;;  %v544_v48 = vor.u32 %v5166_v42, %v5165_v46 }
 0x6be   :  { %1053 = vmatpush1.bf16.msra.mxu0 %v5181_v52  ;;  %1096 = vmatpush1.bf16.msra.mxu1 %v5183_v53  ;;  %v7184_v52 = vsub.s32 3, %v552_v45 }
 0x6bf   :  { %1054 = vmatprep.subr.bf16.mxu0 %v5198_v54  ;;  %1097 = vmatprep.subr.bf16.mxu1 %v5200_v55  ;;  %v554_v53 = vrot.slane %v544_v48, %v7178_v49  ;;  %v562_v1 = vrot.slane %v544_v48, %v7180_v50  ;;  %v558_v54 = vrot.slane %v544_v48, %v7182_v51 }
 0x6c0   :  { %1084 = vmatprep.mubr.bf16.mxu0 %v6641_v44  ;;  %1127 = vmatprep.mubr.bf16.mxu1 %v6641_v44  ;;  %v566_v55 = vrot.slane %v544_v48, %v7184_v52 }
 0x6c2   :  { %1055 = vmatpush1.bf16.msra.mxu0 %v5197_v56  ;;  %1098 = vmatpush1.bf16.msra.mxu1 %v5199_v57  ;;  %v7190_v56 = vsub.s32 4, %v552_v45  ;;  %v7192_v57 = vsub.s32 6, %v552_v45 }
 0x6c3   :  { %5844 = vmatprep.subr.bf16.mxu0 %v6314_v59  ;;  %5866 = vmatprep.subr.bf16.mxu1 %v6315_v60  ;;  %v7194_v59 = vsub.s32 5, %v552_v45 }
 0x6c5   :  { %5207 = vmatmul.mubr.msk.bf16.vlgmr.msra.gmra.mrb[24].mxu0 %vm81_vm9, %v6997_v19  ;;  %5208 = vmatmul.mubr.msk.bf16.vlgmr.msra.gmra.mrb[16].mxu1 %vm81_vm9, %v6997_v19  ;;  %v6324_v19 = vld [vmem:[%s8364_s4 + $0x10] sm:$0xff]  }
 0x6c6   :  { %5845 = vmatpush3.bf16.msra.mxu0 %v6316_v61  ;;  %5867 = vmatpush3.bf16.msra.mxu1 %v6317_v63  ;;  %v7196_v63 = vsub.s32 7, %v552_v45 }
 0x6c7   :  { %5846 = vmatprep.subr.bf16.mxu0 %v6318_v3  ;;  %5868 = vmatprep.subr.bf16.mxu1 %v6319_v5  ;;  %v5167_v3 = vld [vmem:[%s8365_s5 + $0x44] ss:$8 sm:$0xf] }
 0x6ca   :  { %5847 = vmatpush3.bf16.msra.mxu0 %v6320_v7  ;;  %5869 = vmatpush3.bf16.msra.mxu1 %v6321_v8 }
 0x6cb   :  { %5848 = vmatprep.subr.bf16.mxu0 %v6322_v9  ;;  %5870 = vmatprep.subr.bf16.mxu1 %v6323_v13  ;;  %v5168_v13 = vld [vmem:[%s8365_s5 + $0x44] ss:$8 sm:$0xf0] }
 0x6ce   :  { %5849 = vmatpush3.bf16.msra.mxu0 %v6324_v19  ;;  %5871 = vmatpush3.bf16.msra.mxu1 %v6325_v11 }
 0x6cf   :  { %5850 = vmatprep.subr.bf16.mxu0 %v6326_v12  ;;  %5872 = vmatprep.subr.bf16.mxu1 %v6327_v27 }
 0x6d2   :  { %5851 = vmatpush3.bf16.msra.mxu0 %v6328_v20  ;;  %5873 = vmatpush3.bf16.msra.mxu1 %v6329_v22  ;;  %v570_v20 = vrot.slane %v544_v48, %v7190_v56 }
 0x6d3   :  { %5852 = vmatprep.subr.bf16.mxu0 %v6330_v14  ;;  %5874 = vmatprep.subr.bf16.mxu1 %v6331_v16 }
 0x6d6   :  { %5853 = vmatpush3.bf16.msra.mxu0 %v6332_v23  ;;  %5875 = vmatpush3.bf16.msra.mxu1 %v6333_v24  ;;  %v578_v24 = vrot.slane %v544_v48, %v7192_v57 }
 0x6d7   :  { %5854 = vmatprep.subr.bf16.mxu0 %v6334_v25  ;;  %5876 = vmatprep.subr.bf16.mxu1 %v6335_v28  ;;  %v574_v25 = vrot.slane %v544_v48, %v7194_v59 }
 0x6da   :  { %5855 = vmatpush3.bf16.msra.mxu0 %v6336_v31  ;;  %5877 = vmatpush3.bf16.msra.mxu1 %v6337_v32  ;;  %v582_v32 = vrot.slane %v544_v48, %v7196_v63  ;;  %v6348_v48 = vld [vmem:[%s8364_s4 + $0x100] sm:$0xff]  }
 0x6db   :  { %5856 = vmatprep.subr.bf16.mxu0 %v6338_v33  ;;  %5878 = vmatprep.subr.bf16.mxu1 %v6339_v34  ;;  %v7208_v33 = vor.u32 %v5168_v13, %v5167_v3 }
 0x6de   :  { %5857 = vmatpush3.bf16.msra.mxu0 %v6340_v35  ;;  %5879 = vmatpush3.bf16.msra.mxu1 %v6341_v36 }
 0x6df   :  { %5858 = vmatprep.subr.bf16.mxu0 %v6342_v37  ;;  %5880 = vmatprep.subr.bf16.mxu1 %v6343_v38 }
 0x6e2   :  { %5859 = vmatpush3.bf16.msra.mxu0 %v6344_v39  ;;  %5881 = vmatpush3.bf16.msra.mxu1 %v6345_v40 }
 0x6e3   :  { %5888 = vmatprep.subr.bf16.mxu0 %v6346_v41  ;;  %5910 = vmatprep.subr.bf16.mxu1 %v6347_v43 }
 0x780   :  { %v828_v60 = vpop.f32.mrb[12].mxu0  ;;  %v871_v61 = vpop.f32.mrb[4].mxu1 }
 0x781   :  { %v829_v5 = vadd.f32 %v828_v60, %v554_v53  ;;  %v872_v7 = vadd.f32 %v871_v61, %v562_v1  ;;  %v830_v8 = vpop.f32.mrb[13].mxu0  ;;  %v873_v9 = vpop.f32.mrb[5].mxu1 }
 0x782   :  { %v831_v19 = vadd.f32 %v830_v8, %v558_v54  ;;  %v874_v11 = vadd.f32 %v873_v9, %v566_v55  ;;  %v832_v12 = vpop.f32.mrb[14].mxu0  ;;  %v875_v27 = vpop.f32.mrb[6].mxu1  ;;  %v586_v8 = vrot.slane %v7208_v33, %v7178_v49 }
 0x783   :  { %v833_v22 = vadd.f32 %v832_v12, %v554_v53  ;;  %v876_v14 = vadd.f32 %v875_v27, %v562_v1  ;;  %v834_v16 = vpop.f32.mrb[15].mxu0  ;;  %v877_v23 = vpop.f32.mrb[7].mxu1  ;;  %v1138_v34 = vmax.f32 %v829_v5, 0.0  ;;  %v1140_v35 = vmax.f32 %v872_v7, 0.0  ;;  %v6350_v5 = vld [vmem:[%s8364_s4 + $0x148] sm:$0xff]  }
 0x784   :  { %v835_v28 = vadd.f32 %v834_v16, %v558_v54  ;;  %v878_v31 = vadd.f32 %v877_v23, %v566_v55  ;;  %v1139_v38 = vmax.f32 %v831_v19, 0.0  ;;  %v1141_v39 = vmax.f32 %v874_v11, 0.0  ;;  %v6349_v54 = vld [vmem:[%s8364_s4 + $0x180] sm:$0xff]   ;;  %v6351_v7 = vld [vmem:[%s8364_s4 + $0x1c8] sm:$0xff]  }
 0x785   :  { %v1154_v36 = vmax.f32 %v833_v22, 0.0  ;;  %v1156_v37 = vmax.f32 %v876_v14, 0.0  ;;  %v594_v12 = vrot.slane %v7208_v33, %v7180_v50  ;;  %v590_v23 = vrot.slane %v7208_v33, %v7182_v51 }
 0x786   :  { %v1155_v40 = vmax.f32 %v835_v28, 0.0  ;;  %v1157_v41 = vmax.f32 %v878_v31, 0.0 }
 0x787   :  { %v1170_v43 = vpack.c.bf16 %v1154_v36, %v1138_v34  ;;  %v1172_v45 = vpack.c.bf16 %v1156_v37, %v1140_v35  ;;  %v6352_v34 = vld [vmem:[%s8364_s4 + $0x108] sm:$0xff]  }
 0x788   :  { %v1171_v46 = vpack.c.bf16 %v1155_v40, %v1139_v38  ;;  %v1173_v42 = vpack.c.bf16 %v1157_v41, %v1141_v39  ;;  %v914_v53 = vpop.f32.mrb[16].mxu0  ;;  %v957_v1 = vpop.f32.mrb[8].mxu1 }
 0x789   :  { %v915_v55 = vadd.f32 %v914_v53, %v570_v20  ;;  %v958_v60 = vadd.f32 %v957_v1, %v578_v24  ;;  %v916_v61 = vpop.f32.mrb[17].mxu0  ;;  %v959_v3 = vpop.f32.mrb[9].mxu1 }
 0x78a   :  { %v917_v9 = vadd.f32 %v916_v61, %v574_v25  ;;  %v960_v13 = vadd.f32 %v959_v3, %v582_v32  ;;  %v918_v19 = vpop.f32.mrb[18].mxu0  ;;  %v961_v11 = vpop.f32.mrb[10].mxu1  ;;  %2243 = vmatprep.mubr.bf16.mxu0 %v1171_v46  ;;  %2284 = vmatprep.mubr.bf16.mxu1 %v1173_v42 }
 0x78b   :  { %v919_v27 = vadd.f32 %v918_v19, %v570_v20  ;;  %v962_v22 = vadd.f32 %v961_v11, %v578_v24  ;;  %v920_v14 = vpop.f32.mrb[19].mxu0  ;;  %v963_v16 = vpop.f32.mrb[11].mxu1  ;;  %2244 = vmatmul.mubr.bf16.vlgmr.msra.gmra.mrb[28].mxu0 %v1170_v43  ;;  %2285 = vmatmul.mubr.bf16.vlgmr.msra.gmra.mrb[20].mxu1 %v1172_v45  ;;  %v6353_v20 = vld [vmem:[%s8364_s4 + $0x188] sm:$0xff]   ;;  %v598_v24 = vrot.slane %v7208_v33, %v7184_v52  ;;  %v1142_v35 = vmax.f32 %v915_v55, 0.0  ;;  %v6357_v55 = vld [vmem:[%s8364_s4 + $0x190] sm:$0xff]  }
 0x78c   :  { %v921_v28 = vadd.f32 %v920_v14, %v574_v25  ;;  %v964_v31 = vadd.f32 %v963_v16, %v582_v32  ;;  %5889 = vmatpush3.bf16.msra.mxu0 %v6348_v48  ;;  %5911 = vmatpush3.bf16.msra.mxu1 %v6349_v54  ;;  %v1144_v36 = vmax.f32 %v958_v60, 0.0  ;;  %v6354_v25 = vld [vmem:[%s8364_s4 + $0x150] sm:$0xff]   ;;  %v1143_v39 = vmax.f32 %v917_v9, 0.0  ;;  %v6359_v9 = vld [vmem:[%s8364_s4 + $0x1d8] sm:$0xff]  }
 0x78d   :  { %v1158_v37 = vmax.f32 %v919_v27, 0.0  ;;  %v1160_v38 = vmax.f32 %v962_v22, 0.0  ;;  %5890 = vmatprep.subr.bf16.mxu0 %v6350_v5  ;;  %5912 = vmatprep.subr.bf16.mxu1 %v6351_v7  ;;  %v6355_v32 = vld [vmem:[%s8364_s4 + $0x1d0] sm:$0xff]   ;;  %v1145_v40 = vmax.f32 %v960_v13, 0.0  ;;  %v6358_v7 = vld [vmem:[%s8364_s4 + $0x158] sm:$0xff]   ;;  %v602_v22 = vrot.slane %v7208_v33, %v7190_v56 }
 0x78e   :  { %v1159_v41 = vmax.f32 %v921_v28, 0.0  ;;  %v1161_v43 = vmax.f32 %v964_v31, 0.0  ;;  %v6356_v54 = vld [vmem:[%s8364_s4 + $0x110] sm:$0xff]  }
 0x78f   :  { %v7242_v45 = vpack.c.bf16 %v1158_v37, %v1142_v35  ;;  %v7244_v46 = vpack.c.bf16 %v1160_v38, %v1144_v36  ;;  %v6360_v37 = vld [vmem:[%s8364_s4 + $0x118] sm:$0xff]  }
 0x790   :  { %v1175_v42 = vpack.c.bf16 %v1159_v41, %v1143_v39  ;;  %v1177_v53 = vpack.c.bf16 %v1161_v43, %v1145_v40  ;;  %5891 = vmatpush3.bf16.msra.mxu0 %v6352_v34  ;;  %5913 = vmatpush3.bf16.msra.mxu1 %v6353_v20  ;;  %v1000_v1 = vpop.f32.mrb[20].mxu0  ;;  %v1043_v48 = vpop.f32.mrb[12].mxu1  ;;  %v610_v34 = vrot.slane %v7208_v33, %v7192_v57 }
 0x791   :  { %v1001_v60 = vadd.f32 %v1000_v1, %v586_v8  ;;  %v1044_v61 = vadd.f32 %v1043_v48, %v594_v12  ;;  %v1002_v3 = vpop.f32.mrb[21].mxu0  ;;  %v1045_v5 = vpop.f32.mrb[13].mxu1  ;;  %5892 = vmatprep.subr.bf16.mxu0 %v6354_v25  ;;  %5914 = vmatprep.subr.bf16.mxu1 %v6355_v32  ;;  %v606_v20 = vrot.slane %v7208_v33, %v7194_v59 }
 0x792   :  { %v1003_v13 = vadd.f32 %v1002_v3, %v590_v23  ;;  %v1046_v19 = vadd.f32 %v1045_v5, %v598_v24  ;;  %v1004_v11 = vpop.f32.mrb[22].mxu0  ;;  %v1047_v27 = vpop.f32.mrb[14].mxu1  ;;  %2325 = vmatprep.mubr.bf16.mxu0 %v1175_v42  ;;  %2366 = vmatprep.mubr.bf16.mxu1 %v1177_v53 }
 0x793   :  { %v1005_v14 = vadd.f32 %v1004_v11, %v586_v8  ;;  %v1048_v16 = vadd.f32 %v1047_v27, %v594_v12  ;;  %v1006_v28 = vpop.f32.mrb[23].mxu0  ;;  %v1049_v31 = vpop.f32.mrb[15].mxu1  ;;  %v6361_v8 = vld [vmem:[%s8364_s4 + $0x198] sm:$0xff]   ;;  %v614_v12 = vrot.slane %v7208_v33, %v7196_v63  ;;  %v1146_v38 = vmax.f32 %v1001_v60, 0.0  ;;  %v6364_v60 = vld [vmem:[%s8364_s4 + $0x120] sm:$0xff]  }
 0x794   :  { %v1007_v35 = vadd.f32 %v1006_v28, %v590_v23  ;;  %v1050_v36 = vadd.f32 %v1049_v31, %v598_v24  ;;  %5893 = vmatpush3.bf16.msra.mxu0 %v6356_v54  ;;  %5915 = vmatpush3.bf16.msra.mxu1 %v6357_v55  ;;  %v1148_v25 = vmax.f32 %v1044_v61, 0.0  ;;  %v6362_v23 = vld [vmem:[%s8364_s4 + $0x160] sm:$0xff]   ;;  %v1147_v40 = vmax.f32 %v1003_v13, 0.0  ;;  %v6366_v13 = vld [vmem:[%s8364_s4 + $0x168] sm:$0xff]  }
 0x795   :  { %v1162_v32 = vmax.f32 %v1005_v14, 0.0  ;;  %v1164_v39 = vmax.f32 %v1048_v16, 0.0  ;;  %5894 = vmatprep.subr.bf16.mxu0 %v6358_v7  ;;  %5916 = vmatprep.subr.bf16.mxu1 %v6359_v9  ;;  %v6363_v24 = vld [vmem:[%s8364_s4 + $0x1e0] sm:$0xff]   ;;  %v1149_v41 = vmax.f32 %v1046_v19, 0.0  ;;  %v6367_v19 = vld [vmem:[%s8364_s4 + $0x1e8] sm:$0xff]  }
 0x796   :  { %v1163_v43 = vmax.f32 %v1007_v35, 0.0  ;;  %v1165_v42 = vmax.f32 %v1050_v36, 0.0  ;;  %v6365_v61 = vld [vmem:[%s8364_s4 + $0x1a0] sm:$0xff]  }
 0x797   :  { %v7278_v53 = vpack.c.bf16 %v1162_v32, %v1146_v38  ;;  %v7280_v33 = vpack.c.bf16 %v1164_v39, %v1148_v25  ;;  %v6368_v38 = vld [vmem:[%s8364_s4 + $0x128] sm:$0xff]  }
 0x798   :  { %v7282_v1 = vpack.c.bf16 %v1163_v43, %v1147_v40  ;;  %v7284_v48 = vpack.c.bf16 %v1165_v42, %v1149_v41  ;;  %5895 = vmatpush3.bf16.msra.mxu0 %v6360_v37  ;;  %5917 = vmatpush3.bf16.msra.mxu1 %v6361_v8  ;;  %v1086_v54 = vpop.f32.mrb[24].mxu0  ;;  %v1129_v55 = vpop.f32.mrb[16].mxu1  ;;  %v6369_v25 = vld [vmem:[%s8364_s4 + $0x1a8] sm:$0xff]  }
 0x799   :  { %v1087_v3 = vadd.f32 %v1086_v54, %v602_v22  ;;  %v1130_v5 = vadd.f32 %v1129_v55, %v610_v34  ;;  %v1088_v7 = vpop.f32.mrb[25].mxu0  ;;  %v1131_v9 = vpop.f32.mrb[17].mxu1  ;;  %5896 = vmatprep.subr.bf16.mxu0 %v6362_v23  ;;  %5918 = vmatprep.subr.bf16.mxu1 %v6363_v24 }
 0x79a   :  { %v1089_v11 = vadd.f32 %v1088_v7, %v606_v20  ;;  %v1132_v27 = vadd.f32 %v1131_v9, %v614_v12  ;;  %v1090_v14 = vpop.f32.mrb[26].mxu0  ;;  %v1133_v16 = vpop.f32.mrb[18].mxu1  ;;  %v6376_v7 = vld [vmem:[%s8364_s4 + $0x138] sm:$0xff]  }
 0x79b   :  { %v1091_v28 = vadd.f32 %v1090_v14, %v602_v22  ;;  %v1134_v31 = vadd.f32 %v1133_v16, %v610_v34  ;;  %v1092_v35 = vpop.f32.mrb[27].mxu0  ;;  %v1135_v36 = vpop.f32.mrb[19].mxu1  ;;  %v1150_v32 = vmax.f32 %v1087_v3, 0.0  ;;  %v1152_v39 = vmax.f32 %v1130_v5, 0.0  ;;  %v6370_v22 = vld [vmem:[%s8364_s4 + $0x170] sm:$0xff]   ;;  %v6374_v3 = vld [vmem:[%s8364_s4 + $0x178] sm:$0xff]  }
 0x79c   :  { %v1093_v37 = vadd.f32 %v1092_v35, %v606_v20  ;;  %v1136_v8 = vadd.f32 %v1135_v36, %v614_v12  ;;  %5897 = vmatpush3.bf16.msra.mxu0 %v6364_v60  ;;  %5919 = vmatpush3.bf16.msra.mxu1 %v6365_v61  ;;  %v6371_v34 = vld [vmem:[%s8364_s4 + $0x1f0] sm:$0xff]   ;;  %v1151_v20 = vmax.f32 %v1089_v11, 0.0  ;;  %v1153_v12 = vmax.f32 %v1132_v27, 0.0  ;;  %v6375_v5 = vld [vmem:[%s8364_s4 + $0x1f8] sm:$0xff]   ;;  %v6380_v11 = vld [vmem:[%s8364_s4 + $0x200] sm:$0xff]  }
 0x79d   :  { %v1166_v23 = vmax.f32 %v1091_v28, 0.0  ;;  %v1168_v24 = vmax.f32 %v1134_v31, 0.0  ;;  %5898 = vmatprep.subr.bf16.mxu0 %v6366_v13  ;;  %5920 = vmatprep.subr.bf16.mxu1 %v6367_v19  ;;  %v6372_v60 = vld [vmem:[%s8364_s4 + $0x130] sm:$0xff]   ;;  %v6377_v9 = vld [vmem:[%s8364_s4 + $0x1b8] sm:$0xff]   ;;  %v6378_v13 = vld [vmem:[%s8364_s4 + $0x240] sm:$0xff]  }
 0x79e   :  { %v1167_v40 = vmax.f32 %v1093_v37, 0.0  ;;  %v1169_v41 = vmax.f32 %v1136_v8, 0.0  ;;  %v6373_v61 = vld [vmem:[%s8364_s4 + $0x1b0] sm:$0xff]   ;;  %v6379_v19 = vld [vmem:[%s8364_s4 + $0x2c0] sm:$0xff]   ;;  %v6382_v14 = vld [vmem:[%s8364_s4 + $0x248] sm:$0xff]  }
 0x79f   :  { %v7310_v43 = vpack.c.bf16 %v1166_v23, %v1150_v32  ;;  %v7312_v42 = vpack.c.bf16 %v1168_v24, %v1152_v39  ;;  %v6381_v27 = vld [vmem:[%s8364_s4 + $0x280] sm:$0xff]   ;;  %v6383_v16 = vld [vmem:[%s8364_s4 + $0x2c8] sm:$0xff]   ;;  %v6390_v35 = vld [vmem:[%s8364_s4 + $0x258] sm:$0xff]  }
 0x7a0   :  { %v7314_v54 = vpack.c.bf16 %v1167_v40, %v1151_v20  ;;  %v7316_v55 = vpack.c.bf16 %v1169_v41, %v1153_v12  ;;  %5899 = vmatpush3.bf16.msra.mxu0 %v6368_v38  ;;  %5921 = vmatpush3.bf16.msra.mxu1 %v6369_v25  ;;  %v6384_v28 = vld [vmem:[%s8364_s4 + $0x208] sm:$0xff]   ;;  %v6391_v36 = vld [vmem:[%s8364_s4 + $0x2d8] sm:$0xff]   ;;  %v6394_v38 = vld [vmem:[%s8364_s4 + $0x260] sm:$0xff]  }
 0x7a1   :  { %5900 = vmatprep.subr.bf16.mxu0 %v6370_v22  ;;  %5922 = vmatprep.subr.bf16.mxu1 %v6371_v34  ;;  %v6385_v31 = vld [vmem:[%s8364_s4 + $0x288] sm:$0xff]   ;;  %v6392_v37 = vld [vmem:[%s8364_s4 + $0x218] sm:$0xff]   ;;  %v6395_v25 = vld [vmem:[%s8364_s4 + $0x2e0] sm:$0xff]  }
 0x7a2   :  { %v6393_v8 = vld [vmem:[%s8364_s4 + $0x298] sm:$0xff]   ;;  %v6396_v32 = vld [vmem:[%s8364_s4 + $0x220] sm:$0xff]   ;;  %v6398_v23 = vld [vmem:[%s8364_s4 + $0x268] sm:$0xff]  }
 0x7a3   :  { %v6397_v39 = vld [vmem:[%s8364_s4 + $0x2a0] sm:$0xff]   ;;  %v6399_v24 = vld [vmem:[%s8364_s4 + $0x2e8] sm:$0xff]   ;;  %v6402_v20 = vld [vmem:[%s8364_s4 + $0x270] sm:$0xff]  }
 0x7a4   :  { %5901 = vmatpush3.bf16.msra.mxu0 %v6372_v60  ;;  %5923 = vmatpush3.bf16.msra.mxu1 %v6373_v61  ;;  %v6400_v22 = vld [vmem:[%s8364_s4 + $0x228] sm:$0xff]   ;;  %v6403_v12 = vld [vmem:[%s8364_s4 + $0x2f0] sm:$0xff]   ;;  %v6406_v60 = vld [vmem:[%s8364_s4 + $0x278] sm:$0xff]  }
 0x7a5   :  { %5902 = vmatprep.subr.bf16.mxu0 %v6374_v3  ;;  %5924 = vmatprep.subr.bf16.mxu1 %v6375_v5  ;;  %v6401_v34 = vld [vmem:[%s8364_s4 + $0x2a8] sm:$0xff]   ;;  %v6404_v40 = vld [vmem:[%s8364_s4 + $0x230] sm:$0xff]   ;;  %v6407_v61 = vld [vmem:[%s8364_s4 + $0x2f8] sm:$0xff]  }
 0x7a6   :  { %v6405_v41 = vld [vmem:[%s8364_s4 + $0x2b0] sm:$0xff]   ;;  %v6408_v3 = vld [vmem:[%s8364_s4 + $0x238] sm:$0xff]  }
 0x7a7   :  { %v6409_v5 = vld [vmem:[%s8364_s4 + $0x2b8] sm:$0xff]  }
 0x7a8   :  { %5903 = vmatpush3.bf16.msra.mxu0 %v6376_v7  ;;  %5925 = vmatpush3.bf16.msra.mxu1 %v6377_v9  ;;  %v6410_v7 = vld [vmem:[%s8364_s4 + $0x340] sm:$0xff]  }
 0x7a9   :  { %5932 = vmatprep.subr.bf16.mxu0 %v6378_v13  ;;  %5954 = vmatprep.subr.bf16.mxu1 %v6379_v19  ;;  %v6411_v9 = vld [vmem:[%s8364_s4 + $0x3c0] sm:$0xff]  }
 0x7aa   :  { %v6412_v13 = vld [vmem:[%s8364_s4 + $0x300] sm:$0xff]  }
 0x7ab   :  { %2326 = vmatmul.mubr.bf16.vlgmr.msra.gmra.mrb[32].mxu0 %v7242_v45  ;;  %2367 = vmatmul.mubr.bf16.vlgmr.msra.gmra.mrb[24].mxu1 %v7244_v46  ;;  %v6386_v45 = vld [vmem:[%s8364_s4 + $0x250] sm:$0xff]   ;;  %v6413_v19 = vld [vmem:[%s8364_s4 + $0x380] sm:$0xff]  }
 0x7ac   :  { %5933 = vmatpush3.bf16.msra.mxu0 %v6380_v11  ;;  %2407 = vmatprep.mubr.bf16.mxu0 %v7282_v1  ;;  %v6387_v46 = vld [vmem:[%s8364_s4 + $0x2d0] sm:$0xff]   ;;  %v6414_v11 = vld [vmem:[%s8364_s4 + $0x348] sm:$0xff]  }
 0x7ad   :  { %5955 = vmatpush3.bf16.msra.mxu1 %v6381_v27  ;;  %2448 = vmatprep.mubr.bf16.mxu1 %v7284_v48  ;;  %v6388_v1 = vld [vmem:[%s8364_s4 + $0x210] sm:$0xff]   ;;  %v6415_v27 = vld [vmem:[%s8364_s4 + $0x3c8] sm:$0xff]  }
 0x7ae   :  { %5934 = vmatprep.subr.bf16.mxu0 %v6382_v14  ;;  %5956 = vmatprep.subr.bf16.mxu1 %v6383_v16  ;;  %v6389_v48 = vld [vmem:[%s8364_s4 + $0x290] sm:$0xff]   ;;  %v6416_v14 = vld [vmem:[%s8364_s4 + $0x308] sm:$0xff]  }
 0x7af   :  { %v6417_v16 = vld [vmem:[%s8364_s4 + $0x388] sm:$0xff]  }
 0x7b0   :  { %5935 = vmatpush3.bf16.msra.mxu0 %v6384_v28  ;;  %v6421_v28 = vld [vmem:[%s8364_s4 + $0x390] sm:$0xff]  }
 0x7b1   :  { %5957 = vmatpush3.bf16.msra.mxu1 %v6385_v31  ;;  %5936 = vmatprep.subr.bf16.mxu0 %v6386_v45  ;;  %v6423_v31 = vld [vmem:[%s8364_s4 + $0x3d8] sm:$0xff]  }
 0x7b2   :  { %5958 = vmatprep.subr.bf16.mxu1 %v6387_v46  ;;  %v6424_v45 = vld [vmem:[%s8364_s4 + $0x318] sm:$0xff]  }
 0x7b3   :  { %v6425_v46 = vld [vmem:[%s8364_s4 + $0x398] sm:$0xff]  }
 0x7b4   :  { %5937 = vmatpush3.bf16.msra.mxu0 %v6388_v1  ;;  %v6426_v1 = vld [vmem:[%s8364_s4 + $0x360] sm:$0xff]  }
 0x7b5   :  { %5959 = vmatpush3.bf16.msra.mxu1 %v6389_v48  ;;  %5938 = vmatprep.subr.bf16.mxu0 %v6390_v35  ;;  %v6427_v48 = vld [vmem:[%s8364_s4 + $0x3e0] sm:$0xff]  }
 0x7b6   :  { %5960 = vmatprep.subr.bf16.mxu1 %v6391_v36  ;;  %v6428_v35 = vld [vmem:[%s8364_s4 + $0x320] sm:$0xff]  }
 0x7b7   :  { %v6429_v36 = vld [vmem:[%s8364_s4 + $0x3a0] sm:$0xff]  }
 0x7b8   :  { %5939 = vmatpush3.bf16.msra.mxu0 %v6392_v37  ;;  %v6430_v37 = vld [vmem:[%s8364_s4 + $0x368] sm:$0xff]  }
 0x7b9   :  { %5961 = vmatpush3.bf16.msra.mxu1 %v6393_v8  ;;  %5940 = vmatprep.subr.bf16.mxu0 %v6394_v38  ;;  %v6431_v8 = vld [vmem:[%s8364_s4 + $0x3e8] sm:$0xff]  }
 0x7ba   :  { %5962 = vmatprep.subr.bf16.mxu1 %v6395_v25  ;;  %v6432_v38 = vld [vmem:[%s8364_s4 + $0x328] sm:$0xff]  }
 0x7bb   :  { %v6433_v25 = vld [vmem:[%s8364_s4 + $0x3a8] sm:$0xff]  }
 0x7bc   :  { %5941 = vmatpush3.bf16.msra.mxu0 %v6396_v32  ;;  %v6434_v32 = vld [vmem:[%s8364_s4 + $0x370] sm:$0xff]  }
 0x7bd   :  { %5963 = vmatpush3.bf16.msra.mxu1 %v6397_v39  ;;  %5942 = vmatprep.subr.bf16.mxu0 %v6398_v23  ;;  %v6435_v39 = vld [vmem:[%s8364_s4 + $0x3f0] sm:$0xff]  }
 0x7be   :  { %5964 = vmatprep.subr.bf16.mxu1 %v6399_v24  ;;  %v6436_v23 = vld [vmem:[%s8364_s4 + $0x330] sm:$0xff]  }
 0x7bf   :  { %v6437_v24 = vld [vmem:[%s8364_s4 + $0x3b0] sm:$0xff]  }
 0x7c0   :  { %5943 = vmatpush3.bf16.msra.mxu0 %v6400_v22  ;;  %v6438_v22 = vld [vmem:[%s8364_s4 + $0x378] sm:$0xff]  }
 0x7c1   :  { %5965 = vmatpush3.bf16.msra.mxu1 %v6401_v34  ;;  %5944 = vmatprep.subr.bf16.mxu0 %v6402_v20  ;;  %v6439_v34 = vld [vmem:[%s8364_s4 + $0x3f8] sm:$0xff]  }
 0x7c2   :  { %5966 = vmatprep.subr.bf16.mxu1 %v6403_v12  ;;  %v6440_v20 = vld [vmem:[%s8364_s4 + $0x338] sm:$0xff]  }
 0x7c3   :  { %v6441_v12 = vld [vmem:[%s8364_s4 + $0x3b8] sm:$0xff]  }
 0x7c4   :  { %5945 = vmatpush3.bf16.msra.mxu0 %v6404_v40 }
 0x7c5   :  { %5967 = vmatpush3.bf16.msra.mxu1 %v6405_v41  ;;  %5946 = vmatprep.subr.bf16.mxu0 %v6406_v60  ;;  %v1442_v60 = vld [vmem:[%s8365_s5 + $0x5] ss:$0 sm:$0xff] }
 0x7c6   :  { %5968 = vmatprep.subr.bf16.mxu1 %v6407_v61 }
 0x7c8   :  { %5947 = vmatpush3.bf16.msra.mxu0 %v6408_v3 }
 0x7c9   :  { %5969 = vmatpush3.bf16.msra.mxu1 %v6409_v5  ;;  %5976 = vmatprep.subr.bf16.mxu0 %v6410_v7 }
 0x7ca   :  { %5998 = vmatprep.subr.bf16.mxu1 %v6411_v9 }
 0x7cb   :  { %2408 = vmatmul.mubr.bf16.vlgmr.msra.gmra.mrb[36].mxu0 %v7278_v53  ;;  %v6418_v53 = vld [vmem:[%s8364_s4 + $0x350] sm:$0xff]  }
 0x7cc   :  { %2449 = vmatmul.mubr.bf16.vlgmr.msra.gmra.mrb[28].mxu1 %v7280_v33  ;;  %5977 = vmatpush3.bf16.msra.mxu0 %v6412_v13  ;;  %v6419_v33 = vld [vmem:[%s8364_s4 + $0x3d0] sm:$0xff]  }
 0x7cd   :  { %2489 = vmatprep.mubr.bf16.mxu0 %v7314_v54  ;;  %5999 = vmatpush3.bf16.msra.mxu1 %v6413_v19  ;;  %v6420_v54 = vld [vmem:[%s8364_s4 + $0x310] sm:$0xff]  }
 0x7ce   :  { %2530 = vmatprep.mubr.bf16.mxu1 %v7316_v55  ;;  %5978 = vmatprep.subr.bf16.mxu0 %v6414_v11  ;;  %v6422_v55 = vld [vmem:[%s8364_s4 + $0x358] sm:$0xff]  }
 0x7cf   :  { %6000 = vmatprep.subr.bf16.mxu1 %v6415_v27 }
 0x7d0   :  { %5979 = vmatpush3.bf16.msra.mxu0 %v6416_v14 }
 0x7d1   :  { %6001 = vmatpush3.bf16.msra.mxu1 %v6417_v16  ;;  %5980 = vmatprep.subr.bf16.mxu0 %v6418_v53 }
 0x7d2   :  { %6002 = vmatprep.subr.bf16.mxu1 %v6419_v33 }
 0x7d4   :  { %5981 = vmatpush3.bf16.msra.mxu0 %v6420_v54 }
 0x7d5   :  { %6003 = vmatpush3.bf16.msra.mxu1 %v6421_v28  ;;  %5982 = vmatprep.subr.bf16.mxu0 %v6422_v55 }
 0x7d6   :  { %6004 = vmatprep.subr.bf16.mxu1 %v6423_v31 }
 0x7d8   :  { %5983 = vmatpush3.bf16.msra.mxu0 %v6424_v45 }
 0x7d9   :  { %6005 = vmatpush3.bf16.msra.mxu1 %v6425_v46  ;;  %5984 = vmatprep.subr.bf16.mxu0 %v6426_v1 }
 0x7da   :  { %6006 = vmatprep.subr.bf16.mxu1 %v6427_v48 }
 0x7dc   :  { %5985 = vmatpush3.bf16.msra.mxu0 %v6428_v35 }
 0x7dd   :  { %6007 = vmatpush3.bf16.msra.mxu1 %v6429_v36  ;;  %5986 = vmatprep.subr.bf16.mxu0 %v6430_v37 }
 0x7de   :  { %6008 = vmatprep.subr.bf16.mxu1 %v6431_v8 }
 0x7e0   :  { %5987 = vmatpush3.bf16.msra.mxu0 %v6432_v38 }
 0x7e1   :  { %6009 = vmatpush3.bf16.msra.mxu1 %v6433_v25  ;;  %5988 = vmatprep.subr.bf16.mxu0 %v6434_v32 }
 0x7e2   :  { %6010 = vmatprep.subr.bf16.mxu1 %v6435_v39 }
 0x7e4   :  { %5989 = vmatpush3.bf16.msra.mxu0 %v6436_v23 }
 0x7e5   :  { %6011 = vmatpush3.bf16.msra.mxu1 %v6437_v24  ;;  %5990 = vmatprep.subr.bf16.mxu0 %v6438_v22 }
 0x7e6   :  { %6012 = vmatprep.subr.bf16.mxu1 %v6439_v34 }
 0x7e8   :  { %5991 = vmatpush3.bf16.msra.mxu0 %v6440_v20 }
 0x7e9   :  { %6013 = vmatpush3.bf16.msra.mxu1 %v6441_v12  ;;  %6255 = vmatprep.subr.bf16.mxu0 %v6636_v2 }
 0x7ea   :  { %6263 = vmatprep.subr.bf16.mxu1 %v6636_v2 }
 0x7eb   :  { %2490 = vmatmul.mubr.bf16.vlgmr.msra.gmra.mrb[40].mxu0 %v7310_v43 }
 0x7ec   :  { %2531 = vmatmul.mubr.bf16.vlgmr.msra.gmra.mrb[32].mxu1 %v7312_v42  ;;  %6259 = vmatprep.mubr.msk.bf16.mxu0 %vm6637_vm0, %v6636_v2 }
 0x7ed   :  { %6271 = vmatprep.mubr.msk.bf16.mxu1 %vm6637_vm0, %v6636_v2 }
 0x85e   :  { %v5860_v40 = vpop.f32.mrb[28].mxu0  ;;  %v5882_v41 = vpop.f32.mrb[20].mxu1 }
 0x85f   :  { %v5861_v61 = vpop.f32.mrb[29].mxu0  ;;  %v5883_v3 = vpop.f32.mrb[21].mxu1 }
 0x860   :  { %v5862_v5 = vadd.f32 %v5861_v61, %v5860_v40  ;;  %v5884_v7 = vadd.f32 %v5883_v3, %v5882_v41  ;;  %v5863_v9 = vpop.f32.mrb[30].mxu0  ;;  %v5885_v43 = vpop.f32.mrb[22].mxu1 }
 0x861   :  { %v5864_v13 = vpop.f32.mrb[31].mxu0  ;;  %v5886_v42 = vpop.f32.mrb[23].mxu1 }
 0x862   :  { %v2246_v19 = vadd.f32 %v5862_v5, %v1442_v60  ;;  %v5865_v11 = vadd.f32 %v5864_v13, %v5863_v9  ;;  %v5887_v27 = vadd.f32 %v5886_v42, %v5885_v43 }
 0x864   :  { %v2287_v14 = vadd.f32 %v5884_v7, %v2246_v19  ;;  %v2249_v16 = vadd.f32 %v5865_v11, %v1442_v60 }
 0x866   :  { %v2290_v53 = vadd.f32 %v5887_v27, %v2249_v16 }
 0x87e   :  { %v5904_v33 = vpop.f32.mrb[32].mxu0  ;;  %v5926_v54 = vpop.f32.mrb[24].mxu1 }
 0x87f   :  { %v5905_v28 = vpop.f32.mrb[33].mxu0  ;;  %v5927_v55 = vpop.f32.mrb[25].mxu1 }
 0x880   :  { %v5906_v31 = vadd.f32 %v5905_v28, %v5904_v33  ;;  %v5928_v45 = vadd.f32 %v5927_v55, %v5926_v54  ;;  %v5907_v46 = vpop.f32.mrb[34].mxu0  ;;  %v5929_v1 = vpop.f32.mrb[26].mxu1 }
 0x881   :  { %v5908_v48 = vpop.f32.mrb[35].mxu0  ;;  %v5930_v35 = vpop.f32.mrb[27].mxu1 }
 0x882   :  { %v2328_v36 = vadd.f32 %v5906_v31, %v2287_v14  ;;  %v5909_v37 = vadd.f32 %v5908_v48, %v5907_v46  ;;  %v5931_v8 = vadd.f32 %v5930_v35, %v5929_v1 }
 0x884   :  { %v2369_v38 = vadd.f32 %v5928_v45, %v2328_v36  ;;  %v2331_v25 = vadd.f32 %v5909_v37, %v2290_v53 }
 0x886   :  { %v2372_v32 = vadd.f32 %v5931_v8, %v2331_v25 }
 0x89e   :  { %v5948_v39 = vpop.f32.mrb[36].mxu0 }
 0x89f   :  { %v5970_v23 = vpop.f32.mrb[28].mxu1  ;;  %v5949_v24 = vpop.f32.mrb[37].mxu0 }
 0x8a0   :  { %v5950_v22 = vadd.f32 %v5949_v24, %v5948_v39  ;;  %v5971_v34 = vpop.f32.mrb[29].mxu1  ;;  %v5951_v20 = vpop.f32.mrb[38].mxu0 }
 0x8a1   :  { %v5972_v12 = vadd.f32 %v5971_v34, %v5970_v23  ;;  %v5973_v40 = vpop.f32.mrb[30].mxu1  ;;  %v5952_v41 = vpop.f32.mrb[39].mxu0 }
 0x8a2   :  { %v2410_v60 = vadd.f32 %v5950_v22, %v2369_v38  ;;  %v5953_v61 = vadd.f32 %v5952_v41, %v5951_v20  ;;  %v5974_v3 = vpop.f32.mrb[31].mxu1  ;;  %v6443_v20 = vld [vmem:[%s8361_s1 + $0x18] sm:$0xff]  }
 0x8a3   :  { %v5975_v5 = vadd.f32 %v5974_v3, %v5973_v40 }
 0x8a4   :  { %v2451_v7 = vadd.f32 %v5972_v12, %v2410_v60  ;;  %v2413_v9 = vadd.f32 %v5953_v61, %v2372_v32 }
 0x8a6   :  { %v2454_v43 = vadd.f32 %v5975_v5, %v2413_v9 }
 0x8be   :  { %v5992_v13 = vpop.f32.mrb[40].mxu0 }
 0x8bf   :  { %v6014_v42 = vpop.f32.mrb[32].mxu1  ;;  %v5993_v19 = vpop.f32.mrb[41].mxu0 }
 0x8c0   :  { %v5994_v11 = vadd.f32 %v5993_v19, %v5992_v13  ;;  %v6015_v27 = vpop.f32.mrb[33].mxu1  ;;  %v5995_v14 = vpop.f32.mrb[42].mxu0  ;;  %v2542_v19 = vld [vmem:[%s8365_s5 + $0x7] ss:$0 sm:$0xff] }
 0x8c1   :  { %v6016_v16 = vadd.f32 %v6015_v27, %v6014_v42  ;;  %v6017_v53 = vpop.f32.mrb[34].mxu1  ;;  %v5996_v33 = vpop.f32.mrb[43].mxu0 }
 0x8c2   :  { %v2492_v54 = vadd.f32 %v5994_v11, %v2451_v7  ;;  %v5997_v28 = vadd.f32 %v5996_v33, %v5995_v14  ;;  %v6018_v55 = vpop.f32.mrb[35].mxu1  ;;  %v2541_v7 = vld [vmem:[%s8365_s5 + $0x6] ss:$0 sm:$0xff] }
 0x8c3   :  { %v6019_v31 = vadd.f32 %v6018_v55, %v6017_v53  ;;  %v5341_v53 = vld [vmem:[%s8365_s5 + $0x80] ss:$0 sm:$0xff] }
 0x8c4   :  { %v2533_v45 = vadd.f32 %v6016_v16, %v2492_v54  ;;  %v2495_v46 = vadd.f32 %v5997_v28, %v2454_v43 }
 0x8c6   :  { %v2536_v1 = vadd.f32 %v6019_v31, %v2495_v46  ;;  %v2539_v48 = vadd.f32 %v2533_v45, %v6991_v15 }
 0x8c8   :  { %v2543_v35 = vsel %vm81_vm9, %v2539_v48, 0.0  ;;  %v2540_v36 = vadd.f32 %v2536_v1, %v6993_v18  ;;  %v6442_v18 = vld [vmem:[%s8361_s1 + $0x10] sm:$0xff]  }
 0x8c9   :  { %2544 = vadd.xlane.f32.xlu1 %v2543_v35  ;;  %6256 = vmatpush3.bf16.msra.mxu0 %v6442_v18 }
 0x8ca   :  { %v2546_v37 = vsel %vm81_vm9, %v2540_v36, 0.0  ;;  %6257 = vmatprep.subr.bf16.mxu0 %v6636_v2 }
 0x8cb   :  { %2547 = vadd.xlane.f32.xlu0 %v2546_v37 }
 0x8cd   :  { %6258 = vmatpush3.bf16.msra.mxu0 %v6443_v20  ;;  %v6611_v20 = vld [vmem:[%s8360_s0 + $0x18] sm:$0xff] }
 0x8ce   :  { %6275 = vmatprep.subr.bf16.mxu0 %v6636_v2 }
 0x956   :  { %v2545_v8 = vpop.xlane.xlu1 %2544 }
 0x957   :  { %v2549_v38 = vmul.f32 0.03125, %v2545_v8 }
 0x958   :  { %v2548_v25 = vpop.xlane.xlu0 %2547 }
 0x959   :  { %v2551_v32 = vsub.f32 %v2539_v48, %v2549_v38  ;;  %v2550_v39 = vmul.f32 0.03125, %v2548_v25 }
 0x95b   :  { %v2552_v23 = vsub.f32 %v2540_v36, %v2550_v39  ;;  %v2553_v24 = vmul.f32 %v2551_v32, %v2551_v32 }
 0x95d   :  { %v2555_v22 = vsel %vm81_vm9, %v2553_v24, 0.0  ;;  %v2554_v34 = vmul.f32 %v2552_v23, %v2552_v23 }
 0x95e   :  { %2556 = vadd.xlane.f32.xlu1 %v2555_v22  ;;  %v6610_v22 = vld [vmem:[%s8360_s0 + $0x10] sm:$0xff]  ;;  %s5143_s0 = sshll.u32 %s6642_s17, 4  ;;  %s5144_s0 = int_to_ptr.vmem [resolvable:$true] %s5143_s0 }
 0x95f   :  { %v2558_v15 = vsel %vm81_vm9, %v2554_v34, 0.0  ;;  %p6617_p1 = scmp.lt.s32.totalorder %s5144_s0, %s5144_s0 }
 0x960   :  { %2559 = vadd.xlane.f32.xlu0 %v2558_v15 }
 0x9eb   :  { %v2557_v12 = vpop.xlane.xlu1 %2556 }
 0x9ec   :  { %v2561_v40 = vmul.f32 0.03125, %v2557_v12 }
 0x9ed   :  { %v2560_v41 = vpop.xlane.xlu0 %2559 }
 0x9ee   :  { %v2563_v60 = vadd.f32 1e-05, %v2561_v40  ;;  %v2562_v61 = vmul.f32 0.03125, %v2560_v41 }
 0x9f0   :  { %6588 = vrsqrt.f32 %v2563_v60  ;;  %v2564_v3 = vadd.f32 1e-05, %v2562_v61 }
 0x9f2   :  { %6590 = vrsqrt.f32 %v2564_v3 }
 0x9fa   :  { %v6589_v5 = vpop.eup %6588 }
 0x9fb   :  { %v2567_v9 = vmul.f32 %v6589_v5, %v2551_v32 }
 0x9fc   :  { %v6591_v43 = vpop.eup %6590 }
 0x9fd   :  { %v2569_v13 = vmul.f32 %v2567_v9, %v2541_v7  ;;  %v2568_v42 = vmul.f32 %v6591_v43, %v2552_v23 }
 0x9ff   :  { %v2570_v11 = vmul.f32 %v2568_v42, %v2541_v7  ;;  %v7567_v27 = vadd.f32 %v2569_v13, %v2542_v19 }
 0xa01   :  { %v7569_v14 = vadd.f32 %v2570_v11, %v2542_v19 }
 0xa03   :  { %v2573_v16 = vpack.c.bf16 %v7569_v14, %v7567_v27 }
 0xa05   :  { %6260 = vmatmul.mubr.msk.bf16.vlgmr.msra.gmra.mrb[44].mxu0 %vm81_vm9, %v2573_v16 }
 0xa06   :  { %6283 = vmatprep.mubr.msk.bf16.mxu0 %vm6637_vm0, %v6636_v2 }
 0xad8   :  { %v2630_v33 = vpop.f32.mrb[44].mxu0 }
 0xad9   :  { %v6261_v54 = vpop.f32.mrb[45].mxu0  ;;  %v2631_v55 = vadd.f32 %v5341_v53, %v2630_v33 }
 0xada   :  { %v2633_v28 = vpop.f32.mrb[46].mxu0 }
 0xadb   :  { %v2634_v31 = vadd.f32 %v5341_v53, %v2633_v28  ;;  %v6262_v45 = vpop.f32.mrb[47].mxu0 }
 0xadd   :  { %v7579_v46 = vpack.c.bf16 %v2634_v31, %v2631_v55 }
 0xadf   :  { %v2639_v1 = vmul.bf16 %v7579_v46, %v6740_v26  ;;  %v2638_v48 = vmul.bf16 %v7579_v46, %v6733_v17  ;;  %v2640_v35 = vmul.bf16 %v7579_v46, %v6738_v21  ;;  %v2641_v36 = vmul.bf16 %v7579_v46, %v6748_v30 }
 0xae0   :  { %v2642_v54 = vmul.bf16 %v7579_v46, %v6827_v29 }
 0xae1   :  { %2652 = vrot.lane.b32.xlu0 %v2639_v1, %s6639_s8  ;;  %2650 = vrot.lane.b32.xlu1 %v2638_v48, %s6639_s8 }
 0xae5   :  { %2654 = vrot.lane.b32.xlu1 %v2640_v35, %s6639_s8 }
 0xae9   :  { %2656 = vrot.lane.b32.xlu1 %v2641_v36, %s6639_s8 }
 0xb53   :  { %v2651_v37 = vpop.permute.xlu1 %2650  ;;  %v2653_v17 = vpop.permute.xlu0 %2652 }
 0xb54   :  { %v2662_v26 = vsel %vm81_vm9, %v2651_v37, 0  ;;  %v2665_v8 = vsel %vm81_vm9, %v2653_v17, 0 }
 0xb55   :  { %6264 = vmatpush3.bf16.xpose.msra.mxu1 %v2662_v26 }
 0xb56   :  { %6265 = vmatprep.subr.bf16.mxu1 %v6636_v2 }
 0xb57   :  { %v2655_v21 = vpop.permute.xlu1 %2654 }
 0xb58   :  { %v2668_v38 = vsel %vm81_vm9, %v2655_v21, 0 }
 0xb5b   :  { %v2657_v30 = vpop.permute.xlu1 %2656 }
 0xb5c   :  { %v2671_v25 = vsel %vm81_vm9, %v2657_v30, 0 }
 0xb5d   :  { %6266 = vmatpush3.bf16.xpose.msra.mxu1 %v2665_v8 }
 0xb5e   :  { %6267 = vmatprep.subr.bf16.mxu1 %v6636_v2 }
 0xb65   :  { %6268 = vmatpush3.bf16.xpose.msra.mxu1 %v2668_v38 }
 0xb66   :  { %6269 = vmatprep.subr.bf16.mxu1 %v6636_v2 }
 0xb6d   :  { %6270 = vmatpush3.bf16.xpose.msra.mxu1 %v2671_v25 }
 0xb74   :  { %6272 = vmatmul.mubr.msk.bf16.vlgmr.msra.gmra.mrb[36].mxu1 %vm81_vm9, %v7579_v46 }
 0xb75   :  { %3344 = vmatprep.mubr.bf16.mxu1 %v6641_v44 }
 0xc47   :  { %v2707_v32 = vpop.f32.mrb[36].mxu1 }
 0xc48   :  { %v2714_v39 = vmul.f32 0.35355338, %v2707_v32  ;;  %v6273_v23 = vpop.f32.mrb[37].mxu1 }
 0xc49   :  { %v2710_v24 = vpop.f32.mrb[38].mxu1 }
 0xc4a   :  { %v2716_v34 = vadd.f32 %v6610_v22, %v2714_v39  ;;  %v2715_v15 = vmul.f32 0.35355338, %v2710_v24  ;;  %v6274_v18 = vpop.f32.mrb[39].mxu1 }
 0xc4c   :  { %v2717_v12 = vadd.f32 %v6611_v20, %v2715_v15  ;;  %v2742_v40 = vsel %vm6775_vm15, %v2716_v34, -1e+30  ;;  %v2718_v41 = vsel %vm38_vm8, %v2716_v34, -1e+30  ;;  %v2730_v3 = vsel %vm6709_vm10, %v2716_v34, -1e+30 }
 0xc4d   :  { %v2744_v60 = vsel %vm239_vm1, %v2742_v40, -inf  ;;  %v2720_v61 = vsel %vm239_vm1, %v2718_v41, -inf  ;;  %v2732_v7 = vsel %vm239_vm1, %v2730_v3, -inf  ;;  %v2754_v13 = vsel %vm6791_vm4, %v2716_v34, -1e+30 }
 0xc4e   :  { %2745 = vmax.xlane.f32.xlu1 %v2744_v60  ;;  %2721 = vmax.xlane.f32.xlu0 %v2720_v61  ;;  %v2719_v5 = vsel %vm38_vm8, %v2717_v12, -1e+30  ;;  %v2731_v43 = vsel %vm6709_vm10, %v2717_v12, -1e+30  ;;  %v2756_v19 = vsel %vm239_vm1, %v2754_v13, -inf }
 0xc4f   :  { %v2723_v9 = vsel %vm239_vm1, %v2719_v5, -inf  ;;  %v2735_v42 = vsel %vm239_vm1, %v2731_v43, -inf  ;;  %v2743_v11 = vsel %vm6775_vm15, %v2717_v12, -1e+30  ;;  %v2755_v53 = vsel %vm6791_vm4, %v2717_v12, -1e+30 }
 0xc50   :  { %v2747_v16 = vsel %vm239_vm1, %v2743_v11, -inf  ;;  %v2759_v33 = vsel %vm239_vm1, %v2755_v53, -inf }
 0xc52   :  { %2733 = vmax.xlane.f32.xlu0 %v2732_v7  ;;  %2724 = vmax.xlane.f32.xlu1 %v2723_v9 }
 0xc56   :  { %2736 = vmax.xlane.f32.xlu0 %v2735_v42  ;;  %2757 = vmax.xlane.f32.xlu1 %v2756_v19 }
 0xc5a   :  { %2748 = vmax.xlane.f32.xlu0 %v2747_v16 }
 0xc5e   :  { %2760 = vmax.xlane.f32.xlu0 %v2759_v33 }
 0xc67   :  { %2829 = vrot.lane.b32.xlu1 %v2642_v54, %s6640_s13 }
 0xcdb   :  { %v2746_v28 = vpop.xlane.xlu1 %2745  ;;  %v2722_v55 = vpop.xlane.xlu0 %2721 }
 0xcdc   :  { %v2726_v1 = vsel %vm38_vm8, %v2722_v55, 0.0  ;;  %v2750_v36 = vsel %vm6775_vm15, %v2746_v28, 0.0  ;;  %v2644_v55 = vmul.bf16 %v7579_v46, %v6879_v0 }
 0xcdf   :  { %v2734_v31 = vpop.xlane.xlu0 %2733  ;;  %v2725_v45 = vpop.xlane.xlu1 %2724 }
 0xce0   :  { %v2738_v48 = vsel %vm6709_vm10, %v2734_v31, 0.0  ;;  %v2727_v32 = vsel %vm38_vm8, %v2725_v45, 0.0  ;;  %v2645_v31 = vmul.bf16 %v7579_v46, %v6883_v4  ;;  %v2643_v45 = vmul.bf16 %v7579_v46, %v6874_v62 }
 0xce1   :  { %v2740_v35 = vadd.f32 %v2738_v48, %v2726_v1 }
 0xce3   :  { %v2737_v37 = vpop.xlane.xlu0 %2736  ;;  %v2752_v26 = vadd.f32 %v2750_v36, %v2740_v35  ;;  %v2758_v17 = vpop.xlane.xlu1 %2757 }
 0xce4   :  { %v2762_v29 = vsel %vm6791_vm4, %v2758_v17, 0.0  ;;  %v2739_v21 = vsel %vm6709_vm10, %v2737_v37, 0.0 }
 0xce5   :  { %v2764_v8 = vadd.f32 %v2762_v29, %v2752_v26  ;;  %v2741_v23 = vadd.f32 %v2739_v21, %v2727_v32 }
 0xce7   :  { %v2766_v38 = vsub.f32 %v2716_v34, %v2764_v8  ;;  %v2749_v30 = vpop.xlane.xlu0 %2748  ;;  %v2830_v25 = vpop.permute.xlu1 %2829 }
 0xce8   :  { %v2751_v39 = vsel %vm6775_vm15, %v2749_v30, 0.0  ;;  %6276 = vmatpush3.bf16.msra.mxu0 %v2830_v25 }
 0xce9   :  { %v2768_v24 = vmul.f32 1.442695, %v2766_v38  ;;  %6277 = vmatprep.subr.bf16.mxu0 %v6636_v2  ;;  %v2753_v22 = vadd.f32 %v2751_v39, %v2741_v23 }
 0xceb   :  { %6592 = vpow2.f32 %v2768_v24  ;;  %v2761_v15 = vpop.xlane.xlu0 %2760 }
 0xcec   :  { %v2763_v18 = vsel %vm6791_vm4, %v2761_v15, 0.0 }
 0xced   :  { %v2765_v34 = vadd.f32 %v2763_v18, %v2753_v22 }
 0xcef   :  { %v2767_v20 = vsub.f32 %v2717_v12, %v2765_v34 }
 0xcf1   :  { %v2770_v40 = vmul.f32 1.442695, %v2767_v20  ;;  %v6444_v20 = vld [vmem:[%s8362_s2 + $0x10] sm:$0xff]  }
 0xcf3   :  { %6594 = vpow2.f32 %v2770_v40 }
 0xcf5   :  { %v7653_v41 = vpop.eup %6592 }
 0xcf6   :  { %v2772_v60 = vsel %vm38_vm8, %v7653_v41, 0.0  ;;  %v2784_v3 = vsel %vm6709_vm10, %v7653_v41, 0.0  ;;  %v2796_v12 = vsel %vm6775_vm15, %v7653_v41, 0.0  ;;  %v2808_v19 = vsel %vm6791_vm4, %v7653_v41, 0.0 }
 0xcf7   :  { %v2774_v61 = vsel %vm239_vm1, %v2772_v60, 0.0  ;;  %v2786_v5 = vsel %vm239_vm1, %v2784_v3, 0.0  ;;  %v2798_v13 = vsel %vm239_vm1, %v2796_v12, 0.0  ;;  %v2810_v16 = vsel %vm239_vm1, %v2808_v19, 0.0  ;;  %v6445_v60 = vld [vmem:[%s8362_s2 + $0x18] sm:$0xff]  }
 0xcf8   :  { %2775 = vadd.xlane.f32.xlu1 %v2774_v61 }
 0xcfc   :  { %2787 = vadd.xlane.f32.xlu1 %v2786_v5 }
 0xcfd   :  { %v6595_v7 = vpop.eup %6594 }
 0xcfe   :  { %v2773_v9 = vsel %vm38_vm8, %v6595_v7, 0.0  ;;  %v2785_v42 = vsel %vm6709_vm10, %v6595_v7, 0.0  ;;  %v2797_v53 = vsel %vm6775_vm15, %v6595_v7, 0.0  ;;  %v2809_v54 = vsel %vm6791_vm4, %v6595_v7, 0.0 }
 0xcff   :  { %v2777_v43 = vsel %vm239_vm1, %v2773_v9, 0.0  ;;  %v2789_v11 = vsel %vm239_vm1, %v2785_v42, 0.0  ;;  %v2801_v33 = vsel %vm239_vm1, %v2797_v53, 0.0  ;;  %v2813_v28 = vsel %vm239_vm1, %v2809_v54, 0.0 }
 0xd00   :  { %2778 = vadd.xlane.f32.xlu0 %v2777_v43  ;;  %2799 = vadd.xlane.f32.xlu1 %v2798_v13 }
 0xd04   :  { %2790 = vadd.xlane.f32.xlu0 %v2789_v11  ;;  %2811 = vadd.xlane.f32.xlu1 %v2810_v16 }
 0xd08   :  { %2802 = vadd.xlane.f32.xlu0 %v2801_v33 }
 0xd0c   :  { %2814 = vadd.xlane.f32.xlu0 %v2813_v28 }
 0xd15   :  { %2833 = vrot.lane.b32.xlu1 %v2644_v55, %s6640_s13 }
 0xd19   :  { %2835 = vrot.lane.b32.xlu1 %v2645_v31, %s6640_s13 }
 0xd22   :  { %2831 = vrot.lane.b32.xlu0 %v2643_v45, %s6640_s13  ;;  %s6612_s13 = scalar_lea.vmem %s5144_s0, 32 }
 0xd23   :  { %p6613_p0 = scmp.ne.s32.totalorder %s5144_s0, %s6612_s13  ;;  %p6618_p2 = scmp.lt.s32.totalorder %s6612_s13, %s6612_s13 }
 0xd25   :  { %p6619_p3 = por %p6618_p2, %p6617_p1 }
 0xd27   :  { %p6620_p4 = pnand %p6619_p3, %p6613_p0 }
 0xd85   :  { %v2776_v1 = vpop.xlane.xlu1 %2775 }
 0xd86   :  { %v2780_v17 = vsel %vm38_vm8, %v2776_v1, 0.0 }
 0xd89   :  { %v2788_v48 = vpop.xlane.xlu1 %2787 }
 0xd8a   :  { %v2792_v37 = vsel %vm6709_vm10, %v2788_v48, 0.0 }
 0xd8b   :  { %v2794_v29 = vadd.f32 %v2792_v37, %v2780_v17 }
 0xd8d   :  { %v2779_v35 = vpop.xlane.xlu0 %2778  ;;  %v2800_v36 = vpop.xlane.xlu1 %2799 }
 0xd8e   :  { %v2804_v4 = vsel %vm6775_vm15, %v2800_v36, 0.0  ;;  %v2781_v38 = vsel %vm38_vm8, %v2779_v35, 0.0 }
 0xd8f   :  { %v2806_v8 = vadd.f32 %v2804_v4, %v2794_v29  ;;  %v5366_v4 = vld [vmem:[%s8363_s3 + $0x148] sm:$0xff] }
 0xd91   :  { %v2791_v0 = vpop.xlane.xlu0 %2790  ;;  %v2812_v26 = vpop.xlane.xlu1 %2811 }
 0xd92   :  { %v2793_v62 = vsel %vm6709_vm10, %v2791_v0, 0.0  ;;  %v2816_v46 = vsel %vm6791_vm4, %v2812_v26, 0.0  ;;  %v5365_v0 = vld [vmem:[%s8363_s3 + $0x140] sm:$0xff]  ;;  %v5358_v26 = vld [vmem:[%s8363_s3 + $0x108] sm:$0xff] }
 0xd93   :  { %v2795_v25 = vadd.f32 %v2793_v62, %v2781_v38  ;;  %v2818_v32 = vadd.f32 %v2816_v46, %v2806_v8  ;;  %v5395_v62 = vcombine.low %v5358_v26, %v5366_v4  ;;  %v5396_v46 = vcombine.high %v5358_v26, %v5366_v4  ;;  %v5373_v8 = vld [vmem:[%s8363_s3 + $0x180] sm:$0xff]  ;;  %v5374_v38 = vld [vmem:[%s8363_s3 + $0x188] sm:$0xff] }
 0xd94   :  { %v5385_v26 = vld [vmem:[%s8363_s3 + $0x1e0] sm:$0xff]  ;;  %v5386_v4 = vld [vmem:[%s8363_s3 + $0x1e8] sm:$0xff] }
 0xd95   :  { %v2803_v21 = vpop.xlane.xlu0 %2802  ;;  %6596 = vrcp.f32 %v2818_v32  ;;  %v2834_v15 = vpop.permute.xlu1 %2833  ;;  %3312 = vmatprep.subr.bf16.mxu1 %v5396_v46 }
 0xd96   :  { %v2805_v30 = vsel %vm6775_vm15, %v2803_v21, 0.0  ;;  %v5381_v21 = vld [vmem:[%s8363_s3 + $0x1c0] sm:$0xff]  ;;  %3313 = vmatpush1.bf16.msra.mxu1 %v5395_v62 }
 0xd97   :  { %v2807_v39 = vadd.f32 %v2805_v30, %v2795_v25  ;;  %v5410_v30 = vcombine.high %v5373_v8, %v5381_v21  ;;  %v5382_v25 = vld [vmem:[%s8363_s3 + $0x1c8] sm:$0xff]  ;;  %v5409_v32 = vcombine.low %v5373_v8, %v5381_v21  ;;  %v5363_v21 = vld [vmem:[%s8363_s3 + $0x130] sm:$0xff] }
 0xd99   :  { %v2815_v23 = vpop.xlane.xlu0 %2814  ;;  %v2836_v47 = vpop.permute.xlu1 %2835 }
 0xd9a   :  { %v2817_v24 = vsel %vm6791_vm4, %v2815_v23, 0.0  ;;  %v5412_v23 = vcombine.high %v5374_v38, %v5382_v25 }
 0xd9b   :  { %v2819_v10 = vadd.f32 %v2817_v24, %v2807_v39  ;;  %v5411_v39 = vcombine.low %v5374_v38, %v5382_v25  ;;  %v5359_v24 = vld [vmem:[%s8363_s3 + $0x110] sm:$0xff]  ;;  %v5372_v25 = vld [vmem:[%s8363_s3 + $0x178] sm:$0xff] }
 0xd9c   :  { %3314 = vmatprep.subr.bf16.mxu1 %v5412_v23  ;;  %v5371_v38 = vld [vmem:[%s8363_s3 + $0x170] sm:$0xff] }
 0xd9d   :  { %6598 = vrcp.f32 %v2819_v10  ;;  %v2832_v22 = vpop.permute.xlu0 %2831  ;;  %v5367_v10 = vld [vmem:[%s8363_s3 + $0x150] sm:$0xff]  ;;  %3315 = vmatpush1.bf16.msra.mxu1 %v5411_v39  ;;  %v5406_v23 = vcombine.high %v5363_v21, %v5371_v38 }
 0xd9e   :  { %6278 = vmatpush3.bf16.msra.mxu0 %v2832_v22  ;;  %v5360_v22 = vld [vmem:[%s8363_s3 + $0x118] sm:$0xff] }
 0xd9f   :  { %6279 = vmatprep.subr.bf16.mxu0 %v6636_v2  ;;  %v6597_v6 = vpop.eup %6596 }
 0xda0   :  { %v2822_v58 = vmul.f32 %v6597_v6, %v7653_v41  ;;  %v5398_v6 = vcombine.high %v5359_v24, %v5367_v10 }
 0xda2   :  { %6280 = vmatpush3.bf16.msra.mxu0 %v2834_v15  ;;  %v5397_v15 = vcombine.low %v5359_v24, %v5367_v10  ;;  %v5379_v10 = vld [vmem:[%s8363_s3 + $0x1b0] sm:$0xff] }
 0xda3   :  { %6281 = vmatprep.subr.bf16.mxu0 %v6636_v2 }
 0xda6   :  { %6282 = vmatpush3.bf16.msra.mxu0 %v2836_v47  ;;  %v5368_v47 = vld [vmem:[%s8363_s3 + $0x158] sm:$0xff] }
 0xda7   :  { %v6599_v18 = vpop.eup %6598  ;;  %6287 = vmatprep.subr.bf16.mxu0 %v6636_v2 }
 0xda8   :  { %v2823_v34 = vmul.f32 %v6599_v18, %v6595_v7  ;;  %v5351_v7 = vld [vmem:[%s8365_s5 + $0x81] ss:$0 sm:$0xff]  ;;  %v5399_v18 = vcombine.low %v5360_v22, %v5368_v47 }
 0xdaa   :  { %v2824_v40 = vpack.c.bf16 %v2823_v34, %v2822_v58  ;;  %v5400_v58 = vcombine.high %v5360_v22, %v5368_v47  ;;  %v5387_v22 = vld [vmem:[%s8363_s3 + $0x1f0] sm:$0xff]  ;;  %v5405_v47 = vcombine.low %v5363_v21, %v5371_v38 }
 0xdab   :  { %v5390_v21 = vld [vmem:[%s8365_s5 + $0x84] ss:$8 sm:$0xf0] }
 0xdac   :  { %6284 = vmatmul.mubr.msk.bf16.vlgmr.msra.gmra.mrb[48].mxu0 %vm239_vm1, %v2824_v40  ;;  %3398 = vmatprep.subr.bf16.mxu1 %v5400_v58  ;;  %v5422_v58 = vcombine.high %v5379_v10, %v5387_v22 }
 0xdad   :  { %6288 = vmatpush3.bf16.msra.mxu0 %v6444_v20  ;;  %6291 = vmatprep.mubr.msk.bf16.mxu0 %vm6637_vm0, %v6636_v2 }
 0xdae   :  { %6289 = vmatprep.subr.bf16.mxu0 %v6636_v2 }
 0xdb1   :  { %6290 = vmatpush3.bf16.msra.mxu0 %v6445_v60 }
 0xe7f   :  { %v2878_v41 = vpop.f32.mrb[48].mxu0 }
 0xe80   :  { %v6285_v61 = vpop.f32.mrb[49].mxu0 }
 0xe81   :  { %v2881_v3 = vpop.f32.mrb[50].mxu0 }
 0xe82   :  { %v2885_v5 = vpack.c.bf16 %v2881_v3, %v2878_v41  ;;  %v6286_v12 = vpop.f32.mrb[51].mxu0 }
 0xe83   :  { %v5355_v12 = vld [vmem:[%s8365_s5 + $0x82] ss:$0 sm:$0xff] }
 0xe84   :  { %6292 = vmatmul.mubr.msk.bf16.vlgmr.msra.gmra.mrb[52].mxu0 %vm81_vm9, %v2885_v5 }
 0xe85   :  { %3301 = vmatprep.mubr.bf16.mxu0 %v6641_v44 }
 0xf57   :  { %v2941_v9 = vpop.f32.mrb[52].mxu0 }
 0xf58   :  { %v2942_v43 = vadd.f32 %v5351_v7, %v2941_v9  ;;  %v6293_v13 = vpop.f32.mrb[53].mxu0 }
 0xf59   :  { %v2944_v42 = vpop.f32.mrb[54].mxu0  ;;  %v5356_v13 = vld [vmem:[%s8365_s5 + $0x83] ss:$0 sm:$0xff] }
 0xf5a   :  { %v2945_v19 = vadd.f32 %v5351_v7, %v2944_v42  ;;  %v6294_v11 = vpop.f32.mrb[55].mxu0  ;;  %v2948_v16 = vadd.f32 %v2942_v43, %v7567_v27 }
 0xf5b   :  { %v5383_v11 = vld [vmem:[%s8363_s3 + $0x1d0] sm:$0xff] }
 0xf5c   :  { %v2952_v53 = vsel %vm81_vm9, %v2948_v16, 0.0  ;;  %v2949_v33 = vadd.f32 %v2945_v19, %v7569_v14  ;;  %v5357_v14 = vld [vmem:[%s8363_s3 + $0x100] sm:$0xff]  ;;  %v5375_v19 = vld [vmem:[%s8363_s3 + $0x190] sm:$0xff] }
 0xf5d   :  { %2953 = vadd.xlane.f32.xlu0 %v2952_v53  ;;  %v5394_v17 = vcombine.high %v5357_v14, %v5365_v0  ;;  %v5393_v29 = vcombine.low %v5357_v14, %v5365_v0  ;;  %v5384_v53 = vld [vmem:[%s8363_s3 + $0x1d8] sm:$0xff]  ;;  %v5377_v0 = vld [vmem:[%s8363_s3 + $0x1a0] sm:$0xff] }
 0xf5e   :  { %v2955_v54 = vsel %vm81_vm9, %v2949_v33, 0.0  ;;  %v5418_v46 = vcombine.high %v5377_v0, %v5385_v26 }
 0xf5f   :  { %2956 = vadd.xlane.f32.xlu1 %v2955_v54  ;;  %3269 = vmatprep.subr.bf16.mxu0 %v5394_v17  ;;  %v5378_v17 = vld [vmem:[%s8363_s3 + $0x1a8] sm:$0xff] }
 0xf60   :  { %3270 = vmatpush1.bf16.msra.mxu0 %v5393_v29  ;;  %v5420_v8 = vcombine.high %v5378_v17, %v5386_v4  ;;  %v5419_v39 = vcombine.low %v5378_v17, %v5386_v4  ;;  %v6475_v17 = vld [vmem:[%s8364_s4 + $0x4f8] sm:$0xff]  }
 0xf61   :  { %3271 = vmatprep.subr.bf16.mxu0 %v5410_v30  ;;  %v5364_v30 = vld [vmem:[%s8363_s3 + $0x138] sm:$0xff] }
 0xf62   :  { %v5408_v24 = vcombine.high %v5364_v30, %v5372_v25  ;;  %v6476_v4 = vld [vmem:[%s8364_s4 + $0x438] sm:$0xff]  }
 0xf64   :  { %3272 = vmatpush1.bf16.msra.mxu0 %v5409_v32  ;;  %v5417_v32 = vcombine.low %v5377_v0, %v5385_v26  ;;  %v6473_v0 = vld [vmem:[%s8364_s4 + $0x4b0] sm:$0xff]   ;;  %v6474_v26 = vld [vmem:[%s8364_s4 + $0x478] sm:$0xff]  }
 0xf65   :  { %3355 = vmatprep.subr.bf16.mxu0 %v5398_v6  ;;  %v5388_v6 = vld [vmem:[%s8363_s3 + $0x1f8] sm:$0xff] }
 0xfea   :  { %v2954_v28 = vpop.xlane.xlu0 %2953 }
 0xfeb   :  { %v2958_v55 = vmul.f32 0.03125, %v2954_v28 }
 0xfec   :  { %v2957_v31 = vpop.xlane.xlu1 %2956 }
 0xfed   :  { %v2960_v45 = vsub.f32 %v2948_v16, %v2958_v55  ;;  %v2959_v1 = vmul.f32 0.03125, %v2957_v31  ;;  %v5376_v16 = vld [vmem:[%s8363_s3 + $0x198] sm:$0xff]  ;;  %v5414_v55 = vcombine.high %v5375_v19, %v5383_v11 }
 0xfee   :  { %v5416_v31 = vcombine.high %v5376_v16, %v5384_v53 }
 0xfef   :  { %v2961_v48 = vsub.f32 %v2949_v33, %v2959_v1  ;;  %v2962_v35 = vmul.f32 %v2960_v45, %v2960_v45  ;;  %v5369_v1 = vld [vmem:[%s8363_s3 + $0x160] sm:$0xff] }
 0xff1   :  { %v2964_v36 = vsel %vm81_vm9, %v2962_v35, 0.0  ;;  %v2963_v37 = vmul.f32 %v2961_v48, %v2961_v48  ;;  %v5370_v35 = vld [vmem:[%s8363_s3 + $0x168] sm:$0xff] }
 0xff2   :  { %2965 = vadd.xlane.f32.xlu0 %v2964_v36  ;;  %v5413_v36 = vcombine.low %v5375_v19, %v5383_v11  ;;  %v6458_v19 = vld [vmem:[%s8364_s4 + $0x458] sm:$0xff]  }
 0xff3   :  { %v2967_v27 = vsel %vm81_vm9, %v2963_v37, 0.0  ;;  %v5415_v37 = vcombine.low %v5376_v16, %v5384_v53  ;;  %v6459_v11 = vld [vmem:[%s8364_s4 + $0x4d8] sm:$0xff]  }
 0xff4   :  { %v6460_v16 = vld [vmem:[%s8364_s4 + $0x418] sm:$0xff]  }
 0xff5   :  { %v6461_v53 = vld [vmem:[%s8364_s4 + $0x498] sm:$0xff]  }
 0xff6   :  { %2968 = vadd.xlane.f32.xlu0 %v2967_v27 }
0x107f   :  { %v2966_v34 = vpop.xlane.xlu0 %2965 }
0x1080   :  { %v2970_v20 = vmul.f32 0.03125, %v2966_v34 }
0x1082   :  { %v2972_v40 = vadd.f32 1e-05, %v2970_v20  ;;  %v5421_v20 = vcombine.low %v5379_v10, %v5387_v22  ;;  %v5391_v10 = vld [vmem:[%s8365_s5 + $0xc4] ss:$8 sm:$0xf] }
0x1083   :  { %v2969_v60 = vpop.xlane.xlu0 %2968 }
0x1084   :  { %6600 = vrsqrt.f32 %v2972_v40  ;;  %v2971_v41 = vmul.f32 0.03125, %v2969_v60  ;;  %v6446_v60 = vld [vmem:[%s8364_s4 + $0x440] sm:$0xff]  }
0x1086   :  { %v2973_v61 = vadd.f32 1e-05, %v2971_v41  ;;  %v6447_v41 = vld [vmem:[%s8364_s4 + $0x4c0] sm:$0xff]  }
0x1088   :  { %6602 = vrsqrt.f32 %v2973_v61  ;;  %v6448_v61 = vld [vmem:[%s8364_s4 + $0x400] sm:$0xff]  }
0x108e   :  { %v6601_v3 = vpop.eup %6600 }
0x108f   :  { %v2976_v5 = vmul.f32 %v6601_v3, %v2960_v45  ;;  %v5361_v45 = vld [vmem:[%s8363_s3 + $0x120] sm:$0xff] }
0x1090   :  { %v5402_v27 = vcombine.high %v5361_v45, %v5369_v1  ;;  %v5401_v29 = vcombine.low %v5361_v45, %v5369_v1  ;;  %v6449_v3 = vld [vmem:[%s8364_s4 + $0x480] sm:$0xff]   ;;  %v6466_v1 = vld [vmem:[%s8364_s4 + $0x468] sm:$0xff]  }
0x1091   :  { %v2978_v9 = vmul.f32 %v5355_v12, %v2976_v5  ;;  %v6450_v5 = vld [vmem:[%s8364_s4 + $0x448] sm:$0xff]   ;;  %v6465_v45 = vld [vmem:[%s8364_s4 + $0x4a0] sm:$0xff]  }
0x1092   :  { %v6603_v7 = vpop.eup %6602 }
0x1093   :  { %v2977_v43 = vmul.f32 %v6603_v7, %v2961_v48  ;;  %v7787_v33 = vadd.f32 %v5356_v13, %v2978_v9  ;;  %v5362_v48 = vld [vmem:[%s8363_s3 + $0x128] sm:$0xff]  ;;  %v6454_v9 = vld [vmem:[%s8364_s4 + $0x450] sm:$0xff]  }
0x1094   :  { %v5404_v14 = vcombine.high %v5362_v48, %v5370_v35  ;;  %v5403_v62 = vcombine.low %v5362_v48, %v5370_v35  ;;  %v6453_v7 = vld [vmem:[%s8364_s4 + $0x488] sm:$0xff]  }
0x1095   :  { %v2979_v42 = vmul.f32 %v5355_v12, %v2977_v43  ;;  %v6452_v12 = vld [vmem:[%s8364_s4 + $0x408] sm:$0xff]   ;;  %v6455_v43 = vld [vmem:[%s8364_s4 + $0x4d0] sm:$0xff]  }
0x1096   :  { %v6467_v48 = vld [vmem:[%s8364_s4 + $0x4e8] sm:$0xff]  }
0x1097   :  { %v7789_v54 = vadd.f32 %v5356_v13, %v2979_v42  ;;  %v6456_v13 = vld [vmem:[%s8364_s4 + $0x410] sm:$0xff]   ;;  %v6468_v35 = vld [vmem:[%s8364_s4 + $0x428] sm:$0xff]  }
0x1098   :  { %v6457_v42 = vld [vmem:[%s8364_s4 + $0x490] sm:$0xff]  }
0x1099   :  { %v7793_v28 = vpack.c.bf16 %v7789_v54, %v7787_v33 }
0x109b   :  { %5425 = vmatmul.mubr.msk.bf16.vlgmr.msra.gmra.mrb[56].mxu0 %vm81_vm9, %v7793_v28  ;;  %5426 = vmatmul.mubr.msk.bf16.vlgmr.msra.gmra.mrb[40].mxu1 %vm81_vm9, %v7793_v28 }
0x109c   :  { %3356 = vmatpush1.bf16.msra.mxu0 %v5397_v15  ;;  %3399 = vmatpush1.bf16.msra.mxu1 %v5399_v18  ;;  %v5380_v15 = vld [vmem:[%s8363_s3 + $0x1b8] sm:$0xff]  ;;  %v5407_v18 = vcombine.low %v5364_v30, %v5372_v25 }
0x109d   :  { %3357 = vmatprep.subr.bf16.mxu0 %v5414_v55  ;;  %3400 = vmatprep.subr.bf16.mxu1 %v5416_v31  ;;  %v5424_v34 = vcombine.high %v5380_v15, %v5388_v6  ;;  %v5423_v40 = vcombine.low %v5380_v15, %v5388_v6  ;;  %v6463_v55 = vld [vmem:[%s8364_s4 + $0x4e0] sm:$0xff]  }
0x109e   :  { %3387 = vmatprep.mubr.bf16.mxu0 %v6641_v44  ;;  %3430 = vmatprep.mubr.bf16.mxu1 %v6641_v44  ;;  %v6464_v31 = vld [vmem:[%s8364_s4 + $0x420] sm:$0xff]  }
0x10a0   :  { %3358 = vmatpush1.bf16.msra.mxu0 %v5413_v36  ;;  %3401 = vmatpush1.bf16.msra.mxu1 %v5415_v37  ;;  %v6469_v36 = vld [vmem:[%s8364_s4 + $0x4a8] sm:$0xff]   ;;  %v6470_v37 = vld [vmem:[%s8364_s4 + $0x470] sm:$0xff]  }
0x10a1   :  { %3441 = vmatprep.subr.bf16.mxu0 %v5402_v27  ;;  %3484 = vmatprep.subr.bf16.mxu1 %v5404_v14  ;;  %v6471_v27 = vld [vmem:[%s8364_s4 + $0x4f0] sm:$0xff]  }
0x10a2   :  { %v6472_v14 = vld [vmem:[%s8364_s4 + $0x430] sm:$0xff]  }
0x10a3   :  { %5427 = vmatmul.mubr.msk.bf16.vlgmr.msra.gmra.mrb[60].mxu0 %vm81_vm9, %v7793_v28  ;;  %5428 = vmatmul.mubr.msk.bf16.vlgmr.msra.gmra.mrb[44].mxu1 %vm81_vm9, %v7793_v28 }
0x10a4   :  { %3442 = vmatpush1.bf16.msra.mxu0 %v5401_v29  ;;  %3485 = vmatpush1.bf16.msra.mxu1 %v5403_v62  ;;  %v6477_v29 = vld [vmem:[%s8364_s4 + $0x4b8] sm:$0xff]   ;;  %v6478_v62 = vld [vmem:[%s8364_s4 + $0x540] sm:$0xff]  }
0x10a5   :  { %3443 = vmatprep.subr.bf16.mxu0 %v5418_v46  ;;  %3486 = vmatprep.subr.bf16.mxu1 %v5420_v8  ;;  %v6479_v46 = vld [vmem:[%s8364_s4 + $0x5c0] sm:$0xff]  }
0x10a6   :  { %3473 = vmatprep.mubr.bf16.mxu0 %v6641_v44  ;;  %3516 = vmatprep.mubr.bf16.mxu1 %v6641_v44  ;;  %v5389_v8 = vld [vmem:[%s8365_s5 + $0x84] ss:$8 sm:$0xf] }
0x10a7   :  { %v3019_v38 = vor.u32 %v5390_v21, %v5389_v8 }
0x10a8   :  { %3444 = vmatpush1.bf16.msra.mxu0 %v5417_v32  ;;  %3487 = vmatpush1.bf16.msra.mxu1 %v5419_v39 }
0x10a9   :  { %3527 = vmatprep.subr.bf16.mxu0 %v5406_v23  ;;  %3570 = vmatprep.subr.bf16.mxu1 %v5408_v24  ;;  %v3029_v30 = vrot.slane %v3019_v38, %v7178_v49  ;;  %v3037_v25 = vrot.slane %v3019_v38, %v7180_v50  ;;  %v3033_v32 = vrot.slane %v3019_v38, %v7182_v51 }
0x10aa   :  { %v3041_v39 = vrot.slane %v3019_v38, %v7184_v52 }
0x10ab   :  { %5429 = vmatmul.mubr.msk.bf16.vlgmr.msra.gmra.mrb[64].mxu0 %vm81_vm9, %v7793_v28  ;;  %5430 = vmatmul.mubr.msk.bf16.vlgmr.msra.gmra.mrb[48].mxu1 %vm81_vm9, %v7793_v28 }
0x10ac   :  { %3528 = vmatpush1.bf16.msra.mxu0 %v5405_v47  ;;  %3571 = vmatpush1.bf16.msra.mxu1 %v5407_v18  ;;  %v5392_v18 = vld [vmem:[%s8365_s5 + $0xc4] ss:$8 sm:$0xf0] }
0x10ad   :  { %3529 = vmatprep.subr.bf16.mxu0 %v5422_v58  ;;  %3572 = vmatprep.subr.bf16.mxu1 %v5424_v34 }
0x10ae   :  { %3559 = vmatprep.mubr.bf16.mxu0 %v6641_v44  ;;  %3602 = vmatprep.mubr.bf16.mxu1 %v6641_v44  ;;  %v6451_v44 = vld [vmem:[%s8364_s4 + $0x4c8] sm:$0xff]  }
0x10b0   :  { %3530 = vmatpush1.bf16.msra.mxu0 %v5421_v20  ;;  %3573 = vmatpush1.bf16.msra.mxu1 %v5423_v40 }
0x10b1   :  { %6036 = vmatprep.subr.bf16.mxu0 %v6446_v60  ;;  %6058 = vmatprep.subr.bf16.mxu1 %v6447_v41  ;;  %v3045_v60 = vrot.slane %v3019_v38, %v7190_v56 }
0x10b3   :  { %5431 = vmatmul.mubr.msk.bf16.vlgmr.msra.gmra.mrb[68].mxu0 %vm81_vm9, %v7793_v28  ;;  %5432 = vmatmul.mubr.msk.bf16.vlgmr.msra.gmra.mrb[52].mxu1 %vm81_vm9, %v7793_v28  ;;  %v6462_v28 = vld [vmem:[%s8364_s4 + $0x460] sm:$0xff]  }
0x10b4   :  { %6037 = vmatpush3.bf16.msra.mxu0 %v6448_v61  ;;  %6059 = vmatpush3.bf16.msra.mxu1 %v6449_v3 }
0x10b5   :  { %6038 = vmatprep.subr.bf16.mxu0 %v6450_v5  ;;  %6060 = vmatprep.subr.bf16.mxu1 %v6451_v44  ;;  %v3053_v44 = vrot.slane %v3019_v38, %v7192_v57 }
0x10b8   :  { %6039 = vmatpush3.bf16.msra.mxu0 %v6452_v12  ;;  %6061 = vmatpush3.bf16.msra.mxu1 %v6453_v7  ;;  %v3049_v12 = vrot.slane %v3019_v38, %v7194_v59 }
0x10b9   :  { %6040 = vmatprep.subr.bf16.mxu0 %v6454_v9  ;;  %6062 = vmatprep.subr.bf16.mxu1 %v6455_v43  ;;  %v3057_v43 = vrot.slane %v3019_v38, %v7196_v63 }
0x10bc   :  { %6041 = vmatpush3.bf16.msra.mxu0 %v6456_v13  ;;  %6063 = vmatpush3.bf16.msra.mxu1 %v6457_v42  ;;  %v7987_v13 = vor.u32 %v5392_v18, %v5391_v10 }
0x10bd   :  { %6042 = vmatprep.subr.bf16.mxu0 %v6458_v19  ;;  %6064 = vmatprep.subr.bf16.mxu1 %v6459_v11 }
0x10be   :  { %v3065_v10 = vrot.slane %v7987_v13, %v7182_v51  ;;  %v6486_v51 = vld [vmem:[%s8364_s4 + $0x550] sm:$0xff]  }
0x10c0   :  { %6043 = vmatpush3.bf16.msra.mxu0 %v6460_v16  ;;  %6065 = vmatpush3.bf16.msra.mxu1 %v6461_v53 }
0x10c1   :  { %6044 = vmatprep.subr.bf16.mxu0 %v6462_v28  ;;  %6066 = vmatprep.subr.bf16.mxu1 %v6463_v55 }
0x10c4   :  { %6045 = vmatpush3.bf16.msra.mxu0 %v6464_v31  ;;  %6067 = vmatpush3.bf16.msra.mxu1 %v6465_v45 }
0x10c5   :  { %6046 = vmatprep.subr.bf16.mxu0 %v6466_v1  ;;  %6068 = vmatprep.subr.bf16.mxu1 %v6467_v48 }
0x10c8   :  { %6047 = vmatpush3.bf16.msra.mxu0 %v6468_v35  ;;  %6069 = vmatpush3.bf16.msra.mxu1 %v6469_v36 }
0x10c9   :  { %6048 = vmatprep.subr.bf16.mxu0 %v6470_v37  ;;  %6070 = vmatprep.subr.bf16.mxu1 %v6471_v27  ;;  %v6480_v27 = vld [vmem:[%s8364_s4 + $0x500] sm:$0xff]  }
0x10cc   :  { %6049 = vmatpush3.bf16.msra.mxu0 %v6472_v14  ;;  %6071 = vmatpush3.bf16.msra.mxu1 %v6473_v0  ;;  %v6481_v14 = vld [vmem:[%s8364_s4 + $0x580] sm:$0xff]  }
0x10cd   :  { %6050 = vmatprep.subr.bf16.mxu0 %v6474_v26  ;;  %6072 = vmatprep.subr.bf16.mxu1 %v6475_v17 }
0x10d0   :  { %6051 = vmatpush3.bf16.msra.mxu0 %v6476_v4  ;;  %6073 = vmatpush3.bf16.msra.mxu1 %v6477_v29  ;;  %v6482_v29 = vld [vmem:[%s8364_s4 + $0x548] sm:$0xff]  }
0x10d1   :  { %6080 = vmatprep.subr.bf16.mxu0 %v6478_v62  ;;  %6102 = vmatprep.subr.bf16.mxu1 %v6479_v46  ;;  %v6483_v62 = vld [vmem:[%s8364_s4 + $0x5c8] sm:$0xff]   ;;  %v3061_v46 = vrot.slane %v7987_v13, %v7178_v49 }
0x116e   :  { %v3303_v23 = vpop.f32.mrb[56].mxu0  ;;  %v3346_v24 = vpop.f32.mrb[40].mxu1 }
0x116f   :  { %v3304_v22 = vadd.f32 %v3303_v23, %v3029_v30  ;;  %v3347_v15 = vadd.f32 %v3346_v24, %v3037_v25  ;;  %v3305_v6 = vpop.f32.mrb[57].mxu0  ;;  %v3348_v47 = vpop.f32.mrb[41].mxu1 }
0x1170   :  { %v3306_v58 = vadd.f32 %v3305_v6, %v3033_v32  ;;  %v3349_v34 = vadd.f32 %v3348_v47, %v3041_v39  ;;  %v3307_v20 = vpop.f32.mrb[58].mxu0  ;;  %v3350_v40 = vpop.f32.mrb[42].mxu1  ;;  %v3073_v6 = vrot.slane %v7987_v13, %v7184_v52 }
0x1171   :  { %v3308_v41 = vadd.f32 %v3307_v20, %v3029_v30  ;;  %v3351_v61 = vadd.f32 %v3350_v40, %v3037_v25  ;;  %v3309_v3 = vpop.f32.mrb[59].mxu0  ;;  %v3352_v5 = vpop.f32.mrb[43].mxu1  ;;  %v3613_v42 = vmax.f32 %v3304_v22, 0.0  ;;  %v3615_v19 = vmax.f32 %v3347_v15, 0.0  ;;  %v6484_v15 = vld [vmem:[%s8364_s4 + $0x508] sm:$0xff]   ;;  %v6487_v20 = vld [vmem:[%s8364_s4 + $0x5d0] sm:$0xff]  }
0x1172   :  { %v3310_v7 = vadd.f32 %v3309_v3, %v3033_v32  ;;  %v3353_v9 = vadd.f32 %v3352_v5, %v3041_v39  ;;  %v3614_v53 = vmax.f32 %v3306_v58, 0.0  ;;  %v3616_v28 = vmax.f32 %v3349_v34, 0.0 }
0x1173   :  { %v3629_v11 = vmax.f32 %v3308_v41, 0.0  ;;  %v3631_v16 = vmax.f32 %v3351_v61, 0.0  ;;  %v3069_v25 = vrot.slane %v7987_v13, %v7180_v50  ;;  %v6485_v50 = vld [vmem:[%s8364_s4 + $0x588] sm:$0xff]  }
0x1174   :  { %v3630_v55 = vmax.f32 %v3310_v7, 0.0  ;;  %v3632_v31 = vmax.f32 %v3353_v9, 0.0  ;;  %v6488_v9 = vld [vmem:[%s8364_s4 + $0x510] sm:$0xff]  }
0x1175   :  { %v3645_v45 = vpack.c.bf16 %v3629_v11, %v3613_v42  ;;  %v3647_v1 = vpack.c.bf16 %v3631_v16, %v3615_v19 }
0x1176   :  { %v3646_v48 = vpack.c.bf16 %v3630_v55, %v3614_v53  ;;  %v3648_v35 = vpack.c.bf16 %v3632_v31, %v3616_v28  ;;  %v3389_v36 = vpop.f32.mrb[60].mxu0  ;;  %v3432_v37 = vpop.f32.mrb[44].mxu1  ;;  %v6490_v53 = vld [vmem:[%s8364_s4 + $0x558] sm:$0xff]  }
0x1177   :  { %v3390_v0 = vadd.f32 %v3389_v36, %v3045_v60  ;;  %v3433_v26 = vadd.f32 %v3432_v37, %v3053_v44  ;;  %v3391_v17 = vpop.f32.mrb[61].mxu0  ;;  %v3434_v4 = vpop.f32.mrb[45].mxu1  ;;  %v6491_v28 = vld [vmem:[%s8364_s4 + $0x5d8] sm:$0xff]  }
0x1178   :  { %v3392_v8 = vadd.f32 %v3391_v17, %v3049_v12  ;;  %v3435_v21 = vadd.f32 %v3434_v4, %v3057_v43  ;;  %v3393_v38 = vpop.f32.mrb[62].mxu0  ;;  %v3436_v30 = vpop.f32.mrb[46].mxu1  ;;  %4719 = vmatprep.mubr.bf16.mxu0 %v3646_v48  ;;  %4760 = vmatprep.mubr.bf16.mxu1 %v3648_v35  ;;  %v3077_v48 = vrot.slane %v7987_v13, %v7190_v56  ;;  %v6492_v4 = vld [vmem:[%s8364_s4 + $0x518] sm:$0xff]  }
0x1179   :  { %v3394_v32 = vadd.f32 %v3393_v38, %v3045_v60  ;;  %v3437_v39 = vadd.f32 %v3436_v30, %v3053_v44  ;;  %v3395_v23 = vpop.f32.mrb[63].mxu0  ;;  %v3438_v24 = vpop.f32.mrb[47].mxu1  ;;  %4720 = vmatmul.mubr.bf16.vlgmr.msra.gmra.mrb[72].mxu0 %v3645_v45  ;;  %4761 = vmatmul.mubr.bf16.vlgmr.msra.gmra.mrb[56].mxu1 %v3647_v1  ;;  %v3617_v47 = vmax.f32 %v3390_v0, 0.0  ;;  %v3619_v18 = vmax.f32 %v3433_v26, 0.0  ;;  %v6493_v56 = vld [vmem:[%s8364_s4 + $0x598] sm:$0xff]  }
0x117a   :  { %v3396_v22 = vadd.f32 %v3395_v23, %v3049_v12  ;;  %v3439_v49 = vadd.f32 %v3438_v24, %v3057_v43  ;;  %6081 = vmatpush3.bf16.msra.mxu0 %v6480_v27  ;;  %6103 = vmatpush3.bf16.msra.mxu1 %v6481_v14  ;;  %v3618_v40 = vmax.f32 %v3392_v8, 0.0  ;;  %v3620_v60 = vmax.f32 %v3435_v21, 0.0  ;;  %v6489_v43 = vld [vmem:[%s8364_s4 + $0x590] sm:$0xff]   ;;  %v6495_v21 = vld [vmem:[%s8364_s4 + $0x5e0] sm:$0xff]  }
0x117b   :  { %v3633_v58 = vmax.f32 %v3394_v32, 0.0  ;;  %v3635_v34 = vmax.f32 %v3437_v39, 0.0  ;;  %6082 = vmatprep.subr.bf16.mxu0 %v6482_v29  ;;  %6104 = vmatprep.subr.bf16.mxu1 %v6483_v62  ;;  %v3085_v14 = vrot.slane %v7987_v13, %v7192_v57  ;;  %v3081_v0 = vrot.slane %v7987_v13, %v7194_v59  ;;  %v6494_v59 = vld [vmem:[%s8364_s4 + $0x560] sm:$0xff]  }
0x117c   :  { %v3634_v41 = vmax.f32 %v3396_v22, 0.0  ;;  %v3636_v61 = vmax.f32 %v3439_v49, 0.0  ;;  %v3089_v29 = vrot.slane %v7987_v13, %v7196_v63  ;;  %v6496_v22 = vld [vmem:[%s8364_s4 + $0x520] sm:$0xff]  }
0x117d   :  { %v8021_v3 = vpack.c.bf16 %v3633_v58, %v3617_v47  ;;  %v8023_v52 = vpack.c.bf16 %v3635_v34, %v3619_v18  ;;  %v6497_v49 = vld [vmem:[%s8364_s4 + $0x5a0] sm:$0xff]   ;;  %v6498_v18 = vld [vmem:[%s8364_s4 + $0x568] sm:$0xff]  }
0x117e   :  { %v3650_v5 = vpack.c.bf16 %v3634_v41, %v3618_v40  ;;  %v3652_v44 = vpack.c.bf16 %v3636_v61, %v3620_v60  ;;  %6083 = vmatpush3.bf16.msra.mxu0 %v6484_v15  ;;  %6105 = vmatpush3.bf16.msra.mxu1 %v6485_v50  ;;  %v3475_v12 = vpop.f32.mrb[64].mxu0  ;;  %v3518_v7 = vpop.f32.mrb[48].mxu1  ;;  %v6499_v58 = vld [vmem:[%s8364_s4 + $0x5e8] sm:$0xff]  }
0x117f   :  { %v3476_v42 = vadd.f32 %v3475_v12, %v3061_v46  ;;  %v3519_v19 = vadd.f32 %v3518_v7, %v3069_v25  ;;  %v3477_v11 = vpop.f32.mrb[65].mxu0  ;;  %v3520_v16 = vpop.f32.mrb[49].mxu1  ;;  %6084 = vmatprep.subr.bf16.mxu0 %v6486_v51  ;;  %6106 = vmatprep.subr.bf16.mxu1 %v6487_v20  ;;  %v6500_v7 = vld [vmem:[%s8364_s4 + $0x528] sm:$0xff]  }
0x1180   :  { %v3478_v55 = vadd.f32 %v3477_v11, %v3065_v10  ;;  %v3521_v31 = vadd.f32 %v3520_v16, %v3073_v6  ;;  %v3479_v45 = vpop.f32.mrb[66].mxu0  ;;  %v3522_v1 = vpop.f32.mrb[50].mxu1  ;;  %4801 = vmatprep.mubr.bf16.mxu0 %v3650_v5  ;;  %4842 = vmatprep.mubr.bf16.mxu1 %v3652_v44  ;;  %v6502_v16 = vld [vmem:[%s8364_s4 + $0x570] sm:$0xff]  }
0x1181   :  { %v3480_v35 = vadd.f32 %v3479_v45, %v3061_v46  ;;  %v3523_v36 = vadd.f32 %v3522_v1, %v3069_v25  ;;  %v3481_v37 = vpop.f32.mrb[67].mxu0  ;;  %v3524_v27 = vpop.f32.mrb[51].mxu1  ;;  %v3621_v62 = vmax.f32 %v3476_v42, 0.0  ;;  %v3623_v57 = vmax.f32 %v3519_v19, 0.0 }
0x1182   :  { %v3482_v26 = vadd.f32 %v3481_v37, %v3065_v10  ;;  %v3525_v17 = vadd.f32 %v3524_v27, %v3073_v6  ;;  %6085 = vmatpush3.bf16.msra.mxu0 %v6488_v9  ;;  %6107 = vmatpush3.bf16.msra.mxu1 %v6489_v43  ;;  %v3622_v38 = vmax.f32 %v3478_v55, 0.0  ;;  %v3624_v30 = vmax.f32 %v3521_v31, 0.0  ;;  %v6501_v9 = vld [vmem:[%s8364_s4 + $0x5a8] sm:$0xff]   ;;  %v6504_v37 = vld [vmem:[%s8364_s4 + $0x530] sm:$0xff]  }
0x1183   :  { %v3637_v46 = vmax.f32 %v3480_v35, 0.0  ;;  %v3639_v8 = vmax.f32 %v3523_v36, 0.0  ;;  %6086 = vmatprep.subr.bf16.mxu0 %v6490_v53  ;;  %6108 = vmatprep.subr.bf16.mxu1 %v6491_v28  ;;  %v6503_v53 = vld [vmem:[%s8364_s4 + $0x5f0] sm:$0xff]  }
0x1184   :  { %v3638_v25 = vmax.f32 %v3482_v26, 0.0  ;;  %v3640_v32 = vmax.f32 %v3525_v17, 0.0  ;;  %v6505_v27 = vld [vmem:[%s8364_s4 + $0x5b0] sm:$0xff]   ;;  %v6508_v26 = vld [vmem:[%s8364_s4 + $0x538] sm:$0xff]  }
0x1185   :  { %v8057_v39 = vpack.c.bf16 %v3637_v46, %v3621_v62  ;;  %v8059_v63 = vpack.c.bf16 %v3639_v8, %v3623_v57  ;;  %v6509_v17 = vld [vmem:[%s8364_s4 + $0x5b8] sm:$0xff]   ;;  %v6513_v62 = vld [vmem:[%s8364_s4 + $0x680] sm:$0xff]   ;;  %v6514_v57 = vld [vmem:[%s8364_s4 + $0x648] sm:$0xff]  }
0x1186   :  { %v8061_v13 = vpack.c.bf16 %v3638_v25, %v3622_v38  ;;  %v8063_v23 = vpack.c.bf16 %v3640_v32, %v3624_v30  ;;  %6087 = vmatpush3.bf16.msra.mxu0 %v6492_v4  ;;  %6109 = vmatpush3.bf16.msra.mxu1 %v6493_v56  ;;  %v3561_v24 = vpop.f32.mrb[68].mxu0  ;;  %v3604_v10 = vpop.f32.mrb[52].mxu1  ;;  %v6510_v4 = vld [vmem:[%s8364_s4 + $0x640] sm:$0xff]   ;;  %v6515_v46 = vld [vmem:[%s8364_s4 + $0x6c8] sm:$0xff]   ;;  %v6521_v38 = vld [vmem:[%s8364_s4 + $0x690] sm:$0xff]  }
0x1187   :  { %v3562_v15 = vadd.f32 %v3561_v24, %v3077_v48  ;;  %v3605_v50 = vadd.f32 %v3604_v10, %v3085_v14  ;;  %v3563_v6 = vpop.f32.mrb[69].mxu0  ;;  %v3606_v47 = vpop.f32.mrb[53].mxu1  ;;  %6088 = vmatprep.subr.bf16.mxu0 %v6494_v59  ;;  %6110 = vmatprep.subr.bf16.mxu1 %v6495_v21  ;;  %v6511_v56 = vld [vmem:[%s8364_s4 + $0x6c0] sm:$0xff]   ;;  %v6516_v8 = vld [vmem:[%s8364_s4 + $0x608] sm:$0xff]   ;;  %v6520_v21 = vld [vmem:[%s8364_s4 + $0x610] sm:$0xff]  }
0x1188   :  { %v3564_v34 = vadd.f32 %v3563_v6, %v3081_v0  ;;  %v3607_v51 = vadd.f32 %v3606_v47, %v3089_v29  ;;  %v3565_v20 = vpop.f32.mrb[70].mxu0  ;;  %v3608_v40 = vpop.f32.mrb[54].mxu1  ;;  %v6517_v59 = vld [vmem:[%s8364_s4 + $0x688] sm:$0xff]   ;;  %v6522_v30 = vld [vmem:[%s8364_s4 + $0x658] sm:$0xff]   ;;  %v6527_v24 = vld [vmem:[%s8364_s4 + $0x6e0] sm:$0xff]  }
0x1189   :  { %v3566_v60 = vadd.f32 %v3565_v20, %v3077_v48  ;;  %v3609_v41 = vadd.f32 %v3608_v40, %v3085_v14  ;;  %v3567_v61 = vpop.f32.mrb[71].mxu0  ;;  %v3610_v5 = vpop.f32.mrb[55].mxu1  ;;  %v3625_v43 = vmax.f32 %v3562_v15, 0.0  ;;  %v3627_v42 = vmax.f32 %v3605_v50, 0.0  ;;  %v6506_v14 = vld [vmem:[%s8364_s4 + $0x578] sm:$0xff]   ;;  %v6528_v10 = vld [vmem:[%s8364_s4 + $0x620] sm:$0xff]  }
0x118a   :  { %v3568_v44 = vadd.f32 %v3567_v61, %v3081_v0  ;;  %v3611_v12 = vadd.f32 %v3610_v5, %v3089_v29  ;;  %6089 = vmatpush3.bf16.msra.mxu0 %v6496_v22  ;;  %6111 = vmatpush3.bf16.msra.mxu1 %v6497_v49  ;;  %v3626_v28 = vmax.f32 %v3564_v34, 0.0  ;;  %v3628_v55 = vmax.f32 %v3607_v51, 0.0  ;;  %v6507_v0 = vld [vmem:[%s8364_s4 + $0x5f8] sm:$0xff]   ;;  %v6512_v29 = vld [vmem:[%s8364_s4 + $0x600] sm:$0xff]   ;;  %v6530_v49 = vld [vmem:[%s8364_s4 + $0x668] sm:$0xff]  }
0x118b   :  { %v3641_v19 = vmax.f32 %v3566_v60, 0.0  ;;  %v3643_v11 = vmax.f32 %v3609_v41, 0.0  ;;  %6090 = vmatprep.subr.bf16.mxu0 %v6498_v18  ;;  %6112 = vmatprep.subr.bf16.mxu1 %v6499_v58  ;;  %v6523_v25 = vld [vmem:[%s8364_s4 + $0x6d8] sm:$0xff]   ;;  %v6529_v22 = vld [vmem:[%s8364_s4 + $0x6a0] sm:$0xff]   ;;  %v6531_v15 = vld [vmem:[%s8364_s4 + $0x6e8] sm:$0xff]  }
0x118c   :  { %v3642_v31 = vmax.f32 %v3568_v44, 0.0  ;;  %v3644_v45 = vmax.f32 %v3611_v12, 0.0  ;;  %v6524_v32 = vld [vmem:[%s8364_s4 + $0x618] sm:$0xff]   ;;  %v6532_v50 = vld [vmem:[%s8364_s4 + $0x628] sm:$0xff]   ;;  %v6534_v47 = vld [vmem:[%s8364_s4 + $0x670] sm:$0xff]  }
0x118d   :  { %v8089_v1 = vpack.c.bf16 %v3641_v19, %v3625_v43  ;;  %v8091_v48 = vpack.c.bf16 %v3643_v11, %v3627_v42  ;;  %v6533_v6 = vld [vmem:[%s8364_s4 + $0x6a8] sm:$0xff]   ;;  %v6535_v18 = vld [vmem:[%s8364_s4 + $0x6f0] sm:$0xff]   ;;  %v6538_v51 = vld [vmem:[%s8364_s4 + $0x678] sm:$0xff]  }
0x118e   :  { %v8093_v35 = vpack.c.bf16 %v3642_v31, %v3626_v28  ;;  %v8095_v36 = vpack.c.bf16 %v3644_v45, %v3628_v55  ;;  %6091 = vmatpush3.bf16.msra.mxu0 %v6500_v7  ;;  %6113 = vmatpush3.bf16.msra.mxu1 %v6501_v9  ;;  %v6536_v58 = vld [vmem:[%s8364_s4 + $0x630] sm:$0xff]   ;;  %v6539_v20 = vld [vmem:[%s8364_s4 + $0x6f8] sm:$0xff]   ;;  %v6542_v41 = vld [vmem:[%s8364_s4 + $0x740] sm:$0xff]  }
0x118f   :  { %6092 = vmatprep.subr.bf16.mxu0 %v6502_v16  ;;  %6114 = vmatprep.subr.bf16.mxu1 %v6503_v53  ;;  %v6537_v34 = vld [vmem:[%s8364_s4 + $0x6b0] sm:$0xff]   ;;  %v6540_v40 = vld [vmem:[%s8364_s4 + $0x638] sm:$0xff]   ;;  %v6543_v61 = vld [vmem:[%s8364_s4 + $0x7c0] sm:$0xff]  }
0x1190   :  { %v6541_v60 = vld [vmem:[%s8364_s4 + $0x6b8] sm:$0xff]   ;;  %v6544_v5 = vld [vmem:[%s8364_s4 + $0x700] sm:$0xff]   ;;  %v6546_v12 = vld [vmem:[%s8364_s4 + $0x748] sm:$0xff]  }
0x1191   :  { %v6545_v44 = vld [vmem:[%s8364_s4 + $0x780] sm:$0xff]   ;;  %v6547_v7 = vld [vmem:[%s8364_s4 + $0x7c8] sm:$0xff]   ;;  %v6552_v42 = vld [vmem:[%s8364_s4 + $0x710] sm:$0xff]  }
0x1192   :  { %6093 = vmatpush3.bf16.msra.mxu0 %v6504_v37  ;;  %6115 = vmatpush3.bf16.msra.mxu1 %v6505_v27  ;;  %v6548_v9 = vld [vmem:[%s8364_s4 + $0x708] sm:$0xff]   ;;  %v6553_v19 = vld [vmem:[%s8364_s4 + $0x790] sm:$0xff]   ;;  %v6554_v11 = vld [vmem:[%s8364_s4 + $0x758] sm:$0xff]  }
0x1193   :  { %6094 = vmatprep.subr.bf16.mxu0 %v6506_v14  ;;  %6116 = vmatprep.subr.bf16.mxu1 %v6507_v0  ;;  %v6549_v43 = vld [vmem:[%s8364_s4 + $0x788] sm:$0xff]   ;;  %v6555_v16 = vld [vmem:[%s8364_s4 + $0x7d8] sm:$0xff]   ;;  %v6558_v55 = vld [vmem:[%s8364_s4 + $0x760] sm:$0xff]  }
0x1194   :  { %v6556_v53 = vld [vmem:[%s8364_s4 + $0x718] sm:$0xff]   ;;  %v6559_v31 = vld [vmem:[%s8364_s4 + $0x7e0] sm:$0xff]   ;;  %v6563_v37 = vld [vmem:[%s8364_s4 + $0x7e8] sm:$0xff]  }
0x1195   :  { %v6557_v28 = vld [vmem:[%s8364_s4 + $0x798] sm:$0xff]   ;;  %v6560_v45 = vld [vmem:[%s8364_s4 + $0x720] sm:$0xff]   ;;  %v6564_v27 = vld [vmem:[%s8364_s4 + $0x728] sm:$0xff]  }
0x1196   :  { %6095 = vmatpush3.bf16.msra.mxu0 %v6508_v26  ;;  %6117 = vmatpush3.bf16.msra.mxu1 %v6509_v17  ;;  %v6565_v14 = vld [vmem:[%s8364_s4 + $0x7a8] sm:$0xff]   ;;  %v6566_v0 = vld [vmem:[%s8364_s4 + $0x770] sm:$0xff]  }
0x1197   :  { %6124 = vmatprep.subr.bf16.mxu0 %v6510_v4  ;;  %6146 = vmatprep.subr.bf16.mxu1 %v6511_v56  ;;  %v6567_v26 = vld [vmem:[%s8364_s4 + $0x7f0] sm:$0xff]   ;;  %v6570_v56 = vld [vmem:[%s8364_s4 + $0x778] sm:$0xff]  }
0x1198   :  { %v6568_v17 = vld [vmem:[%s8364_s4 + $0x730] sm:$0xff]  }
0x1199   :  { %4802 = vmatmul.mubr.bf16.vlgmr.msra.gmra.mrb[76].mxu0 %v8021_v3  ;;  %4843 = vmatmul.mubr.bf16.vlgmr.msra.gmra.mrb[60].mxu1 %v8023_v52  ;;  %v6518_v3 = vld [vmem:[%s8364_s4 + $0x650] sm:$0xff]  }
0x119a   :  { %6125 = vmatpush3.bf16.msra.mxu0 %v6512_v29  ;;  %4883 = vmatprep.mubr.bf16.mxu0 %v8061_v13  ;;  %v6519_v52 = vld [vmem:[%s8364_s4 + $0x6d0] sm:$0xff]   ;;  %v6525_v13 = vld [vmem:[%s8364_s4 + $0x698] sm:$0xff]  }
0x119b   :  { %6147 = vmatpush3.bf16.msra.mxu1 %v6513_v62  ;;  %4924 = vmatprep.mubr.bf16.mxu1 %v8063_v23  ;;  %v6526_v23 = vld [vmem:[%s8364_s4 + $0x660] sm:$0xff]   ;;  %v6569_v4 = vld [vmem:[%s8364_s4 + $0x7b0] sm:$0xff]   ;;  %v6571_v29 = vld [vmem:[%s8364_s4 + $0x7f8] sm:$0xff]  }
0x119c   :  { %6126 = vmatprep.subr.bf16.mxu0 %v6514_v57  ;;  %6148 = vmatprep.subr.bf16.mxu1 %v6515_v46  ;;  %v6572_v62 = vld [vmem:[%s8364_s4 + $0x738] sm:$0xff]  }
0x119d   :  { %v6573_v57 = vld [vmem:[%s8364_s4 + $0x7b8] sm:$0xff]  }
0x119e   :  { %6127 = vmatpush3.bf16.msra.mxu0 %v6516_v8 }
0x119f   :  { %6149 = vmatpush3.bf16.msra.mxu1 %v6517_v59  ;;  %6128 = vmatprep.subr.bf16.mxu0 %v6518_v3  ;;  %v5689_v59 = vld [vmem:[%s8365_s5 + $0x85] ss:$0 sm:$0xff] }
0x11a0   :  { %6150 = vmatprep.subr.bf16.mxu1 %v6519_v52 }
0x11a2   :  { %6129 = vmatpush3.bf16.msra.mxu0 %v6520_v21 }
0x11a3   :  { %6151 = vmatpush3.bf16.msra.mxu1 %v6521_v38  ;;  %6130 = vmatprep.subr.bf16.mxu0 %v6522_v30 }
0x11a4   :  { %6152 = vmatprep.subr.bf16.mxu1 %v6523_v25 }
0x11a6   :  { %6131 = vmatpush3.bf16.msra.mxu0 %v6524_v32 }
0x11a7   :  { %6153 = vmatpush3.bf16.msra.mxu1 %v6525_v13  ;;  %6132 = vmatprep.subr.bf16.mxu0 %v6526_v23 }
0x11a8   :  { %6154 = vmatprep.subr.bf16.mxu1 %v6527_v24 }
0x11aa   :  { %6133 = vmatpush3.bf16.msra.mxu0 %v6528_v10 }
0x11ab   :  { %6155 = vmatpush3.bf16.msra.mxu1 %v6529_v22  ;;  %6134 = vmatprep.subr.bf16.mxu0 %v6530_v49 }
0x11ac   :  { %6156 = vmatprep.subr.bf16.mxu1 %v6531_v15 }
0x11ae   :  { %6135 = vmatpush3.bf16.msra.mxu0 %v6532_v50 }
0x11af   :  { %6157 = vmatpush3.bf16.msra.mxu1 %v6533_v6  ;;  %6136 = vmatprep.subr.bf16.mxu0 %v6534_v47 }
0x11b0   :  { %6158 = vmatprep.subr.bf16.mxu1 %v6535_v18 }
0x11b2   :  { %6137 = vmatpush3.bf16.msra.mxu0 %v6536_v58 }
0x11b3   :  { %6159 = vmatpush3.bf16.msra.mxu1 %v6537_v34  ;;  %6138 = vmatprep.subr.bf16.mxu0 %v6538_v51 }
0x11b4   :  { %6160 = vmatprep.subr.bf16.mxu1 %v6539_v20 }
0x11b6   :  { %6139 = vmatpush3.bf16.msra.mxu0 %v6540_v40 }
0x11b7   :  { %6161 = vmatpush3.bf16.msra.mxu1 %v6541_v60  ;;  %6168 = vmatprep.subr.bf16.mxu0 %v6542_v41 }
0x11b8   :  { %6190 = vmatprep.subr.bf16.mxu1 %v6543_v61 }
0x11b9   :  { %4884 = vmatmul.mubr.bf16.vlgmr.msra.gmra.mrb[80].mxu0 %v8057_v39  ;;  %v6550_v39 = vld [vmem:[%s8364_s4 + $0x750] sm:$0xff]  }
0x11ba   :  { %4925 = vmatmul.mubr.bf16.vlgmr.msra.gmra.mrb[64].mxu1 %v8059_v63  ;;  %6169 = vmatpush3.bf16.msra.mxu0 %v6544_v5  ;;  %v6551_v63 = vld [vmem:[%s8364_s4 + $0x7d0] sm:$0xff]  }
0x11bb   :  { %4965 = vmatprep.mubr.bf16.mxu0 %v8093_v35  ;;  %6191 = vmatpush3.bf16.msra.mxu1 %v6545_v44  ;;  %v6561_v35 = vld [vmem:[%s8364_s4 + $0x7a0] sm:$0xff]  }
0x11bc   :  { %5006 = vmatprep.mubr.bf16.mxu1 %v8095_v36  ;;  %6170 = vmatprep.subr.bf16.mxu0 %v6546_v12  ;;  %v6562_v36 = vld [vmem:[%s8364_s4 + $0x768] sm:$0xff]  }
0x11bd   :  { %6192 = vmatprep.subr.bf16.mxu1 %v6547_v7 }
0x11be   :  { %6171 = vmatpush3.bf16.msra.mxu0 %v6548_v9 }
0x11bf   :  { %6193 = vmatpush3.bf16.msra.mxu1 %v6549_v43  ;;  %6172 = vmatprep.subr.bf16.mxu0 %v6550_v39 }
0x11c0   :  { %6194 = vmatprep.subr.bf16.mxu1 %v6551_v63 }
0x11c2   :  { %6173 = vmatpush3.bf16.msra.mxu0 %v6552_v42 }
0x11c3   :  { %6195 = vmatpush3.bf16.msra.mxu1 %v6553_v19  ;;  %6174 = vmatprep.subr.bf16.mxu0 %v6554_v11 }
0x11c4   :  { %6196 = vmatprep.subr.bf16.mxu1 %v6555_v16 }
0x11c6   :  { %6175 = vmatpush3.bf16.msra.mxu0 %v6556_v53 }
0x11c7   :  { %6197 = vmatpush3.bf16.msra.mxu1 %v6557_v28  ;;  %6176 = vmatprep.subr.bf16.mxu0 %v6558_v55 }
0x11c8   :  { %6198 = vmatprep.subr.bf16.mxu1 %v6559_v31 }
0x11ca   :  { %6177 = vmatpush3.bf16.msra.mxu0 %v6560_v45 }
0x11cb   :  { %6199 = vmatpush3.bf16.msra.mxu1 %v6561_v35  ;;  %6178 = vmatprep.subr.bf16.mxu0 %v6562_v36 }
0x11cc   :  { %6200 = vmatprep.subr.bf16.mxu1 %v6563_v37 }
0x11ce   :  { %6179 = vmatpush3.bf16.msra.mxu0 %v6564_v27 }
0x11cf   :  { %6201 = vmatpush3.bf16.msra.mxu1 %v6565_v14  ;;  %6180 = vmatprep.subr.bf16.mxu0 %v6566_v0 }
0x11d0   :  { %6202 = vmatprep.subr.bf16.mxu1 %v6567_v26 }
0x11d2   :  { %6181 = vmatpush3.bf16.msra.mxu0 %v6568_v17 }
0x11d3   :  { %6203 = vmatpush3.bf16.msra.mxu1 %v6569_v4  ;;  %6182 = vmatprep.subr.bf16.mxu0 %v6570_v56 }
0x11d4   :  { %6204 = vmatprep.subr.bf16.mxu1 %v6571_v29 }
0x11d6   :  { %6183 = vmatpush3.bf16.msra.mxu0 %v6572_v62 }
0x11d7   :  { %6205 = vmatpush3.bf16.msra.mxu1 %v6573_v57  ;;  %6295 = vmatprep.subr.bf16.mxu0 %v6636_v2 }
0x11d9   :  { %4966 = vmatmul.mubr.bf16.vlgmr.msra.gmra.mrb[84].mxu0 %v8089_v1 }
0x11da   :  { %5007 = vmatmul.mubr.bf16.vlgmr.msra.gmra.mrb[68].mxu1 %v8091_v48  ;;  %6299 = vmatprep.mubr.msk.bf16.mxu0 %vm6637_vm0, %v6636_v2  ;;  %vm5074_vm0 = vcmask 1041409  }
0x124c   :  { %v6052_v46 = vpop.f32.mrb[72].mxu0  ;;  %v6074_v8 = vpop.f32.mrb[56].mxu1 }
0x124d   :  { %v6053_v3 = vpop.f32.mrb[73].mxu0  ;;  %v6075_v52 = vpop.f32.mrb[57].mxu1 }
0x124e   :  { %v6054_v21 = vadd.f32 %v6053_v3, %v6052_v46  ;;  %v6076_v38 = vadd.f32 %v6075_v52, %v6074_v8  ;;  %v6055_v30 = vpop.f32.mrb[74].mxu0  ;;  %v6077_v25 = vpop.f32.mrb[58].mxu1 }
0x124f   :  { %v6056_v32 = vpop.f32.mrb[75].mxu0  ;;  %v6078_v13 = vpop.f32.mrb[59].mxu1 }
0x1250   :  { %v4722_v1 = vadd.f32 %v6054_v21, %v5689_v59  ;;  %v6057_v23 = vadd.f32 %v6056_v32, %v6055_v30  ;;  %v6079_v48 = vadd.f32 %v6078_v13, %v6077_v25 }
0x1252   :  { %v4763_v24 = vadd.f32 %v6076_v38, %v4722_v1  ;;  %v4725_v10 = vadd.f32 %v6057_v23, %v5689_v59 }
0x1254   :  { %v4766_v22 = vadd.f32 %v6079_v48, %v4725_v10 }
0x126c   :  { %v6096_v49 = vpop.f32.mrb[76].mxu0  ;;  %v6118_v15 = vpop.f32.mrb[60].mxu1 }
0x126d   :  { %v6097_v50 = vpop.f32.mrb[77].mxu0  ;;  %v6119_v6 = vpop.f32.mrb[61].mxu1 }
0x126e   :  { %v6098_v47 = vadd.f32 %v6097_v50, %v6096_v49  ;;  %v6120_v18 = vadd.f32 %v6119_v6, %v6118_v15  ;;  %v6099_v58 = vpop.f32.mrb[78].mxu0  ;;  %v6121_v34 = vpop.f32.mrb[62].mxu1  ;;  %v6575_v49 = vld [vmem:[%s8362_s2 + $0x28] sm:$0xff]  }
0x126f   :  { %v6100_v51 = vpop.f32.mrb[79].mxu0  ;;  %v6122_v20 = vpop.f32.mrb[63].mxu1 }
0x1270   :  { %v4804_v40 = vadd.f32 %v6098_v47, %v4763_v24  ;;  %v6101_v60 = vadd.f32 %v6100_v51, %v6099_v58  ;;  %v6123_v41 = vadd.f32 %v6122_v20, %v6121_v34  ;;  %v5818_v51 = vld [vmem:[%s8365_s5 + $0x86] ss:$0 sm:$0xff] }
0x1272   :  { %v4845_v61 = vadd.f32 %v6120_v18, %v4804_v40  ;;  %v4807_v5 = vadd.f32 %v6101_v60, %v4766_v22 }
0x1274   :  { %v4848_v44 = vadd.f32 %v6123_v41, %v4807_v5 }
0x128c   :  { %v6140_v12 = vpop.f32.mrb[80].mxu0 }
0x128d   :  { %v6162_v7 = vpop.f32.mrb[64].mxu1  ;;  %v6141_v9 = vpop.f32.mrb[81].mxu0 }
0x128e   :  { %v6142_v43 = vadd.f32 %v6141_v9, %v6140_v12  ;;  %v6163_v39 = vpop.f32.mrb[65].mxu1  ;;  %v6143_v63 = vpop.f32.mrb[82].mxu0 }
0x128f   :  { %v6164_v42 = vadd.f32 %v6163_v39, %v6162_v7  ;;  %v6165_v19 = vpop.f32.mrb[66].mxu1  ;;  %v6144_v11 = vpop.f32.mrb[83].mxu0 }
0x1290   :  { %v4886_v16 = vadd.f32 %v6142_v43, %v4845_v61  ;;  %v6145_v53 = vadd.f32 %v6144_v11, %v6143_v63  ;;  %v6166_v28 = vpop.f32.mrb[67].mxu1 }
0x1291   :  { %v6167_v55 = vadd.f32 %v6166_v28, %v6165_v19 }
0x1292   :  { %v4927_v31 = vadd.f32 %v6164_v42, %v4886_v16  ;;  %v4889_v45 = vadd.f32 %v6145_v53, %v4848_v44 }
0x1294   :  { %v4930_v35 = vadd.f32 %v6167_v55, %v4889_v45 }
0x12ac   :  { %v6184_v36 = vpop.f32.mrb[84].mxu0 }
0x12ad   :  { %v6206_v37 = vpop.f32.mrb[68].mxu1  ;;  %v6185_v27 = vpop.f32.mrb[85].mxu0 }
0x12ae   :  { %v6186_v14 = vadd.f32 %v6185_v27, %v6184_v36  ;;  %v6207_v0 = vpop.f32.mrb[69].mxu1  ;;  %v6187_v26 = vpop.f32.mrb[86].mxu0 }
0x12af   :  { %v6208_v17 = vadd.f32 %v6207_v0, %v6206_v37  ;;  %v6209_v4 = vpop.f32.mrb[70].mxu1  ;;  %v6188_v56 = vpop.f32.mrb[87].mxu0  ;;  %v5827_v0 = vld [vmem:[%s8365_s5 + $0x100] ss:$0 sm:$0xff] }
0x12b0   :  { %v4968_v29 = vadd.f32 %v6186_v14, %v4927_v31  ;;  %v6189_v62 = vadd.f32 %v6188_v56, %v6187_v26  ;;  %v6210_v57 = vpop.f32.mrb[71].mxu1 }
0x12b1   :  { %v6211_v46 = vadd.f32 %v6210_v57, %v6209_v4 }
0x12b2   :  { %v5009_v8 = vadd.f32 %v6208_v17, %v4968_v29  ;;  %v4971_v59 = vadd.f32 %v6189_v62, %v4930_v35 }
0x12b4   :  { %v5012_v3 = vadd.f32 %v6211_v46, %v4971_v59  ;;  %v5015_v52 = vadd.f32 %v5009_v8, %v7787_v33 }
0x12b6   :  { %v5019_v21 = vsel %vm81_vm9, %v5015_v52, 0.0  ;;  %v5016_v38 = vadd.f32 %v5012_v3, %v7789_v54  ;;  %v6574_v54 = vld [vmem:[%s8362_s2 + $0x20] sm:$0xff]  }
0x12b7   :  { %5020 = vadd.xlane.f32.xlu1 %v5019_v21  ;;  %6296 = vmatpush3.bf16.msra.mxu0 %v6574_v54 }
0x12b8   :  { %v5022_v30 = vsel %vm81_vm9, %v5016_v38, 0.0  ;;  %6297 = vmatprep.subr.bf16.mxu0 %v6636_v2  ;;  %v5819_v2 = vld [vmem:[%s8365_s5 + $0x87] ss:$0 sm:$0xff] }
0x12b9   :  { %5023 = vadd.xlane.f32.xlu0 %v5022_v30 }
0x12bb   :  { %6298 = vmatpush3.bf16.msra.mxu0 %v6575_v49 }
0x1344   :  { %v5021_v25 = vpop.xlane.xlu1 %5020 }
0x1345   :  { %v5025_v32 = vmul.f32 0.03125, %v5021_v25 }
0x1346   :  { %v5024_v13 = vpop.xlane.xlu0 %5023 }
0x1347   :  { %v5027_v1 = vsub.f32 %v5015_v52, %v5025_v32  ;;  %v5026_v23 = vmul.f32 0.03125, %v5024_v13 }
0x1349   :  { %v5028_v48 = vsub.f32 %v5016_v38, %v5026_v23  ;;  %v5029_v24 = vmul.f32 %v5027_v1, %v5027_v1 }
0x134b   :  { %v5031_v10 = vsel %vm81_vm9, %v5029_v24, 0.0  ;;  %v5030_v22 = vmul.f32 %v5028_v48, %v5028_v48 }
0x134c   :  { %5032 = vadd.xlane.f32.xlu1 %v5031_v10 }
0x134d   :  { %v5034_v33 = vsel %vm81_vm9, %v5030_v22, 0.0 }
0x134e   :  { %5035 = vadd.xlane.f32.xlu0 %v5034_v33 }
0x13d9   :  { %v5033_v15 = vpop.xlane.xlu1 %5032 }
0x13da   :  { %v5037_v50 = vmul.f32 0.03125, %v5033_v15 }
0x13db   :  { %v5036_v6 = vpop.xlane.xlu0 %5035 }
0x13dc   :  { %v5039_v47 = vadd.f32 1e-05, %v5037_v50  ;;  %v5038_v18 = vmul.f32 0.03125, %v5036_v6 }
0x13de   :  { %6604 = vrsqrt.f32 %v5039_v47  ;;  %v5040_v58 = vadd.f32 1e-05, %v5038_v18 }
0x13e0   :  { %6606 = vrsqrt.f32 %v5040_v58 }
0x13e8   :  { %v6605_v34 = vpop.eup %6604 }
0x13e9   :  { %v5043_v20 = vmul.f32 %v6605_v34, %v5027_v1 }
0x13ea   :  { %v6607_v40 = vpop.eup %6606 }
0x13eb   :  { %v5045_v60 = vmul.f32 %v5818_v51, %v5043_v20  ;;  %v5044_v41 = vmul.f32 %v6607_v40, %v5028_v48 }
0x13ed   :  { %v5047_v61 = vadd.f32 %v5819_v2, %v5045_v60  ;;  %v5046_v5 = vmul.f32 %v5818_v51, %v5044_v41 }
0x13ef   :  { %v5049_v44 = vsel %vm81_vm9, %v5047_v61, 0.0  ;;  %v5048_v12 = vadd.f32 %v5819_v2, %v5046_v5 }
0x13f0   :  { %v5050_v7 = vrot.slane %v5049_v44, 4 }
0x13f1   :  { %v5056_v9 = vsel %vm81_vm9, %v5048_v12, 0.0 }
0x13f2   :  { %v5051_v43 = vadd.f32 %v5050_v7, %v5049_v44  ;;  %v5057_v39 = vrot.slane %v5056_v9, 4 }
0x13f4   :  { %v5052_v63 = vrot.slane %v5051_v43, 2  ;;  %v5058_v42 = vadd.f32 %v5057_v39, %v5056_v9 }
0x13f6   :  { %v5059_v19 = vrot.slane %v5058_v42, 2  ;;  %v5053_v11 = vadd.f32 %v5052_v63, %v5051_v43 }
0x13f8   :  { %v5054_v16 = vrot.slane %v5053_v11, 1  ;;  %v5060_v53 = vadd.f32 %v5059_v19, %v5058_v42 }
0x13fa   :  { %v5055_v28 = vadd.f32 %v5054_v16, %v5053_v11  ;;  %v5061_v55 = vrot.slane %v5060_v53, 1 }
0x13fc   :  { %v5062_v31 = vadd.f32 %v5061_v55, %v5060_v53  ;;  %v5063_v45 = vpack.c.bf16 %v5055_v28, %v5055_v28 }
0x13fe   :  { %v5064_v35 = vpack.c.bf16 %v5062_v31, %v5062_v31  ;;  %v5072_v36 = vunpack.c.l.b16 %v5063_v45 }
0x1400   :  { %v5073_v37 = vunpack.c.l.b16 %v5064_v35 }
0x1402   :  { %v5075_v27 = vsel %vm5074_vm0, %v5073_v37, %v5072_v36 }
0x1403   :  { %v5076_v14 = vpack.c.b16 %v5075_v27, %v5075_v27 }
0x1405   :  { %6300 = vmatmul.mubr.msk.bf16.vlgmr.msra.gmra.mrb[88].mxu0 %vm81_vm9, %v5076_v14 }
0x14d8   :  { %v5126_v26 = vpop.f32.mrb[88].mxu0 }
0x14d9   :  { %v5134_v17 = vadd.f32 %v5827_v0, %v5126_v26  ;;  %v6301_v4 = vpop.f32.mrb[89].mxu0 }
0x14da   :  { %v5129_v56 = vpop.f32.mrb[90].mxu0 }
0x14db   :  { %v6302_v29 = vpop.f32.mrb[91].mxu0  ;;  %5136 = vst.msk [vmem:[#allocation2] sm:$0x3] %vm5135_vm5, %v5134_v17 }
0x14dc   :  { %6623 = shalt.err (!%p6620_p4)
}
0x14dd   :  { %s6624_s5 = scalar_lea.hbm %s8366_s6, 32 }
0x14de   :  { %p6625_p5 = scmp.ne.s32.totalorder %s8366_s6, %s6624_s5  ;;  %p6628_p6 = scmp.lt.u32.totalorder %s6624_s5, %s8366_s6 }
0x14e0   :  { %p6630_p7 = pnand %p6628_p6, %p6625_p5 }
0x14e2   :  { %6633 = shalt.err (!%p6630_p7)
}
0x14e3   :  { %5146 = dma.vmem_to_hbm [thread:$0]  %s5144_s0, 32, %s8366_s6, [#allocation3]  }
0x14e4   :  { %6634 = dma.done.wait [#allocation3], 32  }
0x14e5   :  { %6635 = vsyncadd [#allocation3], 4294967264 }
0x14e6   :  { %5150 = vsyncpa [#allocation3], 1 }

</bundles_post_ra>
